<compile_context>
chip_gen: v7x
topology: tpu7x:2x2x1
jax: 0.10.0
libtpu: 0.0.40
codegen_flags: <defaults>
</compile_context>

<pallas_src>
import jax
import jax.numpy as jnp
from jax.experimental import pallas as pl
from jax.experimental.pallas import tpu as pltpu

M_DIM = 1          # batch rows (from the module: x610 = randn([1, 2048]))
K_DIM = 2048       # in_features
N_DIM = 1000       # out_features
TN = 512           # N tile (after padding N -> 1024 this is 2 parallel blocks)


def linear_kernel(x_ref, w_ref, b_ref, o_ref):
    """One N-tile of  o = x @ w + b  (full K in a single MXU call)."""
    o_ref[...] = (
        jnp.dot(x_ref[...], w_ref[...], preferred_element_type=jnp.float32)
        + b_ref[...]
    ).astype(o_ref.dtype)


def linear_pallas(x, w_kn, b_row):
    """x: [M, K] f32, w_kn: [K, N] f32 (transposed PyTorch weight), b_row: [1, N]."""
    m, k = x.shape
    _, n = w_kn.shape

    # Pad N up to a lane multiple (1000 -> 1024) with zero columns.
    n_pad = pl.cdiv(n, 128) * 128
    if n_pad != n:
        w_kn = jnp.pad(w_kn, ((0, 0), (0, n_pad - n)))
        b_row = jnp.pad(b_row, ((0, 0), (0, n_pad - n)))

    tn = min(TN, n_pad)
    assert n_pad % tn == 0

    out = pl.pallas_call(
        linear_kernel,
        out_shape=jax.ShapeDtypeStruct((m, n_pad), x.dtype),
        grid_spec=pltpu.PrefetchScalarGridSpec(
            num_scalar_prefetch=0,
            grid=(n_pad // tn,),                               # 2 parallel N blocks
            in_specs=[
                pl.BlockSpec((m, k), lambda j: (0, 0)),        # x fully resident
                pl.BlockSpec((k, tn), lambda j: (0, j)),       # weight column block
                pl.BlockSpec((1, tn), lambda j: (0, j)),       # bias column block
            ],
            out_specs=pl.BlockSpec((m, tn), lambda j: (0, j)),
        ),
        compiler_params=pltpu.CompilerParams(
            dimension_semantics=("parallel",),  # independent N blocks -> megacore
        ),
    )(x, w_kn, b_row)

    return out[:, :n]


def init_params(key):
    """Deterministic init mimicking nn.Linear (uniform(-1/sqrt(K), 1/sqrt(K)))."""
    kw, kb = jax.random.split(key)
    bound = 1.0 / jnp.sqrt(jnp.float32(K_DIM))
    # PyTorch weight is [N, K]; keep that convention, transpose for the kernel.
    w_nk = jax.random.uniform(kw, (N_DIM, K_DIM), jnp.float32, -bound, bound)
    b = jax.random.uniform(kb, (N_DIM,), jnp.float32, -bound, bound)
    return w_nk, b


if __name__ == "__main__":
    key = jax.random.PRNGKey(0)
    k_x, k_p = jax.random.split(key)

    x = jax.random.normal(k_x, (M_DIM, K_DIM), jnp.float32)   # x610
    w_nk, b = init_params(k_p)

    w_kn = w_nk.T                      # [K, N] layout for the kernel
    b_row = b.reshape(1, N_DIM)        # [1, N] for broadcasting in-kernel

    out = linear_pallas(x, w_kn, b_row)
    out = jax.block_until_ready(out)

    # Reference check (plain JAX).
    ref = x @ w_kn + b_row
    assert out.shape == (M_DIM, N_DIM)
    assert jnp.allclose(out, ref, atol=1e-4, rtol=1e-4)

    print("KERNEL_OK")
</pallas_src>

<mosaic_0001>
module attributes {stable_mosaic.version = 11 : i64} {
  func.func @linear_kernel(%arg0: i32, %arg1: memref<1x2048xf32, #tpu.memory_space<vmem>>, %arg2: memref<2048x512xf32, #tpu.memory_space<vmem>>, %arg3: memref<1x512xf32, #tpu.memory_space<vmem>>, %arg4: memref<1x512xf32, #tpu.memory_space<vmem>>) attributes {dimension_semantics = [#tpu.dimension_semantics<parallel>], iteration_bounds = array<i64: 2>, scalar_prefetch = 0 : i64, scratch_operands = 0 : i64, tpu.core_type = #tpu.core_type<tc>, window_params = [{pipeline_mode = #tpu.pipeline_mode<synchronous>, transform_indices = @transform_0, window_bounds = array<i64: 1, 2048>}, {transform_indices = @transform_1, window_bounds = array<i64: 2048, 512>}, {transform_indices = @transform_2, window_bounds = array<i64: 1, 512>}, {transform_indices = @transform_3, window_bounds = array<i64: 1, 512>}]} {
    %c0 = arith.constant 0 : index
    %c0_0 = arith.constant 0 : index
    %0 = vector.load %arg1[%c0, %c0_0] : memref<1x2048xf32, #tpu.memory_space<vmem>>, vector<1x2048xf32>
    %c0_1 = arith.constant 0 : index
    %c0_2 = arith.constant 0 : index
    %1 = vector.load %arg2[%c0_1, %c0_2] : memref<2048x512xf32, #tpu.memory_space<vmem>>, vector<2048x512xf32>
    %cst = arith.constant dense<0.000000e+00> : vector<1x512xf32>
    %2 = tpu.matmul %0, %1, %cst {dimension_numbers = #tpu.dot_dimension_numbers<[1], [0], [0], [1], [0, 0, 1, 1], [], []>} : vector<1x2048xf32>, vector<2048x512xf32>, vector<1x512xf32> -> vector<1x512xf32>
    %c0_3 = arith.constant 0 : index
    %c0_4 = arith.constant 0 : index
    %3 = vector.load %arg3[%c0_3, %c0_4] : memref<1x512xf32, #tpu.memory_space<vmem>>, vector<1x512xf32>
    %4 = arith.addf %2, %3 : vector<1x512xf32>
    %c0_5 = arith.constant 0 : index
    %c0_6 = arith.constant 0 : index
    %5 = vector.load %arg4[%c0_5, %c0_6] : memref<1x512xf32, #tpu.memory_space<vmem>>, vector<1x512xf32>
    tpu.vector_store %arg4[%c0_5, %c0_6], %4 {strides = array<i32>} : memref<1x512xf32, #tpu.memory_space<vmem>>, vector<1x512xf32>,
    return
  }
  func.func @transform_0(%arg0: i32) -> (i32, i32) {
    %c0_i32 = arith.constant 0 : i32
    %c0_i32_0 = arith.constant 0 : i32
    %c0_i32_1 = arith.constant 0 : i32
    return %c0_i32, %c0_i32_0 : i32, i32
  }
  func.func @transform_1(%arg0: i32) -> (i32, i32) {
    %c0_i32 = arith.constant 0 : i32
    %c0_i32_0 = arith.constant 0 : i32
    return %c0_i32, %arg0 : i32, i32
  }
  func.func @transform_2(%arg0: i32) -> (i32, i32) {
    %c0_i32 = arith.constant 0 : i32
    %c0_i32_0 = arith.constant 0 : i32
    return %c0_i32, %arg0 : i32, i32
  }
  func.func @transform_3(%arg0: i32) -> (i32, i32) {
    %c0_i32 = arith.constant 0 : i32
    %c0_i32_0 = arith.constant 0 : i32
    return %c0_i32, %arg0 : i32, i32
  }
}

</mosaic_0001>

<bundles_post_ra>
// kernel: tpu_custom_call.1
= control target key start
LH: loop header
LB: loop body
LE: loop exit
PB: predicated region body
PF: predicated region fallthrough
CT: control target
= control target key end

     0   :  { %8 = vsyncpa [#allocation3], 0  ;;  %s5325_s0 = inlined_call_operand.hbm [shape: f32[1,2048], index: 0, kind: input, shape index: {}]   ;;  %s5326_s1 = inlined_call_operand.hbm [shape: f32[2048,1024], index: 1, kind: input, shape index: {}]   ;;  %s5327_s2 = inlined_call_operand.hbm [shape: f32[1,1024], index: 2, kind: input, shape index: {}]   ;;  %s5328_s3 = inlined_call_operand.hbm [shape: f32[1,1024], index: 3, kind: output, shape index: {}]  }
   0x1   :  { %9 = vsyncpa [#allocation6], 0 }
   0x2   :  { %11 = vsyncpa [#allocation6 + $0x1], 0 }
   0x3   :  { %12 = vsyncpa [#allocation4], 0 }
   0x4   :  { %14 = vsyncpa [#allocation4 + $0x1], 0  ;;  %s3993_s12 = smov 0   ;;  %s3995_s13 = smov 0  }
   0x5   :  { %s3997_s14 = smov 0   ;;  %s3999_s15 = smov 0  }
   0x6 LB: > { %s4014_s16 = sadd.s32 1, %s3963_s15   ;;  %s48_s17 = sadd.s32 1, %s3959_s14  ;;  %s3963_s15 = sphi %s3999_s15, %s5355_s15   ;;  %s3959_s14 = sphi %s3997_s14, %s5354_s14   ;;  %s3955_s13 = sphi %s3995_s13, %s5353_s13   ;;  %s3951_s12 = sphi %s3993_s12, %s5352_s12  }
   0x7   : > { %s45_s18 = ssub.s32 %s3963_s15, %s4014_s16  ;;  %p55_p0 = scmp.ne.s32.totalorder %s3959_s14, %s3955_s13 }
   0x8   : > { %p46_p1 = scmp.eq.s32.totalorder %s45_s18, 0  ;;  %p56_p2 = scmp.eq.s32.totalorder %s3963_s15, 0 }
   0x9   : > { %p3762_p4 = scmp.lt.s32.totalorder %s3963_s15, 2  ;;  %s148_s20 = sand.u32 1, %s3963_s15  }
   0xa   : > { %s4025_s19 = scalar_select %p46_p1, %s3959_s14, %s48_s17  }
   0xb   : > { %p57_p5 = por %p56_p2, %p55_p0  ;;  %s150_s21 = sand.u32 1, %s3959_s14  }
   0xc   : > { %s2661_s22 = sshll.u32 %s150_s21, 13  ;;  %s2677_s23 = sshll.u32 %s3963_s15, 9 }
   0xd   : > { %s4038_s26 = scalar_lea.hbm %s5326_s1, %s2677_s23  ;;  %s152_s27 = scalar_lea.vmem [#allocation5], %s2661_s22 }
   0xe   : > { %s159_s28 = sshll.u32 %s152_s27, 4  ;;  %p4040_p6 = pnand %p3762_p4, %p57_p5  ;;  %s4044_s28 = int_to_ptr.vmem [resolvable:$true] %s159_s28 }
   0xf   : > { %s4046_s30 = scalar_lea.sflag [#allocation6], %s148_s20  ;;  %s3805_s4 = scalar_lea.hbm %s4038_s26, 131072 }
  0x10   : > { %s5336_s29 = scalar_select %p4040_p6, 1, 0 }
  0x11   : > { %p3806_p7 = scmp.ne.s32.totalorder %s4038_s26, %s3805_s4  ;;  %p5330_p8 = pneg %p4040_p6 }
  0x12   : > { %s3810_s7 = scalar_lea.hbm %s5326_s1, 262144  ;;  %p3811_p11 = scmp.lt.u32.totalorder %s4038_s26, %s5326_s1 }
  0x13   : > { %p3808_p9 = pnand %p5330_p8, %p3806_p7  ;;  %p3812_p12 = scmp.lt.u32.totalorder %s3810_s7, %s3805_s4 }
  0x14   : > { %p3814_p1 = scmp.lt.u32.totalorder %s3805_s4, %s4038_s26 }
  0x15   : > { %p3809_p10 = pneg %p3808_p9  ;;  %p3813_p13 = por %p3812_p12, %p3811_p11 }
  0x17   : > { %p3815_p2 = por %p3814_p1, %p3813_p13 }
  0x19   : > { %p3816_p4 = pnand %p3815_p2, %p3809_p10 }
  0x1b   : > { %3819 = shalt.err (!%p3816_p4)
}
  0x1c   : > { %s3820_s10 = scalar_lea.vmem %s4044_s28, 131072  ;;  %s3965_s11 = smov [#allocation5]  }
  0x1d   : > { %p3821_p5 = scmp.ne.s32.totalorder %s4044_s28, %s3820_s10  ;;  %s3825_s17 = sshll.u32 %s3965_s11, 4  ;;  %s3826_s17 = int_to_ptr.vmem [resolvable:$false] %s3825_s17 }
  0x1e   : > { %s3827_s18 = scalar_lea.vmem %s3826_s17, 262144  ;;  %p3828_p3 = scmp.lt.s32.totalorder %s4044_s28, %s3826_s17 }
  0x1f   : > { %p3823_p7 = pnand %p3821_p5, %p5330_p8  ;;  %p3829_p11 = scmp.lt.s32.totalorder %s3827_s18, %s3820_s10 }
  0x21   : > { %p3824_p9 = pneg %p3823_p7  ;;  %p3830_p12 = por %p3829_p11, %p3828_p3 }
  0x23   : > { %p3831_p13 = pnand %p3830_p12, %p3824_p9 }
  0x25   : > { %3834 = shalt.err (!%p3831_p13)
}
  0x26   : > { %s3966_s20 = smov 1024   ;;  %s3967_s22 = smov 512  }
  0x27   : > { %s3968_s23 = smov 32   ;;  %s4075_s24 = sadd.s32 4294967295, %s3963_s15  }
  0x28   : > { %3753 = dma.hbm_to_vmem [thread:$0]  (!%p4040_p6), %s4038_s26, 131072, %s4044_s28, %s4046_s30, %s3966_s20, %s3967_s22, %s3968_s23  }
  0x29   : > { %s2657_s25 = sadd.s32 4294967294, %s3963_s15   ;;  %p61_p3 = scmp.ne.s32.totalorder %s3955_s13, %s3951_s12 }
  0x2a   : > { %p5329_p10 = scmp.eq.s32.totalorder %s4075_s24, 0  ;;  %p111_p1 = scmp.eq.s32.totalorder %s4075_s24, 1 }
  0x2b   : > { %p117_p2 = scmp.eq.s32.totalorder %s2657_s25, 1  ;;  %p2658_p4 = scmp.ge.s32.totalorder %s3963_s15, 1 }
  0x2c   : > { %p4085_p5 = por %p5329_p10, %p61_p3  ;;  %p4092_p7 = por %p111_p1, %p55_p0 }
  0x2d   : > { %p4096_p9 = por %p117_p2, %p61_p3  ;;  %p124_p11 = scmp.lt.s32.totalorder %s3963_s15, 3 }
  0x2e   : > { %s5337_s27 = scalar_select %p4085_p5, 1, 0 }
  0x2f   : > { %s5338_s26 = scalar_select %p4092_p7, 1, 0 }
  0x30   : > { %s5339_s28 = scalar_select %p4096_p9, 1, 0 }
  0x31   : > { %p4101_p12 = pnand %p2658_p4, %p124_p11  ;;  %s3969_s5 = smov [#allocation2]  }
  0x32   : > { %s137_s6 = sshll.u32 %s3969_s5, 4  ;;  %s2664_s7 = sshll.u32 %s150_s21, 2  ;;  %s138_s6 = int_to_ptr.vmem [resolvable:$true] %s137_s6 }
  0x33   : > { %s5340_s4 = scalar_select %p4101_p12, 1, 0 }
  0x34   : > { %p3746_p13 = pneg %p4101_p12  ;;  %s2678_s8 = sshll.u32 %s3963_s15, 6 }
  0x35   : > { %s173_s9 = scalar_lea.vmem [#allocation7], %s2664_s7  ;;  %s4119_s20 = scalar_lea.hbm %s5327_s2, %s2678_s8 }
  0x36   : > { %s181_s10 = sshll.u32 %s173_s9, 4  ;;  %p4112_p0 = pnand %p3746_p13, %p5329_p10  ;;  %s4121_s10 = int_to_ptr.vmem [resolvable:$true] %s181_s10 }
  0x37   : > { %s3835_s23 = scalar_lea.hbm %s5325_s0, 256 }
  0x38   : > { %p3836_p3 = scmp.ne.s32.totalorder %s5325_s0, %s3835_s23  ;;  %p3837_p1 = pneg %p4112_p0 }
  0x39   : > { %p3842_p11 = scmp.lt.u32.totalorder %s3835_s23, %s5325_s0 }
  0x3a   : > { %p3838_p2 = pnand %p3837_p1, %p3836_p3 }
  0x3c   : > { %p3839_p4 = pneg %p3838_p2 }
  0x3e   : > { %p3844_p13 = pnand %p3842_p11, %p3839_p4 }
  0x40   : > { %3847 = shalt.err (!%p3844_p13)
}
  0x41   : > { %s3848_s8 = scalar_lea.vmem %s138_s6, 256  ;;  %p3856_p7 = scmp.lt.s32.totalorder %s138_s6, %s138_s6 }
  0x42   : > { %p3849_p10 = scmp.ne.s32.totalorder %s138_s6, %s3848_s8  ;;  %p3857_p5 = scmp.lt.s32.totalorder %s3848_s8, %s3848_s8 }
  0x44   : > { %p3851_p8 = pnand %p3849_p10, %p3837_p1  ;;  %p3858_p12 = por %p3857_p5, %p3856_p7 }
  0x46   : > { %p3852_p9 = pneg %p3851_p8 }
  0x48   : > { %p3859_p6 = pnand %p3858_p12, %p3852_p9 }
  0x4a   : > { %3862 = shalt.err (!%p3859_p6)
}
  0x4b   : > { %3749 = dma.hbm_to_vmem [thread:$0]  (!%p4112_p0), %s5325_s0, 256, %s138_s6, [#allocation3]  }
  0x4c   : > { %s3863_s21 = scalar_lea.hbm %s4119_s20, 64  ;;  %p5342_p10 = scmp.ne.s32.totalorder %s5336_s29, 0 }
  0x4d   : > { %p3864_p3 = scmp.ne.s32.totalorder %s4119_s20, %s3863_s21  ;;  %s3868_s25 = scalar_lea.hbm %s5327_s2, 128 }
  0x4e   : > { %p5343_p8 = pneg %p5342_p10  ;;  %p3869_p6 = scmp.lt.u32.totalorder %s4119_s20, %s5327_s2 }
  0x4f   : > { %p3870_p5 = scmp.lt.u32.totalorder %s3868_s25, %s3863_s21  ;;  %p3872_p9 = scmp.lt.u32.totalorder %s3863_s21, %s4119_s20 }
  0x50   : > { %p3866_p1 = pnand %p3864_p3, %p5343_p8 }
  0x51   : > { %p3871_p7 = por %p3870_p5, %p3869_p6 }
  0x52   : > { %p3867_p2 = pneg %p3866_p1 }
  0x53   : > { %p3873_p12 = por %p3872_p9, %p3871_p7 }
  0x55   : > { %p3874_p4 = pnand %p3873_p12, %p3867_p2 }
  0x57   : > { %3877 = shalt.err (!%p3874_p4)
}
  0x58   : > { %s3878_s6 = scalar_lea.vmem %s4121_s10, 64  ;;  %p5344_p11 = pmov %p5343_p8 }
  0x59   : > { %p3879_p0 = scmp.ne.s32.totalorder %s4121_s10, %s3878_s6  ;;  %s3970_s7 = smov [#allocation7]  }
  0x5a   : > { %s3883_s9 = sshll.u32 %s3970_s7, 4  ;;  %s3884_s9 = int_to_ptr.vmem [resolvable:$false] %s3883_s9 }
  0x5b   : > { %p3881_p13 = pnand %p3879_p0, %p5344_p11  ;;  %s3885_s8 = scalar_lea.vmem %s3884_s9, 128 }
  0x5c   : > { %p3886_p8 = scmp.lt.s32.totalorder %s4121_s10, %s3884_s9  ;;  %p3887_p1 = scmp.lt.s32.totalorder %s3885_s8, %s3878_s6 }
  0x5d   : > { %p3882_p3 = pneg %p3881_p13 }
  0x5e   : > { %p3888_p6 = por %p3887_p1, %p3886_p8 }
  0x60   : > { %p3889_p5 = pnand %p3888_p6, %p3882_p3 }
  0x62   : > { %3892 = shalt.err (!%p3889_p5)
}
  0x63   : > { %3756 = dma.hbm_to_vmem [thread:$0]  (!%p5342_p10), %s4119_s20, 64, %s4121_s10, %s4046_s30  }
  0x64   : > { %p5345_p2 = scmp.ne.s32.totalorder %s5340_s4, 0 }
  0x65   : > { %p5346_p7 = scmp.eq.s32.totalorder (!%p5345_p2), %s4075_s24, 0 }
  0x66   : > { %190 = sbr.rel (%p5345_p2) target bundleno = 869 (0x365), region = 32 }
  0x6d   : > { %3938 = dma.done.wait (%p5346_p7), [#allocation3], 256   ;;  %p5347_p9 = pmov %p5346_p7 }
  0x6e   : > { %s196_s17 = sand.u32 1, %s4075_s24   ;;  %s4171_s18 = sand.u32 1, %s3955_s13  }
  0x6f   : > { %3940 = vsyncadd (%p5347_p9), [#allocation3], 4294967040  ;;  %s2669_s29 = sshll.u32 %s4171_s18, 13  ;;  %s197_s21 = scalar_lea.sflag [#allocation6], %s196_s17 }
  0x70   : > { %s4174_s22 = scalar_lea.vmem [#allocation5], %s2669_s29  ;;  %p5348_p10 = scmp.ne.s32.totalorder %s5337_s27, 0 }
  0x72   : > { %3942 = dma.done.wait (%p5348_p10), %s197_s21, 131136  }
  0x73   : > { %3944 = vsyncadd (%p5348_p10), %s197_s21, 4294836160  ;;  %v243_v0 = vld [vmem:[%s4174_s22 + $0x8] sm:$0xff]  ;;  %v245_v2 = vld [vmem:[%s4174_s22 + $0x18] sm:$0xff]  ;;  %s2670_s30 = sshll.u32 %s4171_s18, 2  ;;  %s2679_s4 = sshll.u32 %s4075_s24, 6 }
  0x74   : > { %v247_v1 = vld [vmem:[%s4174_s22 + $0x28] sm:$0xff]  ;;  %v249_v4 = vld [vmem:[%s4174_s22 + $0x38] sm:$0xff]  ;;  %v242_v5 = vld [vmem:[%s4174_s22] sm:$0xff]  ;;  %s209_s27 = scalar_lea.vmem [#allocation7], %s2670_s30  ;;  %s236_s10 = scalar_lea.vmem [#allocation8], %s2670_s30 }
  0x75   : > { %v2680_v3 = vpack.c.bf16 %v247_v1, %v243_v0  ;;  %v246_v6 = vld [vmem:[%s4174_s22 + $0x20] sm:$0xff]  ;;  %v3192_v7 = vpack.c.bf16 %v249_v4, %v245_v2  ;;  %v244_v9 = vld [vmem:[%s4174_s22 + $0x10] sm:$0xff]  ;;  %v251_v11 = vld [vmem:[%s4174_s22 + $0x48] sm:$0xff]  ;;  %s2555_s20 = sshll.u32 %s236_s10, 4  ;;  %s5281_s11 = scalar_lea.hbm %s5328_s3, %s2679_s4  ;;  %s5283_s20 = int_to_ptr.vmem [resolvable:$true] %s2555_s20 }
  0x76   : > { %v2682_v8 = vpack.c.bf16 %v246_v6, %v242_v5  ;;  %v248_v10 = vld [vmem:[%s4174_s22 + $0x30] sm:$0xff]  ;;  %v255_v13 = vld [vmem:[%s4174_s22 + $0x68] sm:$0xff]  ;;  %v253_v14 = vld [vmem:[%s4174_s22 + $0x58] sm:$0xff]  ;;  %s2541_s5 = scalar_lea.sflag [#allocation4], %s4171_s18  ;;  %s3893_s6 = scalar_lea.vmem %s5283_s20, 64 }
  0x77   : > { %2681 = vmatprep.subr.bf16.mxu0 %v2680_v3  ;;  %v3194_v12 = vpack.c.bf16 %v248_v10, %v244_v9  ;;  %v257_v15 = vld [vmem:[%s4174_s22 + $0x78] sm:$0xff]  ;;  %3193 = vmatprep.subr.bf16.mxu1 %v3192_v7  ;;  %v2684_v16 = vpack.c.bf16 %v255_v13, %v251_v11  ;;  %v250_v18 = vld [vmem:[%s4174_s22 + $0x40] sm:$0xff]  ;;  %v252_v20 = vld [vmem:[%s4174_s22 + $0x50] sm:$0xff]  ;;  %p3894_p12 = scmp.ne.s32.totalorder %s5283_s20, %s3893_s6  ;;  %p5349_p4 = scmp.ne.s32.totalorder %s5338_s26, 0 }
  0x78   : > { %2683 = vmatpush1.bf16.msra.mxu0 %v2682_v8  ;;  %v3196_v17 = vpack.c.bf16 %v257_v15, %v253_v14  ;;  %v254_v19 = vld [vmem:[%s4174_s22 + $0x60] sm:$0xff]  ;;  %v256_v22 = vld [vmem:[%s4174_s22 + $0x70] sm:$0xff]  ;;  %v259_v23 = vld [vmem:[%s4174_s22 + $0x88] sm:$0xff]  ;;  %s3972_s24 = smov [#allocation8]  }
  0x79   : > { %3195 = vmatpush1.bf16.msra.mxu1 %v3194_v12  ;;  %v2686_v21 = vpack.c.bf16 %v254_v19, %v250_v18  ;;  %v263_v24 = vld [vmem:[%s4174_s22 + $0xa8] sm:$0xff]  ;;  %2685 = vmatprep.subr.bf16.mxu0 %v2684_v16  ;;  %v3198_v25 = vpack.c.bf16 %v256_v22, %v252_v20  ;;  %v261_v27 = vld [vmem:[%s4174_s22 + $0x98] sm:$0xff]  ;;  %v258_v29 = vld [vmem:[%s4174_s22 + $0x80] sm:$0xff]  ;;  %p3895_p0 = pnand %p3894_p12, %p5349_p4  ;;  %s3897_s7 = sshll.u32 %s3972_s24, 4  ;;  %s3898_s7 = int_to_ptr.vmem [resolvable:$false] %s3897_s7 }
  0x7a   : > { %3197 = vmatprep.subr.bf16.mxu1 %v3196_v17  ;;  %v2688_v26 = vpack.c.bf16 %v263_v24, %v259_v23  ;;  %v265_v28 = vld [vmem:[%s4174_s22 + $0xb8] sm:$0xff]  ;;  %v262_v31 = vld [vmem:[%s4174_s22 + $0xa0] sm:$0xff]  ;;  %v260_v32 = vld [vmem:[%s4174_s22 + $0x90] sm:$0xff]  ;;  %s3899_s9 = scalar_lea.vmem %s3898_s7, 128  ;;  %p3900_p13 = scmp.lt.s32.totalorder %s5283_s20, %s3898_s7 }
  0x7b   : > { %v3200_v30 = vpack.c.bf16 %v265_v28, %v261_v27  ;;  %v264_v33 = vld [vmem:[%s4174_s22 + $0xb0] sm:$0xff]  ;;  %v2690_v34 = vpack.c.bf16 %v262_v31, %v258_v29  ;;  %v267_v35 = vld [vmem:[%s4174_s22 + $0xc8] sm:$0xff]  ;;  %v269_v37 = vld [vmem:[%s4174_s22 + $0xd8] sm:$0xff]  ;;  %p3896_p11 = pneg %p3895_p0  ;;  %p3901_p3 = scmp.lt.s32.totalorder %s3899_s9, %s3893_s6 }
  0x7c   : > { %2687 = vmatpush1.bf16.msra.mxu0 %v2686_v21  ;;  %v271_v36 = vld [vmem:[%s4174_s22 + $0xe8] sm:$0xff]  ;;  %v3202_v38 = vpack.c.bf16 %v264_v33, %v260_v32  ;;  %v273_v40 = vld [vmem:[%s4174_s22 + $0xf8] sm:$0xff]  ;;  %v266_v41 = vld [vmem:[%s4174_s22 + $0xc0] sm:$0xff] }
  0x7d   : > { %3199 = vmatpush1.bf16.msra.mxu1 %v3198_v25  ;;  %2689 = vmatprep.subr.bf16.mxu0 %v2688_v26  ;;  %v2692_v39 = vpack.c.bf16 %v271_v36, %v267_v35  ;;  %v270_v42 = vld [vmem:[%s4174_s22 + $0xe0] sm:$0xff]  ;;  %v3204_v43 = vpack.c.bf16 %v273_v40, %v269_v37  ;;  %v268_v44 = vld [vmem:[%s4174_s22 + $0xd0] sm:$0xff]  ;;  %v275_v46 = vld [vmem:[%s4174_s22 + $0x108] sm:$0xff]  ;;  %p3902_p8 = por %p3901_p3, %p3900_p13 }
  0x7e   : > { %3201 = vmatprep.subr.bf16.mxu1 %v3200_v30  ;;  %v272_v45 = vld [vmem:[%s4174_s22 + $0xf0] sm:$0xff]  ;;  %v279_v47 = vld [vmem:[%s4174_s22 + $0x128] sm:$0xff]  ;;  %v277_v48 = vld [vmem:[%s4174_s22 + $0x118] sm:$0xff]  ;;  %v2694_v50 = vpack.c.bf16 %v270_v42, %v266_v41 }
  0x7f   : > { %v281_v49 = vld [vmem:[%s4174_s22 + $0x138] sm:$0xff]  ;;  %v3206_v51 = vpack.c.bf16 %v272_v45, %v268_v44  ;;  %v2696_v52 = vpack.c.bf16 %v279_v47, %v275_v46  ;;  %v274_v53 = vld [vmem:[%s4174_s22 + $0x100] sm:$0xff]  ;;  %v276_v55 = vld [vmem:[%s4174_s22 + $0x110] sm:$0xff]  ;;  %v1269_v46 = vlaneseq  ;;  %p3903_p1 = pnand %p3902_p8, %p3896_p11 }
  0x80   : > { %2691 = vmatpush1.bf16.msra.mxu0 %v2690_v34  ;;  %v278_v54 = vld [vmem:[%s4174_s22 + $0x120] sm:$0xff]  ;;  %v3208_v56 = vpack.c.bf16 %v281_v49, %v277_v48  ;;  %v280_v57 = vld [vmem:[%s4174_s22 + $0x130] sm:$0xff]  ;;  %v283_v58 = vld [vmem:[%s4174_s22 + $0x148] sm:$0xff] }
  0x81   : > { %3203 = vmatpush1.bf16.msra.mxu1 %v3202_v38  ;;  %2693 = vmatprep.subr.bf16.mxu0 %v2692_v39  ;;  %v287_v59 = vld [vmem:[%s4174_s22 + $0x168] sm:$0xff]  ;;  %v285_v60 = vld [vmem:[%s4174_s22 + $0x158] sm:$0xff]  ;;  %v2698_v62 = vpack.c.bf16 %v278_v54, %v274_v53  ;;  %v3210_v63 = vpack.c.bf16 %v280_v57, %v276_v55  ;;  %v282_v1 = vld [vmem:[%s4174_s22 + $0x140] sm:$0xff]  ;;  %vm2537_vm0 = vcmp.lt.s32.totalorder %v1269_v46, 512 }
  0x82   : > { %3205 = vmatprep.subr.bf16.mxu1 %v3204_v43  ;;  %v289_v61 = vld [vmem:[%s4174_s22 + $0x178] sm:$0xff]  ;;  %v2700_v0 = vpack.c.bf16 %v287_v59, %v283_v58  ;;  %v286_v2 = vld [vmem:[%s4174_s22 + $0x160] sm:$0xff]  ;;  %v284_v3 = vld [vmem:[%s4174_s22 + $0x150] sm:$0xff]  ;;  %v4265_v59 = vshrl.u32 %v1269_v46, 7 }
  0x83   : > { %v3212_v4 = vpack.c.bf16 %v289_v61, %v285_v60  ;;  %v288_v5 = vld [vmem:[%s4174_s22 + $0x170] sm:$0xff]  ;;  %v291_v6 = vld [vmem:[%s4174_s22 + $0x188] sm:$0xff]  ;;  %v293_v8 = vld [vmem:[%s4174_s22 + $0x198] sm:$0xff]  ;;  %v2702_v10 = vpack.c.bf16 %v286_v2, %v282_v1 }
  0x84   : > { %2695 = vmatpush1.bf16.msra.mxu0 %v2694_v50  ;;  %v295_v7 = vld [vmem:[%s4174_s22 + $0x1a8] sm:$0xff]  ;;  %v297_v9 = vld [vmem:[%s4174_s22 + $0x1b8] sm:$0xff]  ;;  %v3214_v11 = vpack.c.bf16 %v288_v5, %v284_v3  ;;  %v290_v13 = vld [vmem:[%s4174_s22 + $0x180] sm:$0xff] }
  0x85   : > { %3207 = vmatpush1.bf16.msra.mxu1 %v3206_v51  ;;  %2697 = vmatprep.subr.bf16.mxu0 %v2696_v52  ;;  %v2704_v12 = vpack.c.bf16 %v295_v7, %v291_v6  ;;  %v294_v14 = vld [vmem:[%s4174_s22 + $0x1a0] sm:$0xff]  ;;  %v292_v15 = vld [vmem:[%s4174_s22 + $0x190] sm:$0xff]  ;;  %v3216_v16 = vpack.c.bf16 %v297_v9, %v293_v8  ;;  %v299_v18 = vld [vmem:[%s4174_s22 + $0x1c8] sm:$0xff]  ;;  %v4276_v8 = vsub.s32 1, %v4265_v59 }
  0x86   : > { %3209 = vmatprep.subr.bf16.mxu1 %v3208_v56  ;;  %v296_v17 = vld [vmem:[%s4174_s22 + $0x1b0] sm:$0xff]  ;;  %v303_v19 = vld [vmem:[%s4174_s22 + $0x1e8] sm:$0xff]  ;;  %v301_v20 = vld [vmem:[%s4174_s22 + $0x1d8] sm:$0xff]  ;;  %v2706_v22 = vpack.c.bf16 %v294_v14, %v290_v13 }
  0x87   : > { %v305_v21 = vld [vmem:[%s4174_s22 + $0x1f8] sm:$0xff]  ;;  %v3218_v23 = vpack.c.bf16 %v296_v17, %v292_v15  ;;  %v2708_v24 = vpack.c.bf16 %v303_v19, %v299_v18  ;;  %v298_v25 = vld [vmem:[%s4174_s22 + $0x1c0] sm:$0xff]  ;;  %v300_v27 = vld [vmem:[%s4174_s22 + $0x1d0] sm:$0xff] }
  0x88   : > { %2699 = vmatpush1.bf16.msra.mxu0 %v2698_v62  ;;  %v302_v26 = vld [vmem:[%s4174_s22 + $0x1e0] sm:$0xff]  ;;  %v3220_v28 = vpack.c.bf16 %v305_v21, %v301_v20  ;;  %v304_v29 = vld [vmem:[%s4174_s22 + $0x1f0] sm:$0xff]  ;;  %v307_v30 = vld [vmem:[%s4174_s22 + $0x208] sm:$0xff] }
  0x89   : > { %3211 = vmatpush1.bf16.msra.mxu1 %v3210_v63  ;;  %2701 = vmatprep.subr.bf16.mxu0 %v2700_v0  ;;  %v311_v31 = vld [vmem:[%s4174_s22 + $0x228] sm:$0xff]  ;;  %v309_v32 = vld [vmem:[%s4174_s22 + $0x218] sm:$0xff]  ;;  %v2710_v34 = vpack.c.bf16 %v302_v26, %v298_v25  ;;  %v3222_v35 = vpack.c.bf16 %v304_v29, %v300_v27  ;;  %v306_v37 = vld [vmem:[%s4174_s22 + $0x200] sm:$0xff] }
  0x8a   : > { %3213 = vmatprep.subr.bf16.mxu1 %v3212_v4  ;;  %v313_v33 = vld [vmem:[%s4174_s22 + $0x238] sm:$0xff]  ;;  %v2712_v36 = vpack.c.bf16 %v311_v31, %v307_v30  ;;  %v310_v38 = vld [vmem:[%s4174_s22 + $0x220] sm:$0xff]  ;;  %v308_v39 = vld [vmem:[%s4174_s22 + $0x210] sm:$0xff] }
  0x8b   : > { %v3224_v40 = vpack.c.bf16 %v313_v33, %v309_v32  ;;  %v312_v41 = vld [vmem:[%s4174_s22 + $0x230] sm:$0xff]  ;;  %v315_v42 = vld [vmem:[%s4174_s22 + $0x248] sm:$0xff]  ;;  %v317_v44 = vld [vmem:[%s4174_s22 + $0x258] sm:$0xff]  ;;  %v2714_v47 = vpack.c.bf16 %v310_v38, %v306_v37 }
  0x8c   : > { %2703 = vmatpush1.bf16.msra.mxu0 %v2702_v10  ;;  %v319_v43 = vld [vmem:[%s4174_s22 + $0x268] sm:$0xff]  ;;  %v321_v45 = vld [vmem:[%s4174_s22 + $0x278] sm:$0xff]  ;;  %v3226_v48 = vpack.c.bf16 %v312_v41, %v308_v39  ;;  %v314_v50 = vld [vmem:[%s4174_s22 + $0x240] sm:$0xff] }
  0x8d   : > { %3215 = vmatpush1.bf16.msra.mxu1 %v3214_v11  ;;  %2705 = vmatprep.subr.bf16.mxu0 %v2704_v12  ;;  %v2716_v49 = vpack.c.bf16 %v319_v43, %v315_v42  ;;  %v318_v51 = vld [vmem:[%s4174_s22 + $0x260] sm:$0xff]  ;;  %v316_v52 = vld [vmem:[%s4174_s22 + $0x250] sm:$0xff]  ;;  %v3228_v53 = vpack.c.bf16 %v321_v45, %v317_v44  ;;  %v323_v55 = vld [vmem:[%s4174_s22 + $0x288] sm:$0xff] }
  0x8e   : > { %3217 = vmatprep.subr.bf16.mxu1 %v3216_v16  ;;  %v320_v54 = vld [vmem:[%s4174_s22 + $0x270] sm:$0xff]  ;;  %v327_v56 = vld [vmem:[%s4174_s22 + $0x2a8] sm:$0xff]  ;;  %v325_v57 = vld [vmem:[%s4174_s22 + $0x298] sm:$0xff]  ;;  %v2718_v60 = vpack.c.bf16 %v318_v51, %v314_v50 }
  0x8f   : > { %v329_v58 = vld [vmem:[%s4174_s22 + $0x2b8] sm:$0xff]  ;;  %v3230_v61 = vpack.c.bf16 %v320_v54, %v316_v52  ;;  %v2720_v62 = vpack.c.bf16 %v327_v56, %v323_v55  ;;  %v322_v63 = vld [vmem:[%s4174_s22 + $0x280] sm:$0xff]  ;;  %v324_v1 = vld [vmem:[%s4174_s22 + $0x290] sm:$0xff] }
  0x90   : > { %2707 = vmatpush1.bf16.msra.mxu0 %v2706_v22  ;;  %v326_v0 = vld [vmem:[%s4174_s22 + $0x2a0] sm:$0xff]  ;;  %v3232_v2 = vpack.c.bf16 %v329_v58, %v325_v57  ;;  %v328_v3 = vld [vmem:[%s4174_s22 + $0x2b0] sm:$0xff]  ;;  %v331_v4 = vld [vmem:[%s4174_s22 + $0x2c8] sm:$0xff] }
  0x91   : > { %3219 = vmatpush1.bf16.msra.mxu1 %v3218_v23  ;;  %2709 = vmatprep.subr.bf16.mxu0 %v2708_v24  ;;  %v335_v5 = vld [vmem:[%s4174_s22 + $0x2e8] sm:$0xff]  ;;  %v333_v6 = vld [vmem:[%s4174_s22 + $0x2d8] sm:$0xff]  ;;  %v2722_v9 = vpack.c.bf16 %v326_v0, %v322_v63  ;;  %v330_v10 = vld [vmem:[%s4174_s22 + $0x2c0] sm:$0xff]  ;;  %v3234_v11 = vpack.c.bf16 %v328_v3, %v324_v1 }
  0x92   : > { %3221 = vmatprep.subr.bf16.mxu1 %v3220_v28  ;;  %v337_v7 = vld [vmem:[%s4174_s22 + $0x2f8] sm:$0xff]  ;;  %v2724_v12 = vpack.c.bf16 %v335_v5, %v331_v4  ;;  %v334_v13 = vld [vmem:[%s4174_s22 + $0x2e0] sm:$0xff]  ;;  %v332_v14 = vld [vmem:[%s4174_s22 + $0x2d0] sm:$0xff] }
  0x93   : > { %v336_v15 = vld [vmem:[%s4174_s22 + $0x2f0] sm:$0xff]  ;;  %v3236_v16 = vpack.c.bf16 %v337_v7, %v333_v6  ;;  %v339_v17 = vld [vmem:[%s4174_s22 + $0x308] sm:$0xff]  ;;  %v341_v20 = vld [vmem:[%s4174_s22 + $0x318] sm:$0xff]  ;;  %v2726_v23 = vpack.c.bf16 %v334_v13, %v330_v10  ;;  %v4323_v10 = vsub.s32 0, %v4265_v59 }
  0x94   : > { %2711 = vmatpush1.bf16.msra.mxu0 %v2710_v34  ;;  %v343_v18 = vld [vmem:[%s4174_s22 + $0x328] sm:$0xff]  ;;  %v4284_v19 = vld [vmem:[#allocation2] sm:$0xff]  ;;  %v345_v21 = vld [vmem:[%s4174_s22 + $0x338] sm:$0xff]  ;;  %v3238_v24 = vpack.c.bf16 %v336_v15, %v332_v14 }
  0x95   : > { %3223 = vmatpush1.bf16.msra.mxu1 %v3222_v35  ;;  %2713 = vmatprep.subr.bf16.mxu0 %v2712_v36  ;;  %v1276_v22 = vrot.slane %v4284_v19, %v4276_v8  ;;  %v2728_v25 = vpack.c.bf16 %v343_v18, %v339_v17  ;;  %v338_v26 = vld [vmem:[%s4174_s22 + $0x300] sm:$0xff]  ;;  %v340_v28 = vld [vmem:[%s4174_s22 + $0x310] sm:$0xff]  ;;  %v3240_v29 = vpack.c.bf16 %v345_v21, %v341_v20  ;;  %v347_v31 = vld [vmem:[%s4174_s22 + $0x348] sm:$0xff] }
  0x96   : > { %3225 = vmatprep.subr.bf16.mxu1 %v3224_v40  ;;  %v342_v27 = vld [vmem:[%s4174_s22 + $0x320] sm:$0xff]  ;;  %v344_v30 = vld [vmem:[%s4174_s22 + $0x330] sm:$0xff]  ;;  %v351_v32 = vld [vmem:[%s4174_s22 + $0x368] sm:$0xff] }
  0x97   : > { %1434 = vmatprep.mubr.f32.mxu0 %v1276_v22  ;;  %v349_v33 = vld [vmem:[%s4174_s22 + $0x358] sm:$0xff]  ;;  %2002 = vmatprep.mubr.f32.mxu1 %v1276_v22  ;;  %v2730_v35 = vpack.c.bf16 %v342_v27, %v338_v26  ;;  %v3242_v36 = vpack.c.bf16 %v344_v30, %v340_v28  ;;  %v2732_v37 = vpack.c.bf16 %v351_v32, %v347_v31  ;;  %v346_v38 = vld [vmem:[%s4174_s22 + $0x340] sm:$0xff]  ;;  %v348_v40 = vld [vmem:[%s4174_s22 + $0x350] sm:$0xff]  ;;  %v4332_v22 = vsub.s32 3, %v4265_v59 }
  0x98   : > { %2715 = vmatpush1.bf16.msra.mxu0 %v2714_v47  ;;  %v353_v34 = vld [vmem:[%s4174_s22 + $0x378] sm:$0xff]  ;;  %v350_v39 = vld [vmem:[%s4174_s22 + $0x360] sm:$0xff]  ;;  %v352_v42 = vld [vmem:[%s4174_s22 + $0x370] sm:$0xff] }
  0x99   : > { %3227 = vmatpush1.bf16.msra.mxu1 %v3226_v48  ;;  %2717 = vmatprep.subr.bf16.mxu0 %v2716_v49  ;;  %v3244_v41 = vpack.c.bf16 %v353_v34, %v349_v33  ;;  %v355_v43 = vld [vmem:[%s4174_s22 + $0x388] sm:$0xff]  ;;  %v357_v45 = vld [vmem:[%s4174_s22 + $0x398] sm:$0xff]  ;;  %v2734_v48 = vpack.c.bf16 %v350_v39, %v346_v38  ;;  %v3246_v49 = vpack.c.bf16 %v352_v42, %v348_v40  ;;  %v354_v51 = vld [vmem:[%s4174_s22 + $0x380] sm:$0xff] }
  0x9a   : > { %3229 = vmatprep.subr.bf16.mxu1 %v3228_v53  ;;  %v359_v44 = vld [vmem:[%s4174_s22 + $0x3a8] sm:$0xff]  ;;  %v361_v47 = vld [vmem:[%s4174_s22 + $0x3b8] sm:$0xff]  ;;  %v358_v52 = vld [vmem:[%s4174_s22 + $0x3a0] sm:$0xff] }
  0x9b   : > { %v2736_v50 = vpack.c.bf16 %v359_v44, %v355_v43  ;;  %v356_v53 = vld [vmem:[%s4174_s22 + $0x390] sm:$0xff]  ;;  %v3248_v54 = vpack.c.bf16 %v361_v47, %v357_v45  ;;  %v363_v56 = vld [vmem:[%s4174_s22 + $0x3c8] sm:$0xff]  ;;  %v365_v58 = vld [vmem:[%s4174_s22 + $0x3d8] sm:$0xff] }
  0x9c   : > { %2719 = vmatpush1.bf16.msra.mxu0 %v2718_v60  ;;  %v360_v55 = vld [vmem:[%s4174_s22 + $0x3b0] sm:$0xff]  ;;  %v367_v57 = vld [vmem:[%s4174_s22 + $0x3e8] sm:$0xff]  ;;  %v369_v60 = vld [vmem:[%s4174_s22 + $0x3f8] sm:$0xff] }
  0x9d   : > { %3231 = vmatpush1.bf16.msra.mxu1 %v3230_v61  ;;  %2721 = vmatprep.subr.bf16.mxu0 %v2720_v62  ;;  %v2738_v61 = vpack.c.bf16 %v358_v52, %v354_v51  ;;  %v3250_v62 = vpack.c.bf16 %v360_v55, %v356_v53  ;;  %v2740_v63 = vpack.c.bf16 %v367_v57, %v363_v56  ;;  %v362_v0 = vld [vmem:[%s4174_s22 + $0x3c0] sm:$0xff]  ;;  %v368_v4 = vld [vmem:[%s4174_s22 + $0x3f0] sm:$0xff]  ;;  %v371_v5 = vld [vmem:[%s4174_s22 + $0x408] sm:$0xff] }
  0x9e   : > { %3233 = vmatprep.subr.bf16.mxu1 %v3232_v2  ;;  %v366_v1 = vld [vmem:[%s4174_s22 + $0x3e0] sm:$0xff]  ;;  %v364_v2 = vld [vmem:[%s4174_s22 + $0x3d0] sm:$0xff]  ;;  %v3252_v3 = vpack.c.bf16 %v369_v60, %v365_v58  ;;  %v375_v6 = vld [vmem:[%s4174_s22 + $0x428] sm:$0xff] }
  0x9f   : > { %v373_v7 = vld [vmem:[%s4174_s22 + $0x418] sm:$0xff]  ;;  %v2744_v13 = vpack.c.bf16 %v375_v6, %v371_v5  ;;  %v370_v14 = vld [vmem:[%s4174_s22 + $0x400] sm:$0xff]  ;;  %v376_v18 = vld [vmem:[%s4174_s22 + $0x430] sm:$0xff] }
  0xa0   : > { %2723 = vmatpush1.bf16.msra.mxu0 %v2722_v9  ;;  %v377_v9 = vld [vmem:[%s4174_s22 + $0x438] sm:$0xff]  ;;  %v374_v15 = vld [vmem:[%s4174_s22 + $0x420] sm:$0xff]  ;;  %v379_v20 = vld [vmem:[%s4174_s22 + $0x448] sm:$0xff] }
  0xa1   : > { %3235 = vmatpush1.bf16.msra.mxu1 %v3234_v11  ;;  %2725 = vmatprep.subr.bf16.mxu0 %v2724_v12  ;;  %v2742_v11 = vpack.c.bf16 %v366_v1, %v362_v0  ;;  %v3254_v12 = vpack.c.bf16 %v368_v4, %v364_v2  ;;  %v3256_v17 = vpack.c.bf16 %v377_v9, %v373_v7  ;;  %v383_v21 = vld [vmem:[%s4174_s22 + $0x468] sm:$0xff]  ;;  %v382_v30 = vld [vmem:[%s4174_s22 + $0x460] sm:$0xff]  ;;  %v380_v31 = vld [vmem:[%s4174_s22 + $0x450] sm:$0xff] }
  0xa2   : > { %3237 = vmatprep.subr.bf16.mxu1 %v3236_v16  ;;  %v372_v16 = vld [vmem:[%s4174_s22 + $0x410] sm:$0xff]  ;;  %v2746_v26 = vpack.c.bf16 %v374_v15, %v370_v14  ;;  %v2748_v28 = vpack.c.bf16 %v383_v21, %v379_v20  ;;  %v387_v34 = vld [vmem:[%s4174_s22 + $0x488] sm:$0xff]  ;;  %v393_v38 = vld [vmem:[%s4174_s22 + $0x4b8] sm:$0xff] }
  0xa3   : > { %v3258_v27 = vpack.c.bf16 %v376_v18, %v372_v16  ;;  %v384_v33 = vld [vmem:[%s4174_s22 + $0x470] sm:$0xff]  ;;  %v386_v42 = vld [vmem:[%s4174_s22 + $0x480] sm:$0xff]  ;;  %v401_v51 = vld [vmem:[%s4174_s22 + $0x4f8] sm:$0xff] }
  0xa4   : > { %2727 = vmatpush1.bf16.msra.mxu0 %v2726_v23  ;;  %v1272_v23 = vrot.slane %v4284_v19, %v4323_v10  ;;  %v3262_v40 = vpack.c.bf16 %v384_v33, %v380_v31  ;;  %v390_v43 = vld [vmem:[%s4174_s22 + $0x4a0] sm:$0xff]  ;;  %v388_v44 = vld [vmem:[%s4174_s22 + $0x490] sm:$0xff]  ;;  %v409_v0 = vld [vmem:[%s4174_s22 + $0x538] sm:$0xff] }
  0xa5   : > { %3239 = vmatpush1.bf16.msra.mxu1 %v3238_v24  ;;  %2729 = vmatprep.subr.bf16.mxu0 %v2728_v25  ;;  %v381_v24 = vld [vmem:[%s4174_s22 + $0x458] sm:$0xff]  ;;  %v392_v47 = vld [vmem:[%s4174_s22 + $0x4b0] sm:$0xff]  ;;  %v2754_v52 = vpack.c.bf16 %v390_v43, %v386_v42  ;;  %v394_v55 = vld [vmem:[%s4174_s22 + $0x4c0] sm:$0xff] }
  0xa6   : > { %3241 = vmatprep.subr.bf16.mxu1 %v3240_v29  ;;  %v385_v25 = vld [vmem:[%s4174_s22 + $0x478] sm:$0xff]  ;;  %v378_v29 = vld [vmem:[%s4174_s22 + $0x440] sm:$0xff]  ;;  %v3266_v53 = vpack.c.bf16 %v392_v47, %v388_v44  ;;  %v396_v57 = vld [vmem:[%s4174_s22 + $0x4d0] sm:$0xff] }
  0xa7   : > { %v3260_v32 = vpack.c.bf16 %v385_v25, %v381_v24  ;;  %v2750_v39 = vpack.c.bf16 %v382_v30, %v378_v29  ;;  %v398_v56 = vld [vmem:[%s4174_s22 + $0x4e0] sm:$0xff]  ;;  %v400_v60 = vld [vmem:[%s4174_s22 + $0x4f0] sm:$0xff]  ;;  %v417_v14 = vld [vmem:[%s4174_s22 + $0x578] sm:$0xff] }
  0xa8   : > { %2731 = vmatpush1.bf16.msra.mxu0 %v2730_v35  ;;  %v391_v35 = vld [vmem:[%s4174_s22 + $0x4a8] sm:$0xff]  ;;  %v2758_v1 = vpack.c.bf16 %v398_v56, %v394_v55  ;;  %v3270_v2 = vpack.c.bf16 %v400_v60, %v396_v57  ;;  %v402_v4 = vld [vmem:[%s4174_s22 + $0x500] sm:$0xff]  ;;  %v404_v6 = vld [vmem:[%s4174_s22 + $0x510] sm:$0xff] }
  0xa9   : > { %3243 = vmatpush1.bf16.msra.mxu1 %v3242_v36  ;;  %2733 = vmatprep.subr.bf16.mxu0 %v2732_v37  ;;  %v1284_v36 = vrot.slane %v4284_v19, %v4332_v22  ;;  %v389_v37 = vld [vmem:[%s4174_s22 + $0x498] sm:$0xff]  ;;  %v406_v5 = vld [vmem:[%s4174_s22 + $0x520] sm:$0xff]  ;;  %v408_v9 = vld [vmem:[%s4174_s22 + $0x530] sm:$0xff] }
  0xaa   : > { %3245 = vmatprep.subr.bf16.mxu1 %v3244_v41  ;;  %v2752_v41 = vpack.c.bf16 %v391_v35, %v387_v34  ;;  %v3264_v45 = vpack.c.bf16 %v393_v38, %v389_v37  ;;  %v2762_v15 = vpack.c.bf16 %v406_v5, %v402_v4  ;;  %v3274_v16 = vpack.c.bf16 %v408_v9, %v404_v6  ;;  %v410_v18 = vld [vmem:[%s4174_s22 + $0x540] sm:$0xff]  ;;  %v412_v21 = vld [vmem:[%s4174_s22 + $0x550] sm:$0xff]  ;;  %v419_v25 = vld [vmem:[%s4174_s22 + $0x588] sm:$0xff] }
  0xab   : > { %v414_v20 = vld [vmem:[%s4174_s22 + $0x560] sm:$0xff]  ;;  %v416_v24 = vld [vmem:[%s4174_s22 + $0x570] sm:$0xff]  ;;  %v427_v37 = vld [vmem:[%s4174_s22 + $0x5c8] sm:$0xff] }
  0xac   : > { %2735 = vmatpush1.bf16.msra.mxu0 %v2734_v48  ;;  %v395_v48 = vld [vmem:[%s4174_s22 + $0x4c8] sm:$0xff]  ;;  %v2766_v29 = vpack.c.bf16 %v414_v20, %v410_v18  ;;  %v3278_v30 = vpack.c.bf16 %v416_v24, %v412_v21  ;;  %v422_v33 = vld [vmem:[%s4174_s22 + $0x5a0] sm:$0xff]  ;;  %v420_v34 = vld [vmem:[%s4174_s22 + $0x590] sm:$0xff] }
  0xad   : > { %3247 = vmatpush1.bf16.msra.mxu1 %v3246_v49  ;;  %2737 = vmatprep.subr.bf16.mxu0 %v2736_v50  ;;  %v399_v49 = vld [vmem:[%s4174_s22 + $0x4e8] sm:$0xff]  ;;  %v397_v50 = vld [vmem:[%s4174_s22 + $0x4d8] sm:$0xff]  ;;  %v426_v44 = vld [vmem:[%s4174_s22 + $0x5c0] sm:$0xff] }
  0xae   : > { %3249 = vmatprep.subr.bf16.mxu1 %v3248_v54  ;;  %v2756_v54 = vpack.c.bf16 %v399_v49, %v395_v48  ;;  %v3268_v58 = vpack.c.bf16 %v401_v51, %v397_v50  ;;  %v431_v38 = vld [vmem:[%s4174_s22 + $0x5e8] sm:$0xff]  ;;  %v428_v47 = vld [vmem:[%s4174_s22 + $0x5d0] sm:$0xff]  ;;  %v434_v57 = vld [vmem:[%s4174_s22 + $0x600] sm:$0xff] }
  0xaf   : > { %v2772_v43 = vpack.c.bf16 %v431_v38, %v427_v37  ;;  %v432_v49 = vld [vmem:[%s4174_s22 + $0x5f0] sm:$0xff]  ;;  %v435_v50 = vld [vmem:[%s4174_s22 + $0x608] sm:$0xff]  ;;  %v442_v6 = vld [vmem:[%s4174_s22 + $0x640] sm:$0xff] }
  0xb0   : > { %2739 = vmatpush1.bf16.msra.mxu0 %v2738_v61  ;;  %v403_v61 = vld [vmem:[%s4174_s22 + $0x508] sm:$0xff]  ;;  %v3286_v55 = vpack.c.bf16 %v432_v49, %v428_v47  ;;  %v436_v60 = vld [vmem:[%s4174_s22 + $0x610] sm:$0xff]  ;;  %v450_v21 = vld [vmem:[%s4174_s22 + $0x680] sm:$0xff] }
  0xb1   : > { %3251 = vmatpush1.bf16.msra.mxu1 %v3250_v62  ;;  %2741 = vmatprep.subr.bf16.mxu0 %v2740_v63  ;;  %v407_v62 = vld [vmem:[%s4174_s22 + $0x528] sm:$0xff]  ;;  %v405_v63 = vld [vmem:[%s4174_s22 + $0x518] sm:$0xff]  ;;  %v444_v9 = vld [vmem:[%s4174_s22 + $0x650] sm:$0xff] }
  0xb2   : > { %3253 = vmatprep.subr.bf16.mxu1 %v3252_v3  ;;  %v2760_v3 = vpack.c.bf16 %v407_v62, %v403_v61  ;;  %v3272_v7 = vpack.c.bf16 %v409_v0, %v405_v63  ;;  %v439_v51 = vld [vmem:[%s4174_s22 + $0x628] sm:$0xff]  ;;  %v440_v62 = vld [vmem:[%s4174_s22 + $0x630] sm:$0xff]  ;;  %v466_v47 = vld [vmem:[%s4174_s22 + $0x700] sm:$0xff] }
  0xb3   : > { %v2776_v56 = vpack.c.bf16 %v439_v51, %v435_v50  ;;  %v443_v63 = vld [vmem:[%s4174_s22 + $0x648] sm:$0xff]  ;;  %v3290_v4 = vpack.c.bf16 %v440_v62, %v436_v60  ;;  %v452_v24 = vld [vmem:[%s4174_s22 + $0x690] sm:$0xff]  ;;  %v474_v60 = vld [vmem:[%s4174_s22 + $0x740] sm:$0xff] }
  0xb4   : > { %2743 = vmatpush1.bf16.msra.mxu0 %v2742_v11  ;;  %v411_v11 = vld [vmem:[%s4174_s22 + $0x548] sm:$0xff]  ;;  %v464_v38 = vld [vmem:[%s4174_s22 + $0x6f0] sm:$0xff] }
  0xb5   : > { %3255 = vmatpush1.bf16.msra.mxu1 %v3254_v12  ;;  %2745 = vmatprep.subr.bf16.mxu0 %v2744_v13  ;;  %v415_v12 = vld [vmem:[%s4174_s22 + $0x568] sm:$0xff]  ;;  %v413_v13 = vld [vmem:[%s4174_s22 + $0x558] sm:$0xff]  ;;  %v468_v49 = vld [vmem:[%s4174_s22 + $0x710] sm:$0xff] }
  0xb6   : > { %3257 = vmatprep.subr.bf16.mxu1 %v3256_v17  ;;  %v2764_v17 = vpack.c.bf16 %v415_v12, %v411_v11  ;;  %v447_v0 = vld [vmem:[%s4174_s22 + $0x668] sm:$0xff]  ;;  %v448_v12 = vld [vmem:[%s4174_s22 + $0x670] sm:$0xff] }
  0xb7   : > { %1435 = vmatmul.mubr.f32.vlgmr.msra.gmra.mrb[0].mxu0 %v1272_v23  ;;  %v2780_v5 = vpack.c.bf16 %v447_v0, %v443_v63  ;;  %v3294_v18 = vpack.c.bf16 %v448_v12, %v444_v9  ;;  %v472_v51 = vld [vmem:[%s4174_s22 + $0x730] sm:$0xff]  ;;  %v482_v9 = vld [vmem:[%s4174_s22 + $0x780] sm:$0xff] }
  0xb8   : > { %2747 = vmatpush1.bf16.msra.mxu0 %v2746_v26  ;;  %2003 = vmatmul.mubr.f32.vlgmr.msra.gmra.mrb[0].mxu1 %v1272_v23  ;;  %v3276_v23 = vpack.c.bf16 %v417_v14, %v413_v13  ;;  %v423_v26 = vld [vmem:[%s4174_s22 + $0x5a8] sm:$0xff]  ;;  %v476_v62 = vld [vmem:[%s4174_s22 + $0x750] sm:$0xff] }
  0xb9   : > { %3259 = vmatpush1.bf16.msra.mxu1 %v3258_v27  ;;  %2749 = vmatprep.subr.bf16.mxu0 %v2748_v28  ;;  %v421_v27 = vld [vmem:[%s4174_s22 + $0x598] sm:$0xff]  ;;  %v2768_v31 = vpack.c.bf16 %v423_v26, %v419_v25  ;;  %v451_v13 = vld [vmem:[%s4174_s22 + $0x688] sm:$0xff]  ;;  %v456_v26 = vld [vmem:[%s4174_s22 + $0x6b0] sm:$0xff] }
  0xba   : > { %3261 = vmatprep.subr.bf16.mxu1 %v3260_v32  ;;  %1505 = vmatprep.mubr.f32.mxu0 %v1284_v36  ;;  %v425_v28 = vld [vmem:[%s4174_s22 + $0x5b8] sm:$0xff]  ;;  %v418_v32 = vld [vmem:[%s4174_s22 + $0x580] sm:$0xff]  ;;  %v455_v14 = vld [vmem:[%s4174_s22 + $0x6a8] sm:$0xff] }
  0xbb   : > { %2073 = vmatprep.mubr.f32.mxu1 %v1284_v36  ;;  %v3280_v35 = vpack.c.bf16 %v425_v28, %v421_v27  ;;  %v424_v36 = vld [vmem:[%s4174_s22 + $0x5b0] sm:$0xff]  ;;  %v2784_v20 = vpack.c.bf16 %v455_v14, %v451_v13  ;;  %v459_v27 = vld [vmem:[%s4174_s22 + $0x6c8] sm:$0xff] }
  0xbc   : > { %2751 = vmatpush1.bf16.msra.mxu0 %v2750_v39  ;;  %v429_v39 = vld [vmem:[%s4174_s22 + $0x5d8] sm:$0xff]  ;;  %v3282_v42 = vpack.c.bf16 %v424_v36, %v420_v34  ;;  %v463_v28 = vld [vmem:[%s4174_s22 + $0x6e8] sm:$0xff]  ;;  %v458_v34 = vld [vmem:[%s4174_s22 + $0x6c0] sm:$0xff] }
  0xbd   : > { %3263 = vmatpush1.bf16.msra.mxu1 %v3262_v40  ;;  %2753 = vmatprep.subr.bf16.mxu0 %v2752_v41  ;;  %v433_v40 = vld [vmem:[%s4174_s22 + $0x5f8] sm:$0xff]  ;;  %v2770_v41 = vpack.c.bf16 %v422_v33, %v418_v32  ;;  %v3298_v32 = vpack.c.bf16 %v456_v26, %v452_v24  ;;  %v2788_v33 = vpack.c.bf16 %v463_v28, %v459_v27  ;;  %v460_v36 = vld [vmem:[%s4174_s22 + $0x6d0] sm:$0xff]  ;;  %v490_v24 = vld [vmem:[%s4174_s22 + $0x7c0] sm:$0xff] }
  0xbe   : > { %3265 = vmatprep.subr.bf16.mxu1 %v3264_v45  ;;  %v430_v45 = vld [vmem:[%s4174_s22 + $0x5e0] sm:$0xff]  ;;  %v3284_v48 = vpack.c.bf16 %v433_v40, %v429_v39  ;;  %v467_v39 = vld [vmem:[%s4174_s22 + $0x708] sm:$0xff]  ;;  %v480_v0 = vld [vmem:[%s4174_s22 + $0x770] sm:$0xff] }
  0xbf   : > { %v471_v40 = vld [vmem:[%s4174_s22 + $0x728] sm:$0xff]  ;;  %v484_v12 = vld [vmem:[%s4174_s22 + $0x790] sm:$0xff] }
  0xc0   : > { %2755 = vmatpush1.bf16.msra.mxu0 %v2754_v52  ;;  %v437_v52 = vld [vmem:[%s4174_s22 + $0x618] sm:$0xff]  ;;  %v488_v14 = vld [vmem:[%s4174_s22 + $0x7b0] sm:$0xff] }
  0xc1   : > { %3267 = vmatpush1.bf16.msra.mxu1 %v3266_v53  ;;  %2757 = vmatprep.subr.bf16.mxu0 %v2756_v54  ;;  %v441_v53 = vld [vmem:[%s4174_s22 + $0x638] sm:$0xff]  ;;  %v2774_v54 = vpack.c.bf16 %v430_v45, %v426_v44  ;;  %v3302_v44 = vpack.c.bf16 %v464_v38, %v460_v36  ;;  %v2792_v45 = vpack.c.bf16 %v471_v40, %v467_v39  ;;  %v492_v26 = vld [vmem:[%s4174_s22 + $0x7d0] sm:$0xff]  ;;  %v502_v38 = vld [vmem:[%s4174_s22 + $0x820] sm:$0xff] }
  0xc2   : > { %3269 = vmatprep.subr.bf16.mxu1 %v3268_v58  ;;  %v438_v58 = vld [vmem:[%s4174_s22 + $0x620] sm:$0xff]  ;;  %v3288_v61 = vpack.c.bf16 %v441_v53, %v437_v52  ;;  %v475_v52 = vld [vmem:[%s4174_s22 + $0x748] sm:$0xff]  ;;  %v496_v28 = vld [vmem:[%s4174_s22 + $0x7f0] sm:$0xff] }
  0xc3   : > { %v479_v53 = vld [vmem:[%s4174_s22 + $0x768] sm:$0xff]  ;;  %v500_v39 = vld [vmem:[%s4174_s22 + $0x810] sm:$0xff] }
  0xc4   : > { %2759 = vmatpush1.bf16.msra.mxu0 %v2758_v1  ;;  %v445_v1 = vld [vmem:[%s4174_s22 + $0x658] sm:$0xff] }
  0xc5   : > { %3271 = vmatpush1.bf16.msra.mxu1 %v3270_v2  ;;  %2761 = vmatprep.subr.bf16.mxu0 %v2760_v3  ;;  %v449_v2 = vld [vmem:[%s4174_s22 + $0x678] sm:$0xff]  ;;  %v2778_v3 = vpack.c.bf16 %v438_v58, %v434_v57  ;;  %v3306_v57 = vpack.c.bf16 %v472_v51, %v468_v49  ;;  %v2796_v58 = vpack.c.bf16 %v479_v53, %v475_v52  ;;  %v506_v52 = vld [vmem:[%s4174_s22 + $0x840] sm:$0xff] }
  0xc6   : > { %3273 = vmatprep.subr.bf16.mxu1 %v3272_v7  ;;  %v446_v7 = vld [vmem:[%s4174_s22 + $0x660] sm:$0xff]  ;;  %v3292_v11 = vpack.c.bf16 %v449_v2, %v445_v1  ;;  %v483_v1 = vld [vmem:[%s4174_s22 + $0x788] sm:$0xff] }
  0xc7   : > { %v487_v2 = vld [vmem:[%s4174_s22 + $0x7a8] sm:$0xff]  ;;  %v510_v53 = vld [vmem:[%s4174_s22 + $0x860] sm:$0xff] }
  0xc8   : > { %2763 = vmatpush1.bf16.msra.mxu0 %v2762_v15  ;;  %v453_v15 = vld [vmem:[%s4174_s22 + $0x698] sm:$0xff] }
  0xc9   : > { %3275 = vmatpush1.bf16.msra.mxu1 %v3274_v16  ;;  %2765 = vmatprep.subr.bf16.mxu0 %v2764_v17  ;;  %v457_v16 = vld [vmem:[%s4174_s22 + $0x6b8] sm:$0xff]  ;;  %v2782_v17 = vpack.c.bf16 %v446_v7, %v442_v6  ;;  %v3310_v6 = vpack.c.bf16 %v480_v0, %v476_v62  ;;  %v2800_v7 = vpack.c.bf16 %v487_v2, %v483_v1  ;;  %v514_v2 = vld [vmem:[%s4174_s22 + $0x880] sm:$0xff] }
  0xca   : > { %3277 = vmatprep.subr.bf16.mxu1 %v3276_v23  ;;  %v454_v23 = vld [vmem:[%s4174_s22 + $0x6a0] sm:$0xff]  ;;  %v3296_v25 = vpack.c.bf16 %v457_v16, %v453_v15  ;;  %v491_v15 = vld [vmem:[%s4174_s22 + $0x7c8] sm:$0xff]  ;;  %v521_v62 = vld [vmem:[%s4174_s22 + $0x8b8] sm:$0xff] }
  0xcb   : > { %v495_v16 = vld [vmem:[%s4174_s22 + $0x7e8] sm:$0xff] }
  0xcc   : > { %2767 = vmatpush1.bf16.msra.mxu0 %v2766_v29  ;;  %v461_v29 = vld [vmem:[%s4174_s22 + $0x6d8] sm:$0xff] }
  0xcd   : > { %3279 = vmatpush1.bf16.msra.mxu1 %v3278_v30  ;;  %2769 = vmatprep.subr.bf16.mxu0 %v2768_v31  ;;  %v465_v30 = vld [vmem:[%s4174_s22 + $0x6f8] sm:$0xff]  ;;  %v2786_v31 = vpack.c.bf16 %v454_v23, %v450_v21  ;;  %v3314_v21 = vpack.c.bf16 %v488_v14, %v484_v12  ;;  %v2804_v23 = vpack.c.bf16 %v495_v16, %v491_v15  ;;  %v522_v15 = vld [vmem:[%s4174_s22 + $0x8c0] sm:$0xff] }
  0xce   : > { %3281 = vmatprep.subr.bf16.mxu1 %v3280_v35  ;;  %v462_v35 = vld [vmem:[%s4174_s22 + $0x6e0] sm:$0xff]  ;;  %v3300_v37 = vpack.c.bf16 %v465_v30, %v461_v29  ;;  %v499_v29 = vld [vmem:[%s4174_s22 + $0x808] sm:$0xff] }
  0xcf   : > { %v503_v30 = vld [vmem:[%s4174_s22 + $0x828] sm:$0xff]  ;;  %v526_v16 = vld [vmem:[%s4174_s22 + $0x8e0] sm:$0xff] }
  0xd0   : > { %2771 = vmatpush1.bf16.msra.mxu0 %v2770_v41  ;;  %v469_v41 = vld [vmem:[%s4174_s22 + $0x718] sm:$0xff]  ;;  %v2808_v36 = vpack.c.bf16 %v503_v30, %v499_v29  ;;  %v530_v29 = vld [vmem:[%s4174_s22 + $0x900] sm:$0xff] }
  0xd1   : > { %3283 = vmatpush1.bf16.msra.mxu1 %v3282_v42  ;;  %2773 = vmatprep.subr.bf16.mxu0 %v2772_v43  ;;  %v473_v42 = vld [vmem:[%s4174_s22 + $0x738] sm:$0xff]  ;;  %v2790_v43 = vpack.c.bf16 %v462_v35, %v458_v34  ;;  %v3318_v35 = vpack.c.bf16 %v496_v28, %v492_v26  ;;  %v2822_v26 = vpack.c.bf16 %v526_v16, %v522_v15  ;;  %v534_v30 = vld [vmem:[%s4174_s22 + $0x920] sm:$0xff] }
  0xd2   : > { %3285 = vmatprep.subr.bf16.mxu1 %v3284_v48  ;;  %v470_v48 = vld [vmem:[%s4174_s22 + $0x720] sm:$0xff]  ;;  %v3304_v50 = vpack.c.bf16 %v473_v42, %v469_v41  ;;  %v504_v41 = vld [vmem:[%s4174_s22 + $0x830] sm:$0xff]  ;;  %v507_v42 = vld [vmem:[%s4174_s22 + $0x848] sm:$0xff] }
  0xd4   : > { %2775 = vmatpush1.bf16.msra.mxu0 %v2774_v54  ;;  %v477_v54 = vld [vmem:[%s4174_s22 + $0x758] sm:$0xff] }
  0xd5   : > { %3287 = vmatpush1.bf16.msra.mxu1 %v3286_v55  ;;  %2777 = vmatprep.subr.bf16.mxu0 %v2776_v56  ;;  %v481_v55 = vld [vmem:[%s4174_s22 + $0x778] sm:$0xff]  ;;  %v2794_v56 = vpack.c.bf16 %v470_v48, %v466_v47 }
  0xd6   : > { %3289 = vmatprep.subr.bf16.mxu1 %v3288_v61  ;;  %v478_v61 = vld [vmem:[%s4174_s22 + $0x760] sm:$0xff]  ;;  %v3308_v63 = vpack.c.bf16 %v481_v55, %v477_v54  ;;  %v509_v47 = vld [vmem:[%s4174_s22 + $0x858] sm:$0xff]  ;;  %v508_v54 = vld [vmem:[%s4174_s22 + $0x850] sm:$0xff] }
  0xd7   : > { %v513_v48 = vld [vmem:[%s4174_s22 + $0x878] sm:$0xff] }
  0xd8   : > { %2779 = vmatpush1.bf16.msra.mxu0 %v2778_v3  ;;  %v485_v3 = vld [vmem:[%s4174_s22 + $0x798] sm:$0xff]  ;;  %v3324_v55 = vpack.c.bf16 %v513_v48, %v509_v47  ;;  %v544_v48 = vld [vmem:[%s4174_s22 + $0x970] sm:$0xff] }
  0xd9   : > { %3291 = vmatpush1.bf16.msra.mxu1 %v3290_v4  ;;  %2781 = vmatprep.subr.bf16.mxu0 %v2780_v5  ;;  %v489_v4 = vld [vmem:[%s4174_s22 + $0x7b8] sm:$0xff]  ;;  %v2798_v5 = vpack.c.bf16 %v478_v61, %v474_v60 }
  0xda   : > { %3293 = vmatprep.subr.bf16.mxu1 %v3292_v11  ;;  %v486_v11 = vld [vmem:[%s4174_s22 + $0x7a0] sm:$0xff]  ;;  %v3312_v13 = vpack.c.bf16 %v489_v4, %v485_v3  ;;  %v517_v61 = vld [vmem:[%s4174_s22 + $0x898] sm:$0xff]  ;;  %v516_v4 = vld [vmem:[%s4174_s22 + $0x890] sm:$0xff] }
  0xdb   : > { %v518_v3 = vld [vmem:[%s4174_s22 + $0x8a0] sm:$0xff] }
  0xdc   : > { %2783 = vmatpush1.bf16.msra.mxu0 %v2782_v17  ;;  %v493_v17 = vld [vmem:[%s4174_s22 + $0x7d8] sm:$0xff]  ;;  %v2818_v12 = vpack.c.bf16 %v518_v3, %v514_v2 }
  0xdd   : > { %3295 = vmatpush1.bf16.msra.mxu1 %v3294_v18  ;;  %2785 = vmatprep.subr.bf16.mxu0 %v2784_v20  ;;  %v497_v18 = vld [vmem:[%s4174_s22 + $0x7f8] sm:$0xff]  ;;  %v2802_v20 = vpack.c.bf16 %v486_v11, %v482_v9 }
  0xde   : > { %3297 = vmatprep.subr.bf16.mxu1 %v3296_v25  ;;  %v494_v25 = vld [vmem:[%s4174_s22 + $0x7e0] sm:$0xff]  ;;  %v3316_v27 = vpack.c.bf16 %v497_v18, %v493_v17  ;;  %v525_v9 = vld [vmem:[%s4174_s22 + $0x8d8] sm:$0xff]  ;;  %v524_v17 = vld [vmem:[%s4174_s22 + $0x8d0] sm:$0xff] }
  0xdf   : > { %v2806_v34 = vpack.c.bf16 %v494_v25, %v490_v24  ;;  %v529_v11 = vld [vmem:[%s4174_s22 + $0x8f8] sm:$0xff] }
  0xe0   : > { %2787 = vmatpush1.bf16.msra.mxu0 %v2786_v31  ;;  %v501_v31 = vld [vmem:[%s4174_s22 + $0x818] sm:$0xff]  ;;  %v3332_v18 = vpack.c.bf16 %v529_v11, %v525_v9  ;;  %v560_v9 = vld [vmem:[%s4174_s22 + $0x9f0] sm:$0xff]  ;;  %v563_v11 = vld [vmem:[%s4174_s22 + $0xa08] sm:$0xff] }
  0xe1   : > { %3299 = vmatpush1.bf16.msra.mxu1 %v3298_v32  ;;  %2789 = vmatprep.subr.bf16.mxu0 %v2788_v33  ;;  %v505_v32 = vld [vmem:[%s4174_s22 + $0x838] sm:$0xff]  ;;  %v4461_v33 = vsub.s32 2, %v4265_v59 }
  0xe2   : > { %3301 = vmatprep.subr.bf16.mxu1 %v3300_v37  ;;  %v498_v37 = vld [vmem:[%s4174_s22 + $0x800] sm:$0xff]  ;;  %v3320_v40 = vpack.c.bf16 %v505_v32, %v501_v31  ;;  %v533_v24 = vld [vmem:[%s4174_s22 + $0x918] sm:$0xff]  ;;  %v532_v31 = vld [vmem:[%s4174_s22 + $0x910] sm:$0xff] }
  0xe3   : > { %v2810_v49 = vpack.c.bf16 %v502_v38, %v498_v37  ;;  %v537_v25 = vld [vmem:[%s4174_s22 + $0x938] sm:$0xff] }
  0xe4   : > { %2791 = vmatpush1.bf16.msra.mxu0 %v2790_v43  ;;  %v511_v43 = vld [vmem:[%s4174_s22 + $0x868] sm:$0xff]  ;;  %v3336_v32 = vpack.c.bf16 %v537_v25, %v533_v24  ;;  %v541_v37 = vld [vmem:[%s4174_s22 + $0x958] sm:$0xff]  ;;  %v568_v24 = vld [vmem:[%s4174_s22 + $0xa30] sm:$0xff] }
  0xe5   : > { %3303 = vmatpush1.bf16.msra.mxu1 %v3302_v44  ;;  %2793 = vmatprep.subr.bf16.mxu0 %v2792_v45  ;;  %v1291_v44 = vsub.s32 5, %v4265_v59  ;;  %v1280_v45 = vrot.slane %v4284_v19, %v4461_v33  ;;  %v2812_v51 = vpack.c.bf16 %v511_v43, %v507_v42  ;;  %v545_v38 = vld [vmem:[%s4174_s22 + $0x978] sm:$0xff]  ;;  %v538_v42 = vld [vmem:[%s4174_s22 + $0x940] sm:$0xff]  ;;  %v571_v25 = vld [vmem:[%s4174_s22 + $0xa48] sm:$0xff] }
  0xe6   : > { %3305 = vmatprep.subr.bf16.mxu1 %v3304_v50  ;;  %v3322_v50 = vpack.c.bf16 %v504_v41, %v500_v39  ;;  %v2826_v39 = vpack.c.bf16 %v534_v30, %v530_v29  ;;  %v542_v43 = vld [vmem:[%s4174_s22 + $0x960] sm:$0xff]  ;;  %v3340_v47 = vpack.c.bf16 %v545_v38, %v541_v37  ;;  %v576_v37 = vld [vmem:[%s4174_s22 + $0xa70] sm:$0xff]  ;;  %v579_v38 = vld [vmem:[%s4174_s22 + $0xa88] sm:$0xff] }
  0xe7   : > { %v1292_v60 = vrot.slane %v4284_v19, %v1291_v44  ;;  %v3328_v19 = vpack.c.bf16 %v521_v62, %v517_v61  ;;  %v552_v61 = vld [vmem:[%s4174_s22 + $0x9b0] sm:$0xff]  ;;  %v555_v62 = vld [vmem:[%s4174_s22 + $0x9c8] sm:$0xff] }
  0xe8   : > { %2795 = vmatpush1.bf16.msra.mxu0 %v2794_v56  ;;  %v512_v56 = vld [vmem:[%s4174_s22 + $0x870] sm:$0xff] }
  0xe9   : > { %3307 = vmatpush1.bf16.msra.mxu1 %v3306_v57  ;;  %2797 = vmatprep.subr.bf16.mxu0 %v2796_v58  ;;  %v515_v57 = vld [vmem:[%s4174_s22 + $0x888] sm:$0xff]  ;;  %v3326_v0 = vpack.c.bf16 %v512_v56, %v508_v54  ;;  %v546_v56 = vld [vmem:[%s4174_s22 + $0x980] sm:$0xff] }
  0xea   : > { %3309 = vmatprep.subr.bf16.mxu1 %v3308_v63  ;;  %v519_v58 = vld [vmem:[%s4174_s22 + $0x8a8] sm:$0xff]  ;;  %v2814_v63 = vpack.c.bf16 %v510_v53, %v506_v52  ;;  %v553_v52 = vld [vmem:[%s4174_s22 + $0x9b8] sm:$0xff]  ;;  %v2830_v53 = vpack.c.bf16 %v542_v43, %v538_v42 }
  0xeb   : > { %v2816_v1 = vpack.c.bf16 %v519_v58, %v515_v57  ;;  %v550_v57 = vld [vmem:[%s4174_s22 + $0x9a0] sm:$0xff]  ;;  %v548_v58 = vld [vmem:[%s4174_s22 + $0x990] sm:$0xff] }
  0xec   : > { %2799 = vmatpush1.bf16.msra.mxu0 %v2798_v5  ;;  %v520_v5 = vld [vmem:[%s4174_s22 + $0x8b0] sm:$0xff]  ;;  %v2834_v2 = vpack.c.bf16 %v550_v57, %v546_v56  ;;  %v3346_v3 = vpack.c.bf16 %v552_v61, %v548_v58  ;;  %v590_v61 = vld [vmem:[%s4174_s22 + $0xae0] sm:$0xff] }
  0xed   : > { %3311 = vmatpush1.bf16.msra.mxu1 %v3310_v6  ;;  %2801 = vmatprep.subr.bf16.mxu0 %v2800_v7  ;;  %v523_v6 = vld [vmem:[%s4174_s22 + $0x8c8] sm:$0xff] }
  0xee   : > { %3313 = vmatprep.subr.bf16.mxu1 %v3312_v13  ;;  %v527_v7 = vld [vmem:[%s4174_s22 + $0x8e8] sm:$0xff]  ;;  %v3330_v13 = vpack.c.bf16 %v520_v5, %v516_v4  ;;  %v558_v5 = vld [vmem:[%s4174_s22 + $0x9e0] sm:$0xff] }
  0xef   : > { %v2820_v14 = vpack.c.bf16 %v527_v7, %v523_v6  ;;  %v556_v6 = vld [vmem:[%s4174_s22 + $0x9d0] sm:$0xff] }
  0xf0   : > { %2803 = vmatpush1.bf16.msra.mxu0 %v2802_v20  ;;  %v528_v20 = vld [vmem:[%s4174_s22 + $0x8f0] sm:$0xff]  ;;  %v3350_v16 = vpack.c.bf16 %v560_v9, %v556_v6  ;;  %v598_v9 = vld [vmem:[%s4174_s22 + $0xb20] sm:$0xff] }
  0xf1   : > { %3315 = vmatpush1.bf16.msra.mxu1 %v3314_v21  ;;  %2805 = vmatprep.subr.bf16.mxu0 %v2804_v23  ;;  %v531_v21 = vld [vmem:[%s4174_s22 + $0x908] sm:$0xff] }
  0xf2   : > { %3317 = vmatprep.subr.bf16.mxu1 %v3316_v27  ;;  %v535_v23 = vld [vmem:[%s4174_s22 + $0x928] sm:$0xff]  ;;  %v3334_v27 = vpack.c.bf16 %v528_v20, %v524_v17  ;;  %v566_v20 = vld [vmem:[%s4174_s22 + $0xa20] sm:$0xff] }
  0xf3   : > { %v2824_v28 = vpack.c.bf16 %v535_v23, %v531_v21  ;;  %v564_v21 = vld [vmem:[%s4174_s22 + $0xa10] sm:$0xff] }
  0xf4   : > { %2807 = vmatpush1.bf16.msra.mxu0 %v2806_v34  ;;  %v536_v34 = vld [vmem:[%s4174_s22 + $0x930] sm:$0xff]  ;;  %v3354_v30 = vpack.c.bf16 %v568_v24, %v564_v21  ;;  %v606_v24 = vld [vmem:[%s4174_s22 + $0xb60] sm:$0xff] }
  0xf5   : > { %3319 = vmatpush1.bf16.msra.mxu1 %v3318_v35  ;;  %2809 = vmatprep.subr.bf16.mxu0 %v2808_v36  ;;  %v539_v35 = vld [vmem:[%s4174_s22 + $0x948] sm:$0xff] }
  0xf6   : > { %3321 = vmatprep.subr.bf16.mxu1 %v3320_v40  ;;  %v543_v36 = vld [vmem:[%s4174_s22 + $0x968] sm:$0xff]  ;;  %v3338_v40 = vpack.c.bf16 %v536_v34, %v532_v31  ;;  %v574_v34 = vld [vmem:[%s4174_s22 + $0xa60] sm:$0xff] }
  0xf7   : > { %1506 = vmatmul.mubr.f32.vlgmr.msra.gmra.mrb[0].mxu0 %v1280_v45  ;;  %v2828_v41 = vpack.c.bf16 %v543_v36, %v539_v35  ;;  %v572_v35 = vld [vmem:[%s4174_s22 + $0xa50] sm:$0xff] }
  0xf8   : > { %2811 = vmatpush1.bf16.msra.mxu0 %v2810_v49  ;;  %2074 = vmatmul.mubr.f32.vlgmr.msra.gmra.mrb[0].mxu1 %v1280_v45  ;;  %v540_v45 = vld [vmem:[%s4174_s22 + $0x950] sm:$0xff]  ;;  %v547_v49 = vld [vmem:[%s4174_s22 + $0x988] sm:$0xff]  ;;  %v3358_v43 = vpack.c.bf16 %v576_v37, %v572_v35  ;;  %v614_v37 = vld [vmem:[%s4174_s22 + $0xba0] sm:$0xff] }
  0xf9   : > { %3323 = vmatpush1.bf16.msra.mxu1 %v3322_v50  ;;  %2813 = vmatprep.subr.bf16.mxu0 %v2812_v51  ;;  %v551_v50 = vld [vmem:[%s4174_s22 + $0x9a8] sm:$0xff]  ;;  %v549_v51 = vld [vmem:[%s4174_s22 + $0x998] sm:$0xff]  ;;  %v3342_v54 = vpack.c.bf16 %v544_v48, %v540_v45  ;;  %v582_v48 = vld [vmem:[%s4174_s22 + $0xaa0] sm:$0xff] }
  0xfa   : > { %3325 = vmatprep.subr.bf16.mxu1 %v3324_v55  ;;  %1576 = vmatprep.mubr.f32.mxu0 %v1292_v60  ;;  %v2832_v55 = vpack.c.bf16 %v551_v50, %v547_v49  ;;  %v580_v49 = vld [vmem:[%s4174_s22 + $0xa90] sm:$0xff] }
  0xfb   : > { %2144 = vmatprep.mubr.f32.mxu1 %v1292_v60  ;;  %v3344_v60 = vpack.c.bf16 %v553_v52, %v549_v51  ;;  %v584_v51 = vld [vmem:[%s4174_s22 + $0xab0] sm:$0xff]  ;;  %v587_v52 = vld [vmem:[%s4174_s22 + $0xac8] sm:$0xff] }
  0xfc   : > { %2815 = vmatpush1.bf16.msra.mxu0 %v2814_v63  ;;  %v559_v63 = vld [vmem:[%s4174_s22 + $0x9e8] sm:$0xff]  ;;  %v3362_v57 = vpack.c.bf16 %v584_v51, %v580_v49  ;;  %v622_v51 = vld [vmem:[%s4174_s22 + $0xbe0] sm:$0xff] }
  0xfd   : > { %3327 = vmatpush1.bf16.msra.mxu1 %v3326_v0  ;;  %2817 = vmatprep.subr.bf16.mxu0 %v2816_v1  ;;  %v557_v0 = vld [vmem:[%s4174_s22 + $0x9d8] sm:$0xff]  ;;  %v2836_v4 = vpack.c.bf16 %v559_v63, %v555_v62  ;;  %v588_v62 = vld [vmem:[%s4174_s22 + $0xad0] sm:$0xff] }
  0xfe   : > { %3329 = vmatprep.subr.bf16.mxu1 %v3328_v19  ;;  %v561_v1 = vld [vmem:[%s4174_s22 + $0x9f8] sm:$0xff]  ;;  %v554_v19 = vld [vmem:[%s4174_s22 + $0x9c0] sm:$0xff] }
  0xff   : > { %v3348_v7 = vpack.c.bf16 %v561_v1, %v557_v0  ;;  %v2838_v15 = vpack.c.bf16 %v558_v5, %v554_v19  ;;  %v592_v0 = vld [vmem:[%s4174_s22 + $0xaf0] sm:$0xff]  ;;  %v595_v1 = vld [vmem:[%s4174_s22 + $0xb08] sm:$0xff] }
 0x100   : > { %2819 = vmatpush1.bf16.msra.mxu0 %v2818_v12  ;;  %v567_v12 = vld [vmem:[%s4174_s22 + $0xa28] sm:$0xff]  ;;  %v3366_v5 = vpack.c.bf16 %v592_v0, %v588_v62  ;;  %v626_v0 = vld [vmem:[%s4174_s22 + $0xc00] sm:$0xff] }
 0x101   : > { %3331 = vmatpush1.bf16.msra.mxu1 %v3330_v13  ;;  %2821 = vmatprep.subr.bf16.mxu0 %v2820_v14  ;;  %v565_v13 = vld [vmem:[%s4174_s22 + $0xa18] sm:$0xff]  ;;  %v2840_v17 = vpack.c.bf16 %v567_v12, %v563_v11  ;;  %v596_v11 = vld [vmem:[%s4174_s22 + $0xb10] sm:$0xff] }
 0x102   : > { %3333 = vmatprep.subr.bf16.mxu1 %v3332_v18  ;;  %v569_v14 = vld [vmem:[%s4174_s22 + $0xa38] sm:$0xff]  ;;  %v562_v18 = vld [vmem:[%s4174_s22 + $0xa00] sm:$0xff] }
 0x103   : > { %v3352_v23 = vpack.c.bf16 %v569_v14, %v565_v13  ;;  %v2842_v29 = vpack.c.bf16 %v566_v20, %v562_v18  ;;  %v600_v13 = vld [vmem:[%s4174_s22 + $0xb30] sm:$0xff]  ;;  %v603_v14 = vld [vmem:[%s4174_s22 + $0xb48] sm:$0xff] }
 0x104   : > { %2823 = vmatpush1.bf16.msra.mxu0 %v2822_v26  ;;  %v575_v26 = vld [vmem:[%s4174_s22 + $0xa68] sm:$0xff]  ;;  %v3370_v20 = vpack.c.bf16 %v600_v13, %v596_v11  ;;  %v637_v11 = vld [vmem:[%s4174_s22 + $0xc58] sm:$0xff] }
 0x105   : > { %3335 = vmatpush1.bf16.msra.mxu1 %v3334_v27  ;;  %2825 = vmatprep.subr.bf16.mxu0 %v2824_v28  ;;  %v573_v27 = vld [vmem:[%s4174_s22 + $0xa58] sm:$0xff]  ;;  %v2844_v31 = vpack.c.bf16 %v575_v26, %v571_v25  ;;  %v604_v25 = vld [vmem:[%s4174_s22 + $0xb50] sm:$0xff] }
 0x106   : > { %3337 = vmatprep.subr.bf16.mxu1 %v3336_v32  ;;  %v577_v28 = vld [vmem:[%s4174_s22 + $0xa78] sm:$0xff]  ;;  %v570_v32 = vld [vmem:[%s4174_s22 + $0xa40] sm:$0xff] }
 0x107   : > { %v3356_v36 = vpack.c.bf16 %v577_v28, %v573_v27  ;;  %v2846_v42 = vpack.c.bf16 %v574_v34, %v570_v32  ;;  %v608_v27 = vld [vmem:[%s4174_s22 + $0xb70] sm:$0xff]  ;;  %v611_v28 = vld [vmem:[%s4174_s22 + $0xb88] sm:$0xff] }
 0x108   : > { %2827 = vmatpush1.bf16.msra.mxu0 %v2826_v39  ;;  %v583_v39 = vld [vmem:[%s4174_s22 + $0xaa8] sm:$0xff]  ;;  %v3374_v34 = vpack.c.bf16 %v608_v27, %v604_v25  ;;  %v649_v27 = vld [vmem:[%s4174_s22 + $0xcb8] sm:$0xff] }
 0x109   : > { %3339 = vmatpush1.bf16.msra.mxu1 %v3338_v40  ;;  %2829 = vmatprep.subr.bf16.mxu0 %v2828_v41  ;;  %v581_v40 = vld [vmem:[%s4174_s22 + $0xa98] sm:$0xff]  ;;  %v2848_v45 = vpack.c.bf16 %v583_v39, %v579_v38  ;;  %v612_v38 = vld [vmem:[%s4174_s22 + $0xb90] sm:$0xff] }
 0x10a   : > { %3341 = vmatprep.subr.bf16.mxu1 %v3340_v47  ;;  %v585_v41 = vld [vmem:[%s4174_s22 + $0xab8] sm:$0xff]  ;;  %v578_v47 = vld [vmem:[%s4174_s22 + $0xa80] sm:$0xff] }
 0x10b   : > { %v3360_v50 = vpack.c.bf16 %v585_v41, %v581_v40  ;;  %v2850_v56 = vpack.c.bf16 %v582_v48, %v578_v47  ;;  %v616_v40 = vld [vmem:[%s4174_s22 + $0xbb0] sm:$0xff]  ;;  %v619_v41 = vld [vmem:[%s4174_s22 + $0xbc8] sm:$0xff] }
 0x10c   : > { %2831 = vmatpush1.bf16.msra.mxu0 %v2830_v53  ;;  %v591_v53 = vld [vmem:[%s4174_s22 + $0xae8] sm:$0xff]  ;;  %v3378_v48 = vpack.c.bf16 %v616_v40, %v612_v38  ;;  %v657_v40 = vld [vmem:[%s4174_s22 + $0xcf8] sm:$0xff] }
 0x10d   : > { %3343 = vmatpush1.bf16.msra.mxu1 %v3342_v54  ;;  %2833 = vmatprep.subr.bf16.mxu0 %v2832_v55  ;;  %v589_v54 = vld [vmem:[%s4174_s22 + $0xad8] sm:$0xff]  ;;  %v2852_v58 = vpack.c.bf16 %v591_v53, %v587_v52  ;;  %v620_v52 = vld [vmem:[%s4174_s22 + $0xbd0] sm:$0xff]  ;;  %v655_v38 = vld [vmem:[%s4174_s22 + $0xce8] sm:$0xff] }
 0x10e   : > { %3345 = vmatprep.subr.bf16.mxu1 %v3344_v60  ;;  %v593_v55 = vld [vmem:[%s4174_s22 + $0xaf8] sm:$0xff]  ;;  %v586_v60 = vld [vmem:[%s4174_s22 + $0xac0] sm:$0xff] }
 0x10f   : > { %v3364_v63 = vpack.c.bf16 %v593_v55, %v589_v54  ;;  %v2854_v19 = vpack.c.bf16 %v590_v61, %v586_v60  ;;  %v624_v54 = vld [vmem:[%s4174_s22 + $0xbf0] sm:$0xff]  ;;  %v627_v55 = vld [vmem:[%s4174_s22 + $0xc08] sm:$0xff]  ;;  %v1287_v60 = vsub.s32 4, %v4265_v59 }
 0x110   : > { %2835 = vmatpush1.bf16.msra.mxu0 %v2834_v2  ;;  %v599_v2 = vld [vmem:[%s4174_s22 + $0xb28] sm:$0xff]  ;;  %v3382_v62 = vpack.c.bf16 %v624_v54, %v620_v52  ;;  %v665_v54 = vld [vmem:[%s4174_s22 + $0xd38] sm:$0xff] }
 0x111   : > { %3347 = vmatpush1.bf16.msra.mxu1 %v3346_v3  ;;  %2837 = vmatprep.subr.bf16.mxu0 %v2836_v4  ;;  %v597_v3 = vld [vmem:[%s4174_s22 + $0xb18] sm:$0xff]  ;;  %v2856_v6 = vpack.c.bf16 %v599_v2, %v595_v1  ;;  %v630_v1 = vld [vmem:[%s4174_s22 + $0xc20] sm:$0xff]  ;;  %v628_v2 = vld [vmem:[%s4174_s22 + $0xc10] sm:$0xff] }
 0x112   : > { %3349 = vmatprep.subr.bf16.mxu1 %v3348_v7  ;;  %v601_v4 = vld [vmem:[%s4174_s22 + $0xb38] sm:$0xff]  ;;  %v594_v7 = vld [vmem:[%s4174_s22 + $0xb00] sm:$0xff]  ;;  %v2874_v13 = vpack.c.bf16 %v630_v1, %v626_v0  ;;  %v663_v52 = vld [vmem:[%s4174_s22 + $0xd28] sm:$0xff] }
 0x113   : > { %v3368_v12 = vpack.c.bf16 %v601_v4, %v597_v3  ;;  %v2858_v18 = vpack.c.bf16 %v598_v9, %v594_v7  ;;  %v632_v4 = vld [vmem:[%s4174_s22 + $0xc30] sm:$0xff]  ;;  %v667_v1 = vld [vmem:[%s4174_s22 + $0xd48] sm:$0xff] }
 0x114   : > { %2839 = vmatpush1.bf16.msra.mxu0 %v2838_v15  ;;  %v607_v15 = vld [vmem:[%s4174_s22 + $0xb68] sm:$0xff]  ;;  %v4605_v7 = vld [vmem:[#allocation2] sm:$0xff] }
 0x115   : > { %3351 = vmatpush1.bf16.msra.mxu1 %v3350_v16  ;;  %2841 = vmatprep.subr.bf16.mxu0 %v2840_v17  ;;  %v605_v16 = vld [vmem:[%s4174_s22 + $0xb58] sm:$0xff]  ;;  %v2860_v21 = vpack.c.bf16 %v607_v15, %v603_v14  ;;  %v1288_v9 = vrot.slane %v4605_v7, %v1287_v60  ;;  %v3386_v14 = vpack.c.bf16 %v632_v4, %v628_v2  ;;  %v664_v0 = vld [vmem:[%s4174_s22 + $0xd30] sm:$0xff]  ;;  %v671_v2 = vld [vmem:[%s4174_s22 + $0xd68] sm:$0xff] }
 0x116   : > { %3353 = vmatprep.subr.bf16.mxu1 %v3352_v23  ;;  %v609_v17 = vld [vmem:[%s4174_s22 + $0xb78] sm:$0xff]  ;;  %v602_v23 = vld [vmem:[%s4174_s22 + $0xb40] sm:$0xff] }
 0x117   : > { %v3372_v26 = vpack.c.bf16 %v609_v17, %v605_v16  ;;  %v2862_v32 = vpack.c.bf16 %v606_v24, %v602_v23  ;;  %v634_v16 = vld [vmem:[%s4174_s22 + $0xc40] sm:$0xff]  ;;  %v643_v23 = vld [vmem:[%s4174_s22 + $0xc88] sm:$0xff]  ;;  %v673_v4 = vld [vmem:[%s4174_s22 + $0xd78] sm:$0xff] }
 0x118   : > { %2843 = vmatpush1.bf16.msra.mxu0 %v2842_v29  ;;  %v615_v29 = vld [vmem:[%s4174_s22 + $0xba8] sm:$0xff]  ;;  %v638_v17 = vld [vmem:[%s4174_s22 + $0xc60] sm:$0xff] }
 0x119   : > { %3355 = vmatpush1.bf16.msra.mxu1 %v3354_v30  ;;  %2845 = vmatprep.subr.bf16.mxu0 %v2844_v31  ;;  %v613_v30 = vld [vmem:[%s4174_s22 + $0xb98] sm:$0xff]  ;;  %v2864_v35 = vpack.c.bf16 %v615_v29, %v611_v28  ;;  %v647_v24 = vld [vmem:[%s4174_s22 + $0xca8] sm:$0xff]  ;;  %v2878_v28 = vpack.c.bf16 %v638_v17, %v634_v16 }
 0x11a   : > { %3357 = vmatprep.subr.bf16.mxu1 %v3356_v36  ;;  %v617_v31 = vld [vmem:[%s4174_s22 + $0xbb8] sm:$0xff]  ;;  %v610_v36 = vld [vmem:[%s4174_s22 + $0xb80] sm:$0xff]  ;;  %v675_v16 = vld [vmem:[%s4174_s22 + $0xd88] sm:$0xff] }
 0x11b   : > { %v3376_v39 = vpack.c.bf16 %v617_v31, %v613_v30  ;;  %v2866_v47 = vpack.c.bf16 %v614_v37, %v610_v36  ;;  %v2880_v30 = vpack.c.bf16 %v647_v24, %v643_v23  ;;  %v642_v31 = vld [vmem:[%s4174_s22 + $0xc80] sm:$0xff]  ;;  %v648_v36 = vld [vmem:[%s4174_s22 + $0xcb0] sm:$0xff]  ;;  %v651_v37 = vld [vmem:[%s4174_s22 + $0xcc8] sm:$0xff] }
 0x11c   : > { %2847 = vmatpush1.bf16.msra.mxu0 %v2846_v42  ;;  %v623_v42 = vld [vmem:[%s4174_s22 + $0xbe8] sm:$0xff] }
 0x11d   : > { %3359 = vmatpush1.bf16.msra.mxu1 %v3358_v43  ;;  %2849 = vmatprep.subr.bf16.mxu0 %v2848_v45  ;;  %v621_v43 = vld [vmem:[%s4174_s22 + $0xbd8] sm:$0xff]  ;;  %v2868_v49 = vpack.c.bf16 %v623_v42, %v619_v41  ;;  %v679_v17 = vld [vmem:[%s4174_s22 + $0xda8] sm:$0xff] }
 0x11e   : > { %3361 = vmatprep.subr.bf16.mxu1 %v3360_v50  ;;  %v625_v45 = vld [vmem:[%s4174_s22 + $0xbf8] sm:$0xff]  ;;  %v618_v50 = vld [vmem:[%s4174_s22 + $0xbc0] sm:$0xff]  ;;  %v2896_v24 = vpack.c.bf16 %v679_v17, %v675_v16 }
 0x11f   : > { %v3380_v53 = vpack.c.bf16 %v625_v45, %v621_v43  ;;  %v2870_v61 = vpack.c.bf16 %v622_v51, %v618_v50  ;;  %v2884_v43 = vpack.c.bf16 %v655_v38, %v651_v37  ;;  %v650_v45 = vld [vmem:[%s4174_s22 + $0xcc0] sm:$0xff]  ;;  %v656_v50 = vld [vmem:[%s4174_s22 + $0xcf0] sm:$0xff]  ;;  %v659_v51 = vld [vmem:[%s4174_s22 + $0xd08] sm:$0xff] }
 0x120   : > { %2851 = vmatpush1.bf16.msra.mxu0 %v2850_v56  ;;  %v631_v56 = vld [vmem:[%s4174_s22 + $0xc28] sm:$0xff]  ;;  %v682_v38 = vld [vmem:[%s4174_s22 + $0xdc0] sm:$0xff] }
 0x121   : > { %3363 = vmatpush1.bf16.msra.mxu1 %v3362_v57  ;;  %2853 = vmatprep.subr.bf16.mxu0 %v2852_v58  ;;  %v629_v57 = vld [vmem:[%s4174_s22 + $0xc18] sm:$0xff]  ;;  %v706_v17 = vld [vmem:[%s4174_s22 + $0xe80] sm:$0xff] }
 0x122   : > { %3365 = vmatprep.subr.bf16.mxu1 %v3364_v63  ;;  %v633_v58 = vld [vmem:[%s4174_s22 + $0xc38] sm:$0xff]  ;;  %v2872_v63 = vpack.c.bf16 %v631_v56, %v627_v55 }
 0x123   : > { %v3384_v3 = vpack.c.bf16 %v633_v58, %v629_v57  ;;  %v2888_v57 = vpack.c.bf16 %v663_v52, %v659_v51  ;;  %v658_v58 = vld [vmem:[%s4174_s22 + $0xd00] sm:$0xff] }
 0x124   : > { %2855 = vmatpush1.bf16.msra.mxu0 %v2854_v19  ;;  %v635_v19 = vld [vmem:[%s4174_s22 + $0xc48] sm:$0xff]  ;;  %v690_v52 = vld [vmem:[%s4174_s22 + $0xe00] sm:$0xff] }
 0x125   : > { %3367 = vmatpush1.bf16.msra.mxu1 %v3366_v5  ;;  %2857 = vmatprep.subr.bf16.mxu0 %v2856_v6  ;;  %v639_v5 = vld [vmem:[%s4174_s22 + $0xc68] sm:$0xff]  ;;  %v1299_v6 = vsub.s32 7, %v4265_v59 }
 0x126   : > { %3369 = vmatprep.subr.bf16.mxu1 %v3368_v12  ;;  %v641_v12 = vld [vmem:[%s4174_s22 + $0xc78] sm:$0xff]  ;;  %v2876_v15 = vpack.c.bf16 %v639_v5, %v635_v19 }
 0x127   : > { %v1300_v25 = vrot.slane %v4605_v7, %v1299_v6 }
 0x128   : > { %2859 = vmatpush1.bf16.msra.mxu0 %v2858_v18  ;;  %v636_v18 = vld [vmem:[%s4174_s22 + $0xc50] sm:$0xff] }
 0x129   : > { %3371 = vmatpush1.bf16.msra.mxu1 %v3370_v20  ;;  %2861 = vmatprep.subr.bf16.mxu0 %v2860_v21  ;;  %v3388_v20 = vpack.c.bf16 %v641_v12, %v637_v11  ;;  %v640_v21 = vld [vmem:[%s4174_s22 + $0xc70] sm:$0xff]  ;;  %v666_v11 = vld [vmem:[%s4174_s22 + $0xd40] sm:$0xff] }
 0x12a   : > { %3373 = vmatprep.subr.bf16.mxu1 %v3372_v26  ;;  %v645_v26 = vld [vmem:[%s4174_s22 + $0xc98] sm:$0xff]  ;;  %v3390_v29 = vpack.c.bf16 %v640_v21, %v636_v18  ;;  %v670_v12 = vld [vmem:[%s4174_s22 + $0xd60] sm:$0xff] }
 0x12b   : > { %v677_v18 = vld [vmem:[%s4174_s22 + $0xd98] sm:$0xff]  ;;  %v2894_v21 = vpack.c.bf16 %v670_v12, %v666_v11  ;;  %v711_v11 = vld [vmem:[%s4174_s22 + $0xea8] sm:$0xff] }
 0x12c   : > { %2863 = vmatpush1.bf16.msra.mxu0 %v2862_v32  ;;  %v646_v32 = vld [vmem:[%s4174_s22 + $0xca0] sm:$0xff]  ;;  %v709_v12 = vld [vmem:[%s4174_s22 + $0xe98] sm:$0xff] }
 0x12d   : > { %3375 = vmatpush1.bf16.msra.mxu1 %v3374_v34  ;;  %2865 = vmatprep.subr.bf16.mxu0 %v2864_v35  ;;  %v644_v34 = vld [vmem:[%s4174_s22 + $0xc90] sm:$0xff]  ;;  %v3392_v35 = vpack.c.bf16 %v649_v27, %v645_v26  ;;  %v2882_v41 = vpack.c.bf16 %v646_v32, %v642_v31  ;;  %v678_v26 = vld [vmem:[%s4174_s22 + $0xda0] sm:$0xff]  ;;  %v687_v31 = vld [vmem:[%s4174_s22 + $0xde8] sm:$0xff] }
 0x12e   : > { %3377 = vmatprep.subr.bf16.mxu1 %v3376_v39  ;;  %v653_v39 = vld [vmem:[%s4174_s22 + $0xcd8] sm:$0xff]  ;;  %v3394_v42 = vpack.c.bf16 %v648_v36, %v644_v34  ;;  %v676_v27 = vld [vmem:[%s4174_s22 + $0xd90] sm:$0xff] }
 0x12f   : > { %v685_v32 = vld [vmem:[%s4174_s22 + $0xdd8] sm:$0xff] }
 0x130   : > { %2867 = vmatpush1.bf16.msra.mxu0 %v2866_v47  ;;  %v654_v47 = vld [vmem:[%s4174_s22 + $0xce0] sm:$0xff]  ;;  %v689_v34 = vld [vmem:[%s4174_s22 + $0xdf8] sm:$0xff] }
 0x131   : > { %3379 = vmatpush1.bf16.msra.mxu1 %v3378_v48  ;;  %2869 = vmatprep.subr.bf16.mxu0 %v2868_v49  ;;  %v652_v48 = vld [vmem:[%s4174_s22 + $0xcd0] sm:$0xff]  ;;  %v3396_v49 = vpack.c.bf16 %v657_v40, %v653_v39  ;;  %v2886_v55 = vpack.c.bf16 %v654_v47, %v650_v45  ;;  %v686_v39 = vld [vmem:[%s4174_s22 + $0xde0] sm:$0xff]  ;;  %v695_v45 = vld [vmem:[%s4174_s22 + $0xe28] sm:$0xff] }
 0x132   : > { %3381 = vmatprep.subr.bf16.mxu1 %v3380_v53  ;;  %v661_v53 = vld [vmem:[%s4174_s22 + $0xd18] sm:$0xff]  ;;  %v3398_v56 = vpack.c.bf16 %v656_v50, %v652_v48  ;;  %v684_v40 = vld [vmem:[%s4174_s22 + $0xdd0] sm:$0xff] }
 0x133   : > { %v693_v47 = vld [vmem:[%s4174_s22 + $0xe18] sm:$0xff] }
 0x134   : > { %2871 = vmatpush1.bf16.msra.mxu0 %v2870_v61  ;;  %v662_v61 = vld [vmem:[%s4174_s22 + $0xd20] sm:$0xff]  ;;  %v697_v48 = vld [vmem:[%s4174_s22 + $0xe38] sm:$0xff] }
 0x135   : > { %3383 = vmatpush1.bf16.msra.mxu1 %v3382_v62  ;;  %2873 = vmatprep.subr.bf16.mxu0 %v2872_v63  ;;  %v660_v62 = vld [vmem:[%s4174_s22 + $0xd10] sm:$0xff]  ;;  %v3400_v63 = vpack.c.bf16 %v665_v54, %v661_v53  ;;  %v2890_v19 = vpack.c.bf16 %v662_v61, %v658_v58  ;;  %v694_v53 = vld [vmem:[%s4174_s22 + $0xe20] sm:$0xff]  ;;  %v703_v58 = vld [vmem:[%s4174_s22 + $0xe68] sm:$0xff] }
 0x136   : > { %3385 = vmatprep.subr.bf16.mxu1 %v3384_v3  ;;  %v669_v3 = vld [vmem:[%s4174_s22 + $0xd58] sm:$0xff]  ;;  %v3402_v5 = vpack.c.bf16 %v664_v0, %v660_v62  ;;  %v692_v54 = vld [vmem:[%s4174_s22 + $0xe10] sm:$0xff] }
 0x137   : > { %1577 = vmatmul.mubr.f32.vlgmr.msra.gmra.mrb[0].mxu0 %v1288_v9  ;;  %v701_v61 = vld [vmem:[%s4174_s22 + $0xe58] sm:$0xff] }
 0x138   : > { %2875 = vmatpush1.bf16.msra.mxu0 %v2874_v13  ;;  %2145 = vmatmul.mubr.f32.vlgmr.msra.gmra.mrb[0].mxu1 %v1288_v9  ;;  %v2892_v9 = vpack.c.bf16 %v671_v2, %v667_v1  ;;  %v668_v13 = vld [vmem:[%s4174_s22 + $0xd50] sm:$0xff]  ;;  %v705_v62 = vld [vmem:[%s4174_s22 + $0xe78] sm:$0xff]  ;;  %v698_v2 = vld [vmem:[%s4174_s22 + $0xe40] sm:$0xff] }
 0x139   : > { %3387 = vmatpush1.bf16.msra.mxu1 %v3386_v14  ;;  %2877 = vmatprep.subr.bf16.mxu0 %v2876_v15  ;;  %v3404_v14 = vpack.c.bf16 %v673_v4, %v669_v3  ;;  %v672_v15 = vld [vmem:[%s4174_s22 + $0xd70] sm:$0xff]  ;;  %v702_v3 = vld [vmem:[%s4174_s22 + $0xe60] sm:$0xff] }
 0x13a   : > { %3389 = vmatprep.subr.bf16.mxu1 %v3388_v20  ;;  %1647 = vmatprep.mubr.f32.mxu0 %v1300_v25  ;;  %v681_v20 = vld [vmem:[%s4174_s22 + $0xdb8] sm:$0xff]  ;;  %v3406_v23 = vpack.c.bf16 %v672_v15, %v668_v13  ;;  %v700_v4 = vld [vmem:[%s4174_s22 + $0xe50] sm:$0xff] }
 0x13b   : > { %2215 = vmatprep.mubr.f32.mxu1 %v1300_v25  ;;  %v674_v25 = vld [vmem:[%s4174_s22 + $0xd80] sm:$0xff]  ;;  %v713_v13 = vld [vmem:[%s4174_s22 + $0xeb8] sm:$0xff] }
 0x13c   : > { %2879 = vmatpush1.bf16.msra.mxu0 %v2878_v28  ;;  %v3408_v28 = vpack.c.bf16 %v681_v20, %v677_v18  ;;  %v710_v18 = vld [vmem:[%s4174_s22 + $0xea0] sm:$0xff]  ;;  %v708_v20 = vld [vmem:[%s4174_s22 + $0xe90] sm:$0xff] }
 0x13d   : > { %3391 = vmatpush1.bf16.msra.mxu1 %v3390_v29  ;;  %2881 = vmatprep.subr.bf16.mxu0 %v2880_v30  ;;  %v680_v29 = vld [vmem:[%s4174_s22 + $0xdb0] sm:$0xff]  ;;  %v683_v30 = vld [vmem:[%s4174_s22 + $0xdc8] sm:$0xff] }
 0x13e   : > { %3393 = vmatprep.subr.bf16.mxu1 %v3392_v35  ;;  %v2898_v35 = vpack.c.bf16 %v678_v26, %v674_v25  ;;  %v3410_v36 = vpack.c.bf16 %v680_v29, %v676_v27  ;;  %v2900_v37 = vpack.c.bf16 %v687_v31, %v683_v30  ;;  %v719_v25 = vld [vmem:[%s4174_s22 + $0xee8] sm:$0xff]  ;;  %v717_v26 = vld [vmem:[%s4174_s22 + $0xed8] sm:$0xff]  ;;  %v714_v31 = vld [vmem:[%s4174_s22 + $0xec0] sm:$0xff] }
 0x13f   : > { %v721_v27 = vld [vmem:[%s4174_s22 + $0xef8] sm:$0xff] }
 0x140   : > { %2883 = vmatpush1.bf16.msra.mxu0 %v2882_v41  ;;  %v3412_v41 = vpack.c.bf16 %v689_v34, %v685_v32  ;;  %v718_v32 = vld [vmem:[%s4174_s22 + $0xee0] sm:$0xff]  ;;  %v716_v34 = vld [vmem:[%s4174_s22 + $0xed0] sm:$0xff] }
 0x141   : > { %3395 = vmatpush1.bf16.msra.mxu1 %v3394_v42  ;;  %2885 = vmatprep.subr.bf16.mxu0 %v2884_v43  ;;  %v688_v42 = vld [vmem:[%s4174_s22 + $0xdf0] sm:$0xff]  ;;  %v691_v43 = vld [vmem:[%s4174_s22 + $0xe08] sm:$0xff] }
 0x142   : > { %3397 = vmatprep.subr.bf16.mxu1 %v3396_v49  ;;  %v2902_v49 = vpack.c.bf16 %v686_v39, %v682_v38  ;;  %v3414_v50 = vpack.c.bf16 %v688_v42, %v684_v40  ;;  %v2904_v51 = vpack.c.bf16 %v695_v45, %v691_v43  ;;  %v727_v38 = vld [vmem:[%s4174_s22 + $0xf28] sm:$0xff]  ;;  %v725_v39 = vld [vmem:[%s4174_s22 + $0xf18] sm:$0xff]  ;;  %v722_v45 = vld [vmem:[%s4174_s22 + $0xf00] sm:$0xff] }
 0x143   : > { %v729_v40 = vld [vmem:[%s4174_s22 + $0xf38] sm:$0xff] }
 0x144   : > { %2887 = vmatpush1.bf16.msra.mxu0 %v2886_v55  ;;  %v3416_v55 = vpack.c.bf16 %v697_v48, %v693_v47  ;;  %v726_v47 = vld [vmem:[%s4174_s22 + $0xf20] sm:$0xff]  ;;  %v724_v48 = vld [vmem:[%s4174_s22 + $0xf10] sm:$0xff] }
 0x145   : > { %3399 = vmatpush1.bf16.msra.mxu1 %v3398_v56  ;;  %2889 = vmatprep.subr.bf16.mxu0 %v2888_v57  ;;  %v696_v56 = vld [vmem:[%s4174_s22 + $0xe30] sm:$0xff]  ;;  %v699_v57 = vld [vmem:[%s4174_s22 + $0xe48] sm:$0xff] }
 0x146   : > { %3401 = vmatprep.subr.bf16.mxu1 %v3400_v63  ;;  %v2906_v63 = vpack.c.bf16 %v694_v53, %v690_v52  ;;  %v3418_v0 = vpack.c.bf16 %v696_v56, %v692_v54  ;;  %v2908_v1 = vpack.c.bf16 %v703_v58, %v699_v57  ;;  %v735_v52 = vld [vmem:[%s4174_s22 + $0xf68] sm:$0xff]  ;;  %v733_v53 = vld [vmem:[%s4174_s22 + $0xf58] sm:$0xff]  ;;  %v730_v58 = vld [vmem:[%s4174_s22 + $0xf40] sm:$0xff] }
 0x147   : > { %v737_v54 = vld [vmem:[%s4174_s22 + $0xf78] sm:$0xff] }
 0x148   : > { %2891 = vmatpush1.bf16.msra.mxu0 %v2890_v19  ;;  %v3420_v19 = vpack.c.bf16 %v705_v62, %v701_v61  ;;  %v734_v61 = vld [vmem:[%s4174_s22 + $0xf60] sm:$0xff]  ;;  %v732_v62 = vld [vmem:[%s4174_s22 + $0xf50] sm:$0xff] }
 0x149   : > { %3403 = vmatpush1.bf16.msra.mxu1 %v3402_v5  ;;  %2893 = vmatprep.subr.bf16.mxu0 %v2892_v9  ;;  %v704_v5 = vld [vmem:[%s4174_s22 + $0xe70] sm:$0xff]  ;;  %v707_v9 = vld [vmem:[%s4174_s22 + $0xe88] sm:$0xff] }
 0x14a   : > { %3405 = vmatprep.subr.bf16.mxu1 %v3404_v14  ;;  %v2910_v14 = vpack.c.bf16 %v702_v3, %v698_v2  ;;  %v3422_v15 = vpack.c.bf16 %v704_v5, %v700_v4  ;;  %v2912_v16 = vpack.c.bf16 %v711_v11, %v707_v9  ;;  %v743_v2 = vld [vmem:[%s4174_s22 + $0xfa8] sm:$0xff]  ;;  %v741_v3 = vld [vmem:[%s4174_s22 + $0xf98] sm:$0xff]  ;;  %v738_v11 = vld [vmem:[%s4174_s22 + $0xf80] sm:$0xff] }
 0x14b   : > { %v745_v4 = vld [vmem:[%s4174_s22 + $0xfb8] sm:$0xff] }
 0x14c   : > { %2895 = vmatpush1.bf16.msra.mxu0 %v2894_v21  ;;  %v3424_v21 = vpack.c.bf16 %v713_v13, %v709_v12  ;;  %v742_v12 = vld [vmem:[%s4174_s22 + $0xfa0] sm:$0xff]  ;;  %v740_v13 = vld [vmem:[%s4174_s22 + $0xf90] sm:$0xff] }
 0x14d   : > { %3407 = vmatpush1.bf16.msra.mxu1 %v3406_v23  ;;  %2897 = vmatprep.subr.bf16.mxu0 %v2896_v24  ;;  %v712_v23 = vld [vmem:[%s4174_s22 + $0xeb0] sm:$0xff]  ;;  %v715_v24 = vld [vmem:[%s4174_s22 + $0xec8] sm:$0xff] }
 0x14e   : > { %3409 = vmatprep.subr.bf16.mxu1 %v3408_v28  ;;  %v2914_v28 = vpack.c.bf16 %v710_v18, %v706_v17  ;;  %v3426_v29 = vpack.c.bf16 %v712_v23, %v708_v20  ;;  %v2916_v30 = vpack.c.bf16 %v719_v25, %v715_v24  ;;  %v751_v17 = vld [vmem:[%s4174_s22 + $0xfe8] sm:$0xff]  ;;  %v749_v18 = vld [vmem:[%s4174_s22 + $0xfd8] sm:$0xff]  ;;  %v746_v25 = vld [vmem:[%s4174_s22 + $0xfc0] sm:$0xff] }
 0x14f   : > { %v753_v20 = vld [vmem:[%s4174_s22 + $0xff8] sm:$0xff] }
 0x150   : > { %2899 = vmatpush1.bf16.msra.mxu0 %v2898_v35  ;;  %v3428_v35 = vpack.c.bf16 %v721_v27, %v717_v26  ;;  %v750_v26 = vld [vmem:[%s4174_s22 + $0xfe0] sm:$0xff]  ;;  %v748_v27 = vld [vmem:[%s4174_s22 + $0xfd0] sm:$0xff] }
 0x151   : > { %3411 = vmatpush1.bf16.msra.mxu1 %v3410_v36  ;;  %2901 = vmatprep.subr.bf16.mxu0 %v2900_v37  ;;  %v720_v36 = vld [vmem:[%s4174_s22 + $0xef0] sm:$0xff]  ;;  %v723_v37 = vld [vmem:[%s4174_s22 + $0xf08] sm:$0xff] }
 0x152   : > { %3413 = vmatprep.subr.bf16.mxu1 %v3412_v41  ;;  %v2918_v41 = vpack.c.bf16 %v718_v32, %v714_v31  ;;  %v3430_v42 = vpack.c.bf16 %v720_v36, %v716_v34  ;;  %v2920_v43 = vpack.c.bf16 %v727_v38, %v723_v37  ;;  %v759_v31 = vld [vmem:[%s4174_s22 + $0x1028] sm:$0xff]  ;;  %v757_v32 = vld [vmem:[%s4174_s22 + $0x1018] sm:$0xff]  ;;  %v2934_v36 = vpack.c.bf16 %v750_v26, %v746_v25  ;;  %v784_v26 = vld [vmem:[%s4174_s22 + $0x10f0] sm:$0xff] }
 0x153   : > { %v761_v34 = vld [vmem:[%s4174_s22 + $0x1038] sm:$0xff] }
 0x154   : > { %2903 = vmatpush1.bf16.msra.mxu0 %v2902_v49  ;;  %v3432_v49 = vpack.c.bf16 %v729_v40, %v725_v39  ;;  %v754_v39 = vld [vmem:[%s4174_s22 + $0x1000] sm:$0xff] }
 0x155   : > { %3415 = vmatpush1.bf16.msra.mxu1 %v3414_v50  ;;  %2905 = vmatprep.subr.bf16.mxu0 %v2904_v51  ;;  %v728_v50 = vld [vmem:[%s4174_s22 + $0xf30] sm:$0xff]  ;;  %v731_v51 = vld [vmem:[%s4174_s22 + $0xf48] sm:$0xff]  ;;  %v758_v40 = vld [vmem:[%s4174_s22 + $0x1020] sm:$0xff] }
 0x156   : > { %3417 = vmatprep.subr.bf16.mxu1 %v3416_v55  ;;  %v2922_v55 = vpack.c.bf16 %v726_v47, %v722_v45  ;;  %v3434_v56 = vpack.c.bf16 %v728_v50, %v724_v48  ;;  %v2924_v57 = vpack.c.bf16 %v735_v52, %v731_v51  ;;  %v763_v45 = vld [vmem:[%s4174_s22 + $0x1048] sm:$0xff]  ;;  %v769_v50 = vld [vmem:[%s4174_s22 + $0x1078] sm:$0xff]  ;;  %v2938_v52 = vpack.c.bf16 %v758_v40, %v754_v39  ;;  %v792_v40 = vld [vmem:[%s4174_s22 + $0x1130] sm:$0xff] }
 0x157   : > { %v767_v47 = vld [vmem:[%s4174_s22 + $0x1068] sm:$0xff]  ;;  %v4747_v51 = vld [vmem:[#allocation2 + $0x8] sm:$0xff] }
 0x158   : > { %2907 = vmatpush1.bf16.msra.mxu0 %v2906_v63  ;;  %v3436_v63 = vpack.c.bf16 %v737_v54, %v733_v53  ;;  %v2940_v54 = vpack.c.bf16 %v767_v47, %v763_v45  ;;  %v801_v45 = vld [vmem:[%s4174_s22 + $0x1178] sm:$0xff] }
 0x159   : > { %3419 = vmatpush1.bf16.msra.mxu1 %v3418_v0  ;;  %2909 = vmatprep.subr.bf16.mxu0 %v2908_v1  ;;  %v736_v0 = vld [vmem:[%s4174_s22 + $0xf70] sm:$0xff]  ;;  %v739_v1 = vld [vmem:[%s4174_s22 + $0xf88] sm:$0xff] }
 0x15a   : > { %3421 = vmatprep.subr.bf16.mxu1 %v3420_v19  ;;  %v2926_v19 = vpack.c.bf16 %v734_v61, %v730_v58  ;;  %v3438_v5 = vpack.c.bf16 %v736_v0, %v732_v62  ;;  %v2928_v9 = vpack.c.bf16 %v743_v2, %v739_v1  ;;  %v768_v58 = vld [vmem:[%s4174_s22 + $0x1070] sm:$0xff]  ;;  %v771_v61 = vld [vmem:[%s4174_s22 + $0x1088] sm:$0xff]  ;;  %v773_v0 = vld [vmem:[%s4174_s22 + $0x1098] sm:$0xff] }
 0x15b   : > { %v775_v62 = vld [vmem:[%s4174_s22 + $0x10a8] sm:$0xff]  ;;  %v777_v1 = vld [vmem:[%s4174_s22 + $0x10b8] sm:$0xff] }
 0x15c   : > { %2911 = vmatpush1.bf16.msra.mxu0 %v2910_v14  ;;  %v3440_v14 = vpack.c.bf16 %v745_v4, %v741_v3  ;;  %v2944_v4 = vpack.c.bf16 %v775_v62, %v771_v61 }
 0x15d   : > { %3423 = vmatpush1.bf16.msra.mxu1 %v3422_v15  ;;  %2913 = vmatprep.subr.bf16.mxu0 %v2912_v16  ;;  %v744_v15 = vld [vmem:[%s4174_s22 + $0xfb0] sm:$0xff]  ;;  %v747_v16 = vld [vmem:[%s4174_s22 + $0xfc8] sm:$0xff] }
 0x15e   : > { %3425 = vmatprep.subr.bf16.mxu1 %v3424_v21  ;;  %v2930_v21 = vpack.c.bf16 %v742_v12, %v738_v11  ;;  %v3442_v23 = vpack.c.bf16 %v744_v15, %v740_v13  ;;  %v2932_v24 = vpack.c.bf16 %v751_v17, %v747_v16  ;;  %v3456_v11 = vpack.c.bf16 %v777_v1, %v773_v0  ;;  %v776_v12 = vld [vmem:[%s4174_s22 + $0x10b0] sm:$0xff]  ;;  %v779_v13 = vld [vmem:[%s4174_s22 + $0x10c8] sm:$0xff]  ;;  %v781_v15 = vld [vmem:[%s4174_s22 + $0x10d8] sm:$0xff] }
 0x15f   : > { %v785_v16 = vld [vmem:[%s4174_s22 + $0x10f8] sm:$0xff]  ;;  %v802_v0 = vld [vmem:[%s4174_s22 + $0x1180] sm:$0xff] }
 0x160   : > { %2915 = vmatpush1.bf16.msra.mxu0 %v2914_v28  ;;  %v3444_v28 = vpack.c.bf16 %v753_v20, %v749_v18  ;;  %v3460_v25 = vpack.c.bf16 %v785_v16, %v781_v15  ;;  %v806_v1 = vld [vmem:[%s4174_s22 + $0x11a0] sm:$0xff] }
 0x161   : > { %3427 = vmatpush1.bf16.msra.mxu1 %v3426_v29  ;;  %2917 = vmatprep.subr.bf16.mxu0 %v2916_v30  ;;  %v752_v29 = vld [vmem:[%s4174_s22 + $0xff0] sm:$0xff]  ;;  %v755_v30 = vld [vmem:[%s4174_s22 + $0x1008] sm:$0xff]  ;;  %v810_v15 = vld [vmem:[%s4174_s22 + $0x11c0] sm:$0xff] }
 0x162   : > { %3429 = vmatprep.subr.bf16.mxu1 %v3428_v35  ;;  %v1295_v35 = vsub.s32 6, %v4265_v59  ;;  %v3446_v37 = vpack.c.bf16 %v752_v29, %v748_v27  ;;  %v2936_v38 = vpack.c.bf16 %v759_v31, %v755_v30  ;;  %v787_v27 = vld [vmem:[%s4174_s22 + $0x1108] sm:$0xff]  ;;  %v789_v29 = vld [vmem:[%s4174_s22 + $0x1118] sm:$0xff]  ;;  %v814_v16 = vld [vmem:[%s4174_s22 + $0x11e0] sm:$0xff] }
 0x163   : > { %v793_v30 = vld [vmem:[%s4174_s22 + $0x1138] sm:$0xff] }
 0x164   : > { %2919 = vmatpush1.bf16.msra.mxu0 %v2918_v41  ;;  %v756_v41 = vld [vmem:[%s4174_s22 + $0x1010] sm:$0xff]  ;;  %v1296_v48 = vrot.slane %v4605_v7, %v1295_v35  ;;  %v3464_v39 = vpack.c.bf16 %v793_v30, %v789_v29  ;;  %v818_v29 = vld [vmem:[%s4174_s22 + $0x1200] sm:$0xff] }
 0x165   : > { %3431 = vmatpush1.bf16.msra.mxu1 %v3430_v42  ;;  %2921 = vmatprep.subr.bf16.mxu0 %v2920_v43  ;;  %v3448_v42 = vpack.c.bf16 %v761_v34, %v757_v32  ;;  %v760_v43 = vld [vmem:[%s4174_s22 + $0x1030] sm:$0xff]  ;;  %v822_v30 = vld [vmem:[%s4174_s22 + $0x1220] sm:$0xff] }
 0x166   : > { %3433 = vmatprep.subr.bf16.mxu1 %v3432_v49  ;;  %v765_v49 = vld [vmem:[%s4174_s22 + $0x1058] sm:$0xff]  ;;  %v3450_v53 = vpack.c.bf16 %v760_v43, %v756_v41  ;;  %v795_v41 = vld [vmem:[%s4174_s22 + $0x1148] sm:$0xff] }
 0x167   : > { %v3452_v7 = vpack.c.bf16 %v769_v50, %v765_v49  ;;  %v797_v43 = vld [vmem:[%s4174_s22 + $0x1158] sm:$0xff]  ;;  %v794_v50 = vld [vmem:[%s4174_s22 + $0x1140] sm:$0xff] }
 0x168   : > { %2923 = vmatpush1.bf16.msra.mxu0 %v2922_v55  ;;  %v762_v55 = vld [vmem:[%s4174_s22 + $0x1040] sm:$0xff] }
 0x169   : > { %3435 = vmatpush1.bf16.msra.mxu1 %v3434_v56  ;;  %2925 = vmatprep.subr.bf16.mxu0 %v2924_v57  ;;  %v766_v56 = vld [vmem:[%s4174_s22 + $0x1060] sm:$0xff]  ;;  %v764_v57 = vld [vmem:[%s4174_s22 + $0x1050] sm:$0xff] }
 0x16a   : > { %3437 = vmatprep.subr.bf16.mxu1 %v3436_v63  ;;  %v1308_v63 = vrot.slane %v4747_v51, %v4276_v8  ;;  %v2942_v2 = vpack.c.bf16 %v766_v56, %v762_v55  ;;  %v3454_v3 = vpack.c.bf16 %v768_v58, %v764_v57  ;;  %v800_v55 = vld [vmem:[%s4174_s22 + $0x1170] sm:$0xff]  ;;  %v803_v56 = vld [vmem:[%s4174_s22 + $0x1188] sm:$0xff]  ;;  %v809_v58 = vld [vmem:[%s4174_s22 + $0x11b8] sm:$0xff] }
 0x16b   : > { %v807_v57 = vld [vmem:[%s4174_s22 + $0x11a8] sm:$0xff] }
 0x16c   : > { %2927 = vmatpush1.bf16.msra.mxu0 %v2926_v19  ;;  %v770_v19 = vld [vmem:[%s4174_s22 + $0x1080] sm:$0xff] }
 0x16d   : > { %3439 = vmatpush1.bf16.msra.mxu1 %v3438_v5  ;;  %2929 = vmatprep.subr.bf16.mxu0 %v2928_v9  ;;  %v774_v5 = vld [vmem:[%s4174_s22 + $0x10a0] sm:$0xff]  ;;  %v772_v9 = vld [vmem:[%s4174_s22 + $0x1090] sm:$0xff] }
 0x16e   : > { %3441 = vmatprep.subr.bf16.mxu1 %v3440_v14  ;;  %v783_v14 = vld [vmem:[%s4174_s22 + $0x10e8] sm:$0xff]  ;;  %v2946_v17 = vpack.c.bf16 %v774_v5, %v770_v19  ;;  %v3458_v18 = vpack.c.bf16 %v776_v12, %v772_v9  ;;  %v813_v9 = vld [vmem:[%s4174_s22 + $0x11d8] sm:$0xff]  ;;  %v2962_v12 = vpack.c.bf16 %v806_v1, %v802_v0 }
 0x16f   : > { %v2948_v20 = vpack.c.bf16 %v783_v14, %v779_v13  ;;  %v811_v19 = vld [vmem:[%s4174_s22 + $0x11c8] sm:$0xff] }
 0x170   : > { %2931 = vmatpush1.bf16.msra.mxu0 %v2930_v21  ;;  %v778_v21 = vld [vmem:[%s4174_s22 + $0x10c0] sm:$0xff]  ;;  %v815_v5 = vld [vmem:[%s4174_s22 + $0x11e8] sm:$0xff] }
 0x171   : > { %3443 = vmatpush1.bf16.msra.mxu1 %v3442_v23  ;;  %2933 = vmatprep.subr.bf16.mxu0 %v2932_v24  ;;  %v782_v23 = vld [vmem:[%s4174_s22 + $0x10e0] sm:$0xff]  ;;  %v780_v24 = vld [vmem:[%s4174_s22 + $0x10d0] sm:$0xff]  ;;  %v2964_v14 = vpack.c.bf16 %v815_v5, %v811_v19  ;;  %v843_v0 = vld [vmem:[%s4174_s22 + $0x12c8] sm:$0xff] }
 0x172   : > { %3445 = vmatprep.subr.bf16.mxu1 %v3444_v28  ;;  %v791_v28 = vld [vmem:[%s4174_s22 + $0x1128] sm:$0xff]  ;;  %v2950_v31 = vpack.c.bf16 %v782_v23, %v778_v21  ;;  %v3462_v32 = vpack.c.bf16 %v784_v26, %v780_v24  ;;  %v821_v24 = vld [vmem:[%s4174_s22 + $0x1218] sm:$0xff]  ;;  %v2966_v26 = vpack.c.bf16 %v814_v16, %v810_v15 }
 0x173   : > { %v2952_v34 = vpack.c.bf16 %v791_v28, %v787_v27  ;;  %v819_v21 = vld [vmem:[%s4174_s22 + $0x1208] sm:$0xff] }
 0x174   : > { %2935 = vmatpush1.bf16.msra.mxu0 %v2934_v36  ;;  %v786_v36 = vld [vmem:[%s4174_s22 + $0x1100] sm:$0xff]  ;;  %v823_v23 = vld [vmem:[%s4174_s22 + $0x1228] sm:$0xff] }
 0x175   : > { %3447 = vmatpush1.bf16.msra.mxu1 %v3446_v37  ;;  %2937 = vmatprep.subr.bf16.mxu0 %v2936_v38  ;;  %v790_v37 = vld [vmem:[%s4174_s22 + $0x1120] sm:$0xff]  ;;  %v788_v38 = vld [vmem:[%s4174_s22 + $0x1110] sm:$0xff]  ;;  %v2968_v28 = vpack.c.bf16 %v823_v23, %v819_v21  ;;  %v847_v1 = vld [vmem:[%s4174_s22 + $0x12e8] sm:$0xff] }
 0x176   : > { %3449 = vmatprep.subr.bf16.mxu1 %v3448_v42  ;;  %v799_v42 = vld [vmem:[%s4174_s22 + $0x1168] sm:$0xff]  ;;  %v2954_v47 = vpack.c.bf16 %v790_v37, %v786_v36  ;;  %v2980_v5 = vpack.c.bf16 %v847_v1, %v843_v0 }
 0x177   : > { %1648 = vmatmul.mubr.f32.vlgmr.msra.gmra.mrb[0].mxu0 %v1296_v48  ;;  %v2956_v49 = vpack.c.bf16 %v799_v42, %v795_v41  ;;  %v827_v36 = vld [vmem:[%s4174_s22 + $0x1248] sm:$0xff] }
 0x178   : > { %2939 = vmatpush1.bf16.msra.mxu0 %v2938_v52  ;;  %2216 = vmatmul.mubr.f32.vlgmr.msra.gmra.mrb[0].mxu1 %v1296_v48  ;;  %v3466_v48 = vpack.c.bf16 %v792_v40, %v788_v38  ;;  %v798_v52 = vld [vmem:[%s4174_s22 + $0x1160] sm:$0xff]  ;;  %v831_v37 = vld [vmem:[%s4174_s22 + $0x1268] sm:$0xff]  ;;  %v829_v38 = vld [vmem:[%s4174_s22 + $0x1258] sm:$0xff]  ;;  %v2970_v40 = vpack.c.bf16 %v822_v30, %v818_v29 }
 0x179   : > { %3451 = vmatpush1.bf16.msra.mxu1 %v3450_v53  ;;  %2941 = vmatprep.subr.bf16.mxu0 %v2940_v54  ;;  %v796_v53 = vld [vmem:[%s4174_s22 + $0x1150] sm:$0xff]  ;;  %v3468_v54 = vpack.c.bf16 %v801_v45, %v797_v43  ;;  %v2958_v61 = vpack.c.bf16 %v798_v52, %v794_v50  ;;  %v2972_v42 = vpack.c.bf16 %v831_v37, %v827_v36  ;;  %v826_v43 = vld [vmem:[%s4174_s22 + $0x1240] sm:$0xff]  ;;  %v835_v50 = vld [vmem:[%s4174_s22 + $0x1288] sm:$0xff] }
 0x17a   : > { %3453 = vmatprep.subr.bf16.mxu1 %v3452_v7  ;;  %1718 = vmatprep.mubr.f32.mxu0 %v1308_v63  ;;  %v805_v7 = vld [vmem:[%s4174_s22 + $0x1198] sm:$0xff]  ;;  %v3470_v62 = vpack.c.bf16 %v800_v55, %v796_v53  ;;  %v830_v45 = vld [vmem:[%s4174_s22 + $0x1260] sm:$0xff]  ;;  %v839_v52 = vld [vmem:[%s4174_s22 + $0x12a8] sm:$0xff] }
 0x17b   : > { %2286 = vmatprep.mubr.f32.mxu1 %v1308_v63  ;;  %v2960_v63 = vpack.c.bf16 %v807_v57, %v803_v56  ;;  %v837_v53 = vld [vmem:[%s4174_s22 + $0x1298] sm:$0xff]  ;;  %v2974_v55 = vpack.c.bf16 %v830_v45, %v826_v43  ;;  %v2976_v57 = vpack.c.bf16 %v839_v52, %v835_v50  ;;  %v851_v15 = vld [vmem:[%s4174_s22 + $0x1308] sm:$0xff] }
 0x17c   : > { %2943 = vmatpush1.bf16.msra.mxu0 %v2942_v2  ;;  %v804_v2 = vld [vmem:[%s4174_s22 + $0x1190] sm:$0xff]  ;;  %v855_v16 = vld [vmem:[%s4174_s22 + $0x1328] sm:$0xff] }
 0x17d   : > { %3455 = vmatpush1.bf16.msra.mxu1 %v3454_v3  ;;  %2945 = vmatprep.subr.bf16.mxu0 %v2944_v4  ;;  %v3472_v3 = vpack.c.bf16 %v809_v58, %v805_v7  ;;  %v808_v4 = vld [vmem:[%s4174_s22 + $0x11b0] sm:$0xff]  ;;  %v834_v7 = vld [vmem:[%s4174_s22 + $0x1280] sm:$0xff]  ;;  %v2984_v23 = vpack.c.bf16 %v855_v16, %v851_v15  ;;  %v859_v29 = vld [vmem:[%s4174_s22 + $0x1348] sm:$0xff] }
 0x17e   : > { %3457 = vmatprep.subr.bf16.mxu1 %v3456_v11  ;;  %v817_v11 = vld [vmem:[%s4174_s22 + $0x11f8] sm:$0xff]  ;;  %v3474_v13 = vpack.c.bf16 %v808_v4, %v804_v2  ;;  %v838_v58 = vld [vmem:[%s4174_s22 + $0x12a0] sm:$0xff]  ;;  %v863_v30 = vld [vmem:[%s4174_s22 + $0x1368] sm:$0xff] }
 0x17f   : > { %v845_v2 = vld [vmem:[%s4174_s22 + $0x12d8] sm:$0xff]  ;;  %v2978_v4 = vpack.c.bf16 %v838_v58, %v834_v7  ;;  %v2988_v37 = vpack.c.bf16 %v863_v30, %v859_v29  ;;  %v867_v43 = vld [vmem:[%s4174_s22 + $0x1388] sm:$0xff] }
 0x180   : > { %2947 = vmatpush1.bf16.msra.mxu0 %v2946_v17  ;;  %v812_v17 = vld [vmem:[%s4174_s22 + $0x11d0] sm:$0xff]  ;;  %v871_v45 = vld [vmem:[%s4174_s22 + $0x13a8] sm:$0xff] }
 0x181   : > { %3459 = vmatpush1.bf16.msra.mxu1 %v3458_v18  ;;  %2949 = vmatprep.subr.bf16.mxu0 %v2948_v20  ;;  %v3476_v18 = vpack.c.bf16 %v817_v11, %v813_v9  ;;  %v816_v20 = vld [vmem:[%s4174_s22 + $0x11f0] sm:$0xff]  ;;  %v842_v9 = vld [vmem:[%s4174_s22 + $0x12c0] sm:$0xff]  ;;  %v2992_v52 = vpack.c.bf16 %v871_v45, %v867_v43  ;;  %v875_v7 = vld [vmem:[%s4174_s22 + $0x13c8] sm:$0xff] }
 0x182   : > { %3461 = vmatprep.subr.bf16.mxu1 %v3460_v25  ;;  %v825_v25 = vld [vmem:[%s4174_s22 + $0x1238] sm:$0xff]  ;;  %v3478_v27 = vpack.c.bf16 %v816_v20, %v812_v17  ;;  %v846_v11 = vld [vmem:[%s4174_s22 + $0x12e0] sm:$0xff]  ;;  %v879_v58 = vld [vmem:[%s4174_s22 + $0x13e8] sm:$0xff] }
 0x183   : > { %v853_v17 = vld [vmem:[%s4174_s22 + $0x1318] sm:$0xff]  ;;  %v2982_v20 = vpack.c.bf16 %v846_v11, %v842_v9  ;;  %v2996_v1 = vpack.c.bf16 %v879_v58, %v875_v7  ;;  %v883_v9 = vld [vmem:[%s4174_s22 + $0x1408] sm:$0xff] }
 0x184   : > { %2951 = vmatpush1.bf16.msra.mxu0 %v2950_v31  ;;  %v820_v31 = vld [vmem:[%s4174_s22 + $0x1210] sm:$0xff]  ;;  %v887_v11 = vld [vmem:[%s4174_s22 + $0x1428] sm:$0xff]  ;;  %v905_v43 = vld [vmem:[%s4174_s22 + $0x14b8] sm:$0xff] }
 0x185   : > { %3463 = vmatpush1.bf16.msra.mxu1 %v3462_v32  ;;  %2953 = vmatprep.subr.bf16.mxu0 %v2952_v34  ;;  %v3480_v32 = vpack.c.bf16 %v825_v25, %v821_v24  ;;  %v824_v34 = vld [vmem:[%s4174_s22 + $0x1230] sm:$0xff]  ;;  %v850_v24 = vld [vmem:[%s4174_s22 + $0x1300] sm:$0xff]  ;;  %v3000_v16 = vpack.c.bf16 %v887_v11, %v883_v9 }
 0x186   : > { %3465 = vmatprep.subr.bf16.mxu1 %v3464_v39  ;;  %v833_v39 = vld [vmem:[%s4174_s22 + $0x1278] sm:$0xff]  ;;  %v3482_v41 = vpack.c.bf16 %v824_v34, %v820_v31  ;;  %v854_v25 = vld [vmem:[%s4174_s22 + $0x1320] sm:$0xff] }
 0x187   : > { %v861_v31 = vld [vmem:[%s4174_s22 + $0x1358] sm:$0xff]  ;;  %v2986_v34 = vpack.c.bf16 %v854_v25, %v850_v24  ;;  %v891_v24 = vld [vmem:[%s4174_s22 + $0x1448] sm:$0xff] }
 0x188   : > { %2955 = vmatpush1.bf16.msra.mxu0 %v2954_v47  ;;  %v828_v47 = vld [vmem:[%s4174_s22 + $0x1250] sm:$0xff]  ;;  %v895_v25 = vld [vmem:[%s4174_s22 + $0x1468] sm:$0xff] }
 0x189   : > { %3467 = vmatpush1.bf16.msra.mxu1 %v3466_v48  ;;  %2957 = vmatprep.subr.bf16.mxu0 %v2956_v49  ;;  %v3484_v48 = vpack.c.bf16 %v833_v39, %v829_v38  ;;  %v832_v49 = vld [vmem:[%s4174_s22 + $0x1270] sm:$0xff]  ;;  %v858_v38 = vld [vmem:[%s4174_s22 + $0x1340] sm:$0xff] }
 0x18a   : > { %3469 = vmatprep.subr.bf16.mxu1 %v3468_v54  ;;  %v841_v54 = vld [vmem:[%s4174_s22 + $0x12b8] sm:$0xff]  ;;  %v3486_v56 = vpack.c.bf16 %v832_v49, %v828_v47  ;;  %v862_v39 = vld [vmem:[%s4174_s22 + $0x1360] sm:$0xff] }
 0x18b   : > { %v869_v47 = vld [vmem:[%s4174_s22 + $0x1398] sm:$0xff]  ;;  %v2990_v49 = vpack.c.bf16 %v862_v39, %v858_v38  ;;  %v896_v38 = vld [vmem:[%s4174_s22 + $0x1470] sm:$0xff]  ;;  %v899_v39 = vld [vmem:[%s4174_s22 + $0x1488] sm:$0xff] }
 0x18c   : > { %2959 = vmatpush1.bf16.msra.mxu0 %v2958_v61  ;;  %v836_v61 = vld [vmem:[%s4174_s22 + $0x1290] sm:$0xff] }
 0x18d   : > { %3471 = vmatpush1.bf16.msra.mxu1 %v3470_v62  ;;  %2961 = vmatprep.subr.bf16.mxu0 %v2960_v63  ;;  %v3488_v62 = vpack.c.bf16 %v841_v54, %v837_v53  ;;  %v840_v63 = vld [vmem:[%s4174_s22 + $0x12b0] sm:$0xff]  ;;  %v866_v53 = vld [vmem:[%s4174_s22 + $0x1380] sm:$0xff] }
 0x18e   : > { %3473 = vmatprep.subr.bf16.mxu1 %v3472_v3  ;;  %v849_v3 = vld [vmem:[%s4174_s22 + $0x12f8] sm:$0xff]  ;;  %v3490_v19 = vpack.c.bf16 %v840_v63, %v836_v61  ;;  %v870_v54 = vld [vmem:[%s4174_s22 + $0x13a0] sm:$0xff] }
 0x18f   : > { %v877_v61 = vld [vmem:[%s4174_s22 + $0x13d8] sm:$0xff]  ;;  %v2994_v63 = vpack.c.bf16 %v870_v54, %v866_v53  ;;  %v904_v53 = vld [vmem:[%s4174_s22 + $0x14b0] sm:$0xff]  ;;  %v907_v54 = vld [vmem:[%s4174_s22 + $0x14c8] sm:$0xff] }
 0x190   : > { %2963 = vmatpush1.bf16.msra.mxu0 %v2962_v12  ;;  %v844_v12 = vld [vmem:[%s4174_s22 + $0x12d0] sm:$0xff] }
 0x191   : > { %3475 = vmatpush1.bf16.msra.mxu1 %v3474_v13  ;;  %2965 = vmatprep.subr.bf16.mxu0 %v2964_v14  ;;  %v3492_v13 = vpack.c.bf16 %v849_v3, %v845_v2  ;;  %v848_v14 = vld [vmem:[%s4174_s22 + $0x12f0] sm:$0xff]  ;;  %v874_v2 = vld [vmem:[%s4174_s22 + $0x13c0] sm:$0xff] }
 0x192   : > { %3477 = vmatprep.subr.bf16.mxu1 %v3476_v18  ;;  %v857_v18 = vld [vmem:[%s4174_s22 + $0x1338] sm:$0xff]  ;;  %v3494_v21 = vpack.c.bf16 %v848_v14, %v844_v12  ;;  %v878_v3 = vld [vmem:[%s4174_s22 + $0x13e0] sm:$0xff] }
 0x193   : > { %v885_v12 = vld [vmem:[%s4174_s22 + $0x1418] sm:$0xff]  ;;  %v2998_v14 = vpack.c.bf16 %v878_v3, %v874_v2  ;;  %v912_v2 = vld [vmem:[%s4174_s22 + $0x14f0] sm:$0xff]  ;;  %v915_v3 = vld [vmem:[%s4174_s22 + $0x1508] sm:$0xff] }
 0x194   : > { %2967 = vmatpush1.bf16.msra.mxu0 %v2966_v26  ;;  %v852_v26 = vld [vmem:[%s4174_s22 + $0x1310] sm:$0xff] }
 0x195   : > { %3479 = vmatpush1.bf16.msra.mxu1 %v3478_v27  ;;  %2969 = vmatprep.subr.bf16.mxu0 %v2968_v28  ;;  %v3496_v27 = vpack.c.bf16 %v857_v18, %v853_v17  ;;  %v856_v28 = vld [vmem:[%s4174_s22 + $0x1330] sm:$0xff]  ;;  %v882_v17 = vld [vmem:[%s4174_s22 + $0x1400] sm:$0xff] }
 0x196   : > { %3481 = vmatprep.subr.bf16.mxu1 %v3480_v32  ;;  %v865_v32 = vld [vmem:[%s4174_s22 + $0x1378] sm:$0xff]  ;;  %v3498_v36 = vpack.c.bf16 %v856_v28, %v852_v26  ;;  %v886_v18 = vld [vmem:[%s4174_s22 + $0x1420] sm:$0xff]  ;;  %v1304_v26 = vrot.slane %v4747_v51, %v4323_v10 }
 0x197   : > { %v897_v28 = vld [vmem:[%s4174_s22 + $0x1478] sm:$0xff]  ;;  %v3002_v29 = vpack.c.bf16 %v886_v18, %v882_v17  ;;  %v920_v17 = vld [vmem:[%s4174_s22 + $0x1530] sm:$0xff]  ;;  %v923_v18 = vld [vmem:[%s4174_s22 + $0x1548] sm:$0xff] }
 0x198   : > { %2971 = vmatpush1.bf16.msra.mxu0 %v2970_v40  ;;  %v860_v40 = vld [vmem:[%s4174_s22 + $0x1350] sm:$0xff] }
 0x199   : > { %3483 = vmatpush1.bf16.msra.mxu1 %v3482_v41  ;;  %2973 = vmatprep.subr.bf16.mxu0 %v2972_v42  ;;  %v3500_v41 = vpack.c.bf16 %v865_v32, %v861_v31  ;;  %v864_v42 = vld [vmem:[%s4174_s22 + $0x1370] sm:$0xff]  ;;  %v3004_v31 = vpack.c.bf16 %v895_v25, %v891_v24  ;;  %v890_v32 = vld [vmem:[%s4174_s22 + $0x1440] sm:$0xff] }
 0x19a   : > { %3485 = vmatprep.subr.bf16.mxu1 %v3484_v48  ;;  %v873_v48 = vld [vmem:[%s4174_s22 + $0x13b8] sm:$0xff]  ;;  %v3502_v50 = vpack.c.bf16 %v864_v42, %v860_v40  ;;  %v903_v40 = vld [vmem:[%s4174_s22 + $0x14a8] sm:$0xff] }
 0x19b   : > { %v901_v42 = vld [vmem:[%s4174_s22 + $0x1498] sm:$0xff] }
 0x19c   : > { %2975 = vmatpush1.bf16.msra.mxu0 %v2974_v55  ;;  %v868_v55 = vld [vmem:[%s4174_s22 + $0x1390] sm:$0xff] }
 0x19d   : > { %3487 = vmatpush1.bf16.msra.mxu1 %v3486_v56  ;;  %2977 = vmatprep.subr.bf16.mxu0 %v2976_v57  ;;  %v3504_v56 = vpack.c.bf16 %v873_v48, %v869_v47  ;;  %v872_v57 = vld [vmem:[%s4174_s22 + $0x13b0] sm:$0xff]  ;;  %v3008_v48 = vpack.c.bf16 %v903_v40, %v899_v39 }
 0x19e   : > { %3489 = vmatprep.subr.bf16.mxu1 %v3488_v62  ;;  %v881_v62 = vld [vmem:[%s4174_s22 + $0x13f8] sm:$0xff]  ;;  %v3506_v0 = vpack.c.bf16 %v872_v57, %v868_v55  ;;  %v911_v55 = vld [vmem:[%s4174_s22 + $0x14e8] sm:$0xff] }
 0x19f   : > { %v913_v57 = vld [vmem:[%s4174_s22 + $0x14f8] sm:$0xff] }
 0x1a0   : > { %2979 = vmatpush1.bf16.msra.mxu0 %v2978_v4  ;;  %v876_v4 = vld [vmem:[%s4174_s22 + $0x13d0] sm:$0xff] }
 0x1a1   : > { %3491 = vmatpush1.bf16.msra.mxu1 %v3490_v19  ;;  %2981 = vmatprep.subr.bf16.mxu0 %v2980_v5  ;;  %v3508_v19 = vpack.c.bf16 %v881_v62, %v877_v61  ;;  %v880_v5 = vld [vmem:[%s4174_s22 + $0x13f0] sm:$0xff]  ;;  %v3012_v61 = vpack.c.bf16 %v911_v55, %v907_v54  ;;  %v906_v62 = vld [vmem:[%s4174_s22 + $0x14c0] sm:$0xff] }
 0x1a2   : > { %3493 = vmatprep.subr.bf16.mxu1 %v3492_v13  ;;  %v889_v13 = vld [vmem:[%s4174_s22 + $0x1438] sm:$0xff]  ;;  %v3510_v15 = vpack.c.bf16 %v880_v5, %v876_v4  ;;  %v919_v4 = vld [vmem:[%s4174_s22 + $0x1528] sm:$0xff]  ;;  %v938_v55 = vld [vmem:[%s4174_s22 + $0x15c0] sm:$0xff] }
 0x1a3   : > { %v921_v5 = vld [vmem:[%s4174_s22 + $0x1538] sm:$0xff] }
 0x1a4   : > { %2983 = vmatpush1.bf16.msra.mxu0 %v2982_v20  ;;  %v884_v20 = vld [vmem:[%s4174_s22 + $0x1410] sm:$0xff] }
 0x1a5   : > { %3495 = vmatpush1.bf16.msra.mxu1 %v3494_v21  ;;  %2985 = vmatprep.subr.bf16.mxu0 %v2984_v23  ;;  %v3512_v21 = vpack.c.bf16 %v889_v13, %v885_v12  ;;  %v888_v23 = vld [vmem:[%s4174_s22 + $0x1430] sm:$0xff]  ;;  %v3016_v12 = vpack.c.bf16 %v919_v4, %v915_v3  ;;  %v914_v13 = vld [vmem:[%s4174_s22 + $0x1500] sm:$0xff] }
 0x1a6   : > { %3497 = vmatprep.subr.bf16.mxu1 %v3496_v27  ;;  %v893_v27 = vld [vmem:[%s4174_s22 + $0x1458] sm:$0xff]  ;;  %v3514_v30 = vpack.c.bf16 %v888_v23, %v884_v20  ;;  %v927_v20 = vld [vmem:[%s4174_s22 + $0x1568] sm:$0xff]  ;;  %v946_v4 = vld [vmem:[%s4174_s22 + $0x1600] sm:$0xff] }
 0x1a7   : > { %v929_v23 = vld [vmem:[%s4174_s22 + $0x1578] sm:$0xff] }
 0x1a8   : > { %2987 = vmatpush1.bf16.msra.mxu0 %v2986_v34  ;;  %v894_v34 = vld [vmem:[%s4174_s22 + $0x1460] sm:$0xff] }
 0x1a9   : > { %3499 = vmatpush1.bf16.msra.mxu1 %v3498_v36  ;;  %2989 = vmatprep.subr.bf16.mxu0 %v2988_v37  ;;  %v892_v36 = vld [vmem:[%s4174_s22 + $0x1450] sm:$0xff]  ;;  %v3516_v37 = vpack.c.bf16 %v897_v28, %v893_v27  ;;  %v3006_v45 = vpack.c.bf16 %v894_v34, %v890_v32  ;;  %v922_v27 = vld [vmem:[%s4174_s22 + $0x1540] sm:$0xff]  ;;  %v931_v32 = vld [vmem:[%s4174_s22 + $0x1588] sm:$0xff] }
 0x1aa   : > { %3501 = vmatprep.subr.bf16.mxu1 %v3500_v41  ;;  %v1316_v41 = vrot.slane %v4747_v51, %v4332_v22  ;;  %v3518_v47 = vpack.c.bf16 %v896_v38, %v892_v36  ;;  %v3520_v51 = vpack.c.bf16 %v905_v43, %v901_v42  ;;  %v926_v28 = vld [vmem:[%s4174_s22 + $0x1560] sm:$0xff]  ;;  %v935_v34 = vld [vmem:[%s4174_s22 + $0x15a8] sm:$0xff]  ;;  %v933_v36 = vld [vmem:[%s4174_s22 + $0x1598] sm:$0xff] }
 0x1ab   : > { %v3022_v38 = vpack.c.bf16 %v926_v28, %v922_v27  ;;  %v3024_v40 = vpack.c.bf16 %v935_v34, %v931_v32  ;;  %v934_v42 = vld [vmem:[%s4174_s22 + $0x15a0] sm:$0xff]  ;;  %v932_v43 = vld [vmem:[%s4174_s22 + $0x1590] sm:$0xff]  ;;  %v967_v27 = vld [vmem:[%s4174_s22 + $0x16a8] sm:$0xff] }
 0x1ac   : > { %2991 = vmatpush1.bf16.msra.mxu0 %v2990_v49  ;;  %v898_v49 = vld [vmem:[%s4174_s22 + $0x1480] sm:$0xff]  ;;  %v965_v28 = vld [vmem:[%s4174_s22 + $0x1698] sm:$0xff] }
 0x1ad   : > { %3503 = vmatpush1.bf16.msra.mxu1 %v3502_v50  ;;  %2993 = vmatprep.subr.bf16.mxu0 %v2992_v52  ;;  %v902_v50 = vld [vmem:[%s4174_s22 + $0x14a0] sm:$0xff]  ;;  %v900_v52 = vld [vmem:[%s4174_s22 + $0x1490] sm:$0xff] }
 0x1ae   : > { %3505 = vmatprep.subr.bf16.mxu1 %v3504_v56  ;;  %v909_v56 = vld [vmem:[%s4174_s22 + $0x14d8] sm:$0xff]  ;;  %v3010_v7 = vpack.c.bf16 %v902_v50, %v898_v49  ;;  %v3522_v58 = vpack.c.bf16 %v904_v53, %v900_v52  ;;  %v943_v49 = vld [vmem:[%s4174_s22 + $0x15e8] sm:$0xff]  ;;  %v962_v34 = vld [vmem:[%s4174_s22 + $0x1680] sm:$0xff] }
 0x1af   : > { %v941_v50 = vld [vmem:[%s4174_s22 + $0x15d8] sm:$0xff] }
 0x1b0   : > { %2995 = vmatpush1.bf16.msra.mxu0 %v2994_v63  ;;  %v910_v63 = vld [vmem:[%s4174_s22 + $0x14e0] sm:$0xff]  ;;  %v945_v52 = vld [vmem:[%s4174_s22 + $0x15f8] sm:$0xff] }
 0x1b1   : > { %3507 = vmatpush1.bf16.msra.mxu1 %v3506_v0  ;;  %2997 = vmatprep.subr.bf16.mxu0 %v2996_v1  ;;  %v908_v0 = vld [vmem:[%s4174_s22 + $0x14d0] sm:$0xff]  ;;  %v3524_v1 = vpack.c.bf16 %v913_v57, %v909_v56  ;;  %v3014_v9 = vpack.c.bf16 %v910_v63, %v906_v62  ;;  %v942_v56 = vld [vmem:[%s4174_s22 + $0x15e0] sm:$0xff]  ;;  %v951_v62 = vld [vmem:[%s4174_s22 + $0x1628] sm:$0xff] }
 0x1b2   : > { %3509 = vmatprep.subr.bf16.mxu1 %v3508_v19  ;;  %v917_v19 = vld [vmem:[%s4174_s22 + $0x1518] sm:$0xff]  ;;  %v3526_v11 = vpack.c.bf16 %v912_v2, %v908_v0  ;;  %v940_v57 = vld [vmem:[%s4174_s22 + $0x15d0] sm:$0xff] }
 0x1b3   : > { %v949_v63 = vld [vmem:[%s4174_s22 + $0x1618] sm:$0xff] }
 0x1b4   : > { %2999 = vmatpush1.bf16.msra.mxu0 %v2998_v14  ;;  %v918_v14 = vld [vmem:[%s4174_s22 + $0x1520] sm:$0xff]  ;;  %v953_v0 = vld [vmem:[%s4174_s22 + $0x1638] sm:$0xff] }
 0x1b5   : > { %3511 = vmatpush1.bf16.msra.mxu1 %v3510_v15  ;;  %3001 = vmatprep.subr.bf16.mxu0 %v3000_v16  ;;  %v916_v15 = vld [vmem:[%s4174_s22 + $0x1510] sm:$0xff]  ;;  %v3528_v16 = vpack.c.bf16 %v921_v5, %v917_v19  ;;  %v3018_v24 = vpack.c.bf16 %v918_v14, %v914_v13  ;;  %v950_v19 = vld [vmem:[%s4174_s22 + $0x1620] sm:$0xff]  ;;  %v959_v13 = vld [vmem:[%s4174_s22 + $0x1668] sm:$0xff] }
 0x1b6   : > { %3513 = vmatprep.subr.bf16.mxu1 %v3512_v21  ;;  %v925_v21 = vld [vmem:[%s4174_s22 + $0x1558] sm:$0xff]  ;;  %v3530_v25 = vpack.c.bf16 %v920_v17, %v916_v15  ;;  %v948_v5 = vld [vmem:[%s4174_s22 + $0x1610] sm:$0xff] }
 0x1b7   : > { %1719 = vmatmul.mubr.f32.vlgmr.msra.gmra.mrb[0].mxu0 %v1304_v26  ;;  %v957_v14 = vld [vmem:[%s4174_s22 + $0x1658] sm:$0xff] }
 0x1b8   : > { %3003 = vmatpush1.bf16.msra.mxu0 %v3002_v29  ;;  %2287 = vmatmul.mubr.f32.vlgmr.msra.gmra.mrb[0].mxu1 %v1304_v26  ;;  %v3020_v26 = vpack.c.bf16 %v927_v20, %v923_v18  ;;  %v924_v29 = vld [vmem:[%s4174_s22 + $0x1550] sm:$0xff]  ;;  %v961_v15 = vld [vmem:[%s4174_s22 + $0x1678] sm:$0xff]  ;;  %v954_v20 = vld [vmem:[%s4174_s22 + $0x1640] sm:$0xff] }
 0x1b9   : > { %3515 = vmatpush1.bf16.msra.mxu1 %v3514_v30  ;;  %3005 = vmatprep.subr.bf16.mxu0 %v3004_v31  ;;  %v3532_v30 = vpack.c.bf16 %v929_v23, %v925_v21  ;;  %v928_v31 = vld [vmem:[%s4174_s22 + $0x1570] sm:$0xff]  ;;  %v958_v21 = vld [vmem:[%s4174_s22 + $0x1660] sm:$0xff] }
 0x1ba   : > { %3517 = vmatprep.subr.bf16.mxu1 %v3516_v37  ;;  %1789 = vmatprep.mubr.f32.mxu0 %v1316_v41  ;;  %v937_v37 = vld [vmem:[%s4174_s22 + $0x15b8] sm:$0xff]  ;;  %v3534_v39 = vpack.c.bf16 %v928_v31, %v924_v29  ;;  %v956_v23 = vld [vmem:[%s4174_s22 + $0x1650] sm:$0xff] }
 0x1bb   : > { %2357 = vmatprep.mubr.f32.mxu1 %v1316_v41  ;;  %v930_v41 = vld [vmem:[%s4174_s22 + $0x1580] sm:$0xff]  ;;  %v969_v29 = vld [vmem:[%s4174_s22 + $0x16b8] sm:$0xff] }
 0x1bc   : > { %3007 = vmatpush1.bf16.msra.mxu0 %v3006_v45  ;;  %v3536_v45 = vpack.c.bf16 %v937_v37, %v933_v36  ;;  %v966_v36 = vld [vmem:[%s4174_s22 + $0x16a0] sm:$0xff]  ;;  %v964_v37 = vld [vmem:[%s4174_s22 + $0x1690] sm:$0xff] }
 0x1bd   : > { %3519 = vmatpush1.bf16.msra.mxu1 %v3518_v47  ;;  %3009 = vmatprep.subr.bf16.mxu0 %v3008_v48  ;;  %v936_v47 = vld [vmem:[%s4174_s22 + $0x15b0] sm:$0xff]  ;;  %v939_v48 = vld [vmem:[%s4174_s22 + $0x15c8] sm:$0xff] }
 0x1be   : > { %3521 = vmatprep.subr.bf16.mxu1 %v3520_v51  ;;  %v3026_v51 = vpack.c.bf16 %v934_v42, %v930_v41  ;;  %v3538_v53 = vpack.c.bf16 %v936_v47, %v932_v43  ;;  %v3028_v54 = vpack.c.bf16 %v943_v49, %v939_v48  ;;  %v975_v41 = vld [vmem:[%s4174_s22 + $0x16e8] sm:$0xff]  ;;  %v973_v42 = vld [vmem:[%s4174_s22 + $0x16d8] sm:$0xff]  ;;  %v970_v49 = vld [vmem:[%s4174_s22 + $0x16c0] sm:$0xff] }
 0x1bf   : > { %v977_v43 = vld [vmem:[%s4174_s22 + $0x16f8] sm:$0xff] }
 0x1c0   : > { %3011 = vmatpush1.bf16.msra.mxu0 %v3010_v7  ;;  %v3540_v7 = vpack.c.bf16 %v945_v52, %v941_v50  ;;  %v974_v50 = vld [vmem:[%s4174_s22 + $0x16e0] sm:$0xff]  ;;  %v972_v52 = vld [vmem:[%s4174_s22 + $0x16d0] sm:$0xff] }
 0x1c1   : > { %3523 = vmatpush1.bf16.msra.mxu1 %v3522_v58  ;;  %3013 = vmatprep.subr.bf16.mxu0 %v3012_v61  ;;  %v944_v58 = vld [vmem:[%s4174_s22 + $0x15f0] sm:$0xff]  ;;  %v947_v61 = vld [vmem:[%s4174_s22 + $0x1608] sm:$0xff] }
 0x1c2   : > { %3525 = vmatprep.subr.bf16.mxu1 %v3524_v1  ;;  %v3030_v1 = vpack.c.bf16 %v942_v56, %v938_v55  ;;  %v3542_v2 = vpack.c.bf16 %v944_v58, %v940_v57  ;;  %v3032_v3 = vpack.c.bf16 %v951_v62, %v947_v61  ;;  %v983_v55 = vld [vmem:[%s4174_s22 + $0x1728] sm:$0xff]  ;;  %v981_v56 = vld [vmem:[%s4174_s22 + $0x1718] sm:$0xff]  ;;  %v978_v62 = vld [vmem:[%s4174_s22 + $0x1700] sm:$0xff] }
 0x1c3   : > { %v985_v57 = vld [vmem:[%s4174_s22 + $0x1738] sm:$0xff] }
 0x1c4   : > { %3015 = vmatpush1.bf16.msra.mxu0 %v3014_v9  ;;  %v3544_v9 = vpack.c.bf16 %v953_v0, %v949_v63  ;;  %v982_v63 = vld [vmem:[%s4174_s22 + $0x1720] sm:$0xff]  ;;  %v980_v0 = vld [vmem:[%s4174_s22 + $0x1710] sm:$0xff] }
 0x1c5   : > { %3527 = vmatpush1.bf16.msra.mxu1 %v3526_v11  ;;  %3017 = vmatprep.subr.bf16.mxu0 %v3016_v12  ;;  %v952_v11 = vld [vmem:[%s4174_s22 + $0x1630] sm:$0xff]  ;;  %v955_v12 = vld [vmem:[%s4174_s22 + $0x1648] sm:$0xff] }
 0x1c6   : > { %3529 = vmatprep.subr.bf16.mxu1 %v3528_v16  ;;  %v3034_v16 = vpack.c.bf16 %v950_v19, %v946_v4  ;;  %v3546_v17 = vpack.c.bf16 %v952_v11, %v948_v5  ;;  %v3036_v18 = vpack.c.bf16 %v959_v13, %v955_v12  ;;  %v991_v4 = vld [vmem:[%s4174_s22 + $0x1768] sm:$0xff]  ;;  %v989_v19 = vld [vmem:[%s4174_s22 + $0x1758] sm:$0xff]  ;;  %v986_v13 = vld [vmem:[%s4174_s22 + $0x1740] sm:$0xff] }
 0x1c7   : > { %v993_v5 = vld [vmem:[%s4174_s22 + $0x1778] sm:$0xff] }
 0x1c8   : > { %3019 = vmatpush1.bf16.msra.mxu0 %v3018_v24  ;;  %v3548_v24 = vpack.c.bf16 %v961_v15, %v957_v14  ;;  %v990_v14 = vld [vmem:[%s4174_s22 + $0x1760] sm:$0xff]  ;;  %v988_v15 = vld [vmem:[%s4174_s22 + $0x1750] sm:$0xff] }
 0x1c9   : > { %3531 = vmatpush1.bf16.msra.mxu1 %v3530_v25  ;;  %3021 = vmatprep.subr.bf16.mxu0 %v3020_v26  ;;  %v960_v25 = vld [vmem:[%s4174_s22 + $0x1670] sm:$0xff]  ;;  %v963_v26 = vld [vmem:[%s4174_s22 + $0x1688] sm:$0xff] }
 0x1ca   : > { %3533 = vmatprep.subr.bf16.mxu1 %v3532_v30  ;;  %v3038_v30 = vpack.c.bf16 %v958_v21, %v954_v20  ;;  %v3550_v31 = vpack.c.bf16 %v960_v25, %v956_v23  ;;  %v3040_v32 = vpack.c.bf16 %v967_v27, %v963_v26  ;;  %v999_v20 = vld [vmem:[%s4174_s22 + $0x17a8] sm:$0xff]  ;;  %v997_v21 = vld [vmem:[%s4174_s22 + $0x1798] sm:$0xff]  ;;  %v994_v27 = vld [vmem:[%s4174_s22 + $0x1780] sm:$0xff] }
 0x1cb   : > { %v1001_v23 = vld [vmem:[%s4174_s22 + $0x17b8] sm:$0xff] }
 0x1cc   : > { %3023 = vmatpush1.bf16.msra.mxu0 %v3022_v38  ;;  %v3552_v38 = vpack.c.bf16 %v969_v29, %v965_v28  ;;  %v998_v28 = vld [vmem:[%s4174_s22 + $0x17a0] sm:$0xff]  ;;  %v996_v29 = vld [vmem:[%s4174_s22 + $0x1790] sm:$0xff] }
 0x1cd   : > { %3535 = vmatpush1.bf16.msra.mxu1 %v3534_v39  ;;  %3025 = vmatprep.subr.bf16.mxu0 %v3024_v40  ;;  %v968_v39 = vld [vmem:[%s4174_s22 + $0x16b0] sm:$0xff]  ;;  %v971_v40 = vld [vmem:[%s4174_s22 + $0x16c8] sm:$0xff] }
 0x1ce   : > { %3537 = vmatprep.subr.bf16.mxu1 %v3536_v45  ;;  %v3042_v45 = vpack.c.bf16 %v966_v36, %v962_v34  ;;  %v3554_v47 = vpack.c.bf16 %v968_v39, %v964_v37  ;;  %v3044_v48 = vpack.c.bf16 %v975_v41, %v971_v40  ;;  %v1007_v34 = vld [vmem:[%s4174_s22 + $0x17e8] sm:$0xff]  ;;  %v1005_v36 = vld [vmem:[%s4174_s22 + $0x17d8] sm:$0xff]  ;;  %v1002_v41 = vld [vmem:[%s4174_s22 + $0x17c0] sm:$0xff] }
 0x1cf   : > { %v1009_v37 = vld [vmem:[%s4174_s22 + $0x17f8] sm:$0xff] }
 0x1d0   : > { %3027 = vmatpush1.bf16.msra.mxu0 %v3026_v51  ;;  %v3556_v51 = vpack.c.bf16 %v977_v43, %v973_v42  ;;  %v1006_v42 = vld [vmem:[%s4174_s22 + $0x17e0] sm:$0xff]  ;;  %v1004_v43 = vld [vmem:[%s4174_s22 + $0x17d0] sm:$0xff] }
 0x1d1   : > { %3539 = vmatpush1.bf16.msra.mxu1 %v3538_v53  ;;  %3029 = vmatprep.subr.bf16.mxu0 %v3028_v54  ;;  %v976_v53 = vld [vmem:[%s4174_s22 + $0x16f0] sm:$0xff]  ;;  %v979_v54 = vld [vmem:[%s4174_s22 + $0x1708] sm:$0xff] }
 0x1d2   : > { %3541 = vmatprep.subr.bf16.mxu1 %v3540_v7  ;;  %v3046_v7 = vpack.c.bf16 %v974_v50, %v970_v49  ;;  %v3558_v58 = vpack.c.bf16 %v976_v53, %v972_v52  ;;  %v3048_v61 = vpack.c.bf16 %v983_v55, %v979_v54  ;;  %v1015_v49 = vld [vmem:[%s4174_s22 + $0x1828] sm:$0xff]  ;;  %v1013_v50 = vld [vmem:[%s4174_s22 + $0x1818] sm:$0xff]  ;;  %v1010_v55 = vld [vmem:[%s4174_s22 + $0x1800] sm:$0xff] }
 0x1d3   : > { %v1017_v52 = vld [vmem:[%s4174_s22 + $0x1838] sm:$0xff] }
 0x1d4   : > { %3031 = vmatpush1.bf16.msra.mxu0 %v3030_v1  ;;  %v3560_v1 = vpack.c.bf16 %v985_v57, %v981_v56  ;;  %v1014_v56 = vld [vmem:[%s4174_s22 + $0x1820] sm:$0xff]  ;;  %v1012_v57 = vld [vmem:[%s4174_s22 + $0x1810] sm:$0xff] }
 0x1d5   : > { %3543 = vmatpush1.bf16.msra.mxu1 %v3542_v2  ;;  %3033 = vmatprep.subr.bf16.mxu0 %v3032_v3  ;;  %v984_v2 = vld [vmem:[%s4174_s22 + $0x1730] sm:$0xff]  ;;  %v987_v3 = vld [vmem:[%s4174_s22 + $0x1748] sm:$0xff] }
 0x1d6   : > { %3545 = vmatprep.subr.bf16.mxu1 %v3544_v9  ;;  %v3050_v9 = vpack.c.bf16 %v982_v63, %v978_v62  ;;  %v3562_v11 = vpack.c.bf16 %v984_v2, %v980_v0  ;;  %v3052_v12 = vpack.c.bf16 %v991_v4, %v987_v3  ;;  %v1023_v62 = vld [vmem:[%s4174_s22 + $0x1868] sm:$0xff]  ;;  %v5009_v63 = vld [vmem:[#allocation2 + $0x8] sm:$0xff]  ;;  %v3066_v3 = vpack.c.bf16 %v1014_v56, %v1010_v55  ;;  %v1048_v55 = vld [vmem:[%s4174_s22 + $0x1930] sm:$0xff] }
 0x1d7   : > { %v1312_v0 = vrot.slane %v5009_v63, %v4461_v33  ;;  %v1025_v2 = vld [vmem:[%s4174_s22 + $0x1878] sm:$0xff]  ;;  %v1051_v56 = vld [vmem:[%s4174_s22 + $0x1948] sm:$0xff] }
 0x1d8   : > { %3035 = vmatpush1.bf16.msra.mxu0 %v3034_v16  ;;  %v3564_v16 = vpack.c.bf16 %v993_v5, %v989_v19  ;;  %v1018_v5 = vld [vmem:[%s4174_s22 + $0x1840] sm:$0xff] }
 0x1d9   : > { %3547 = vmatpush1.bf16.msra.mxu1 %v3546_v17  ;;  %3037 = vmatprep.subr.bf16.mxu0 %v3036_v18  ;;  %v992_v17 = vld [vmem:[%s4174_s22 + $0x1770] sm:$0xff]  ;;  %v995_v18 = vld [vmem:[%s4174_s22 + $0x1788] sm:$0xff] }
 0x1da   : > { %3549 = vmatprep.subr.bf16.mxu1 %v3548_v24  ;;  %v3054_v24 = vpack.c.bf16 %v990_v14, %v986_v13  ;;  %v3566_v25 = vpack.c.bf16 %v992_v17, %v988_v15  ;;  %v3056_v26 = vpack.c.bf16 %v999_v20, %v995_v18  ;;  %v1024_v13 = vld [vmem:[%s4174_s22 + $0x1870] sm:$0xff]  ;;  %v1027_v14 = vld [vmem:[%s4174_s22 + $0x1888] sm:$0xff]  ;;  %v1029_v17 = vld [vmem:[%s4174_s22 + $0x1898] sm:$0xff] }
 0x1db   : > { %v1031_v15 = vld [vmem:[%s4174_s22 + $0x18a8] sm:$0xff]  ;;  %v1033_v18 = vld [vmem:[%s4174_s22 + $0x18b8] sm:$0xff] }
 0x1dc   : > { %3039 = vmatpush1.bf16.msra.mxu0 %v3038_v30  ;;  %v3568_v30 = vpack.c.bf16 %v1001_v23, %v997_v21  ;;  %v3072_v23 = vpack.c.bf16 %v1031_v15, %v1027_v14 }
 0x1dd   : > { %3551 = vmatpush1.bf16.msra.mxu1 %v3550_v31  ;;  %3041 = vmatprep.subr.bf16.mxu0 %v3040_v32  ;;  %v1000_v31 = vld [vmem:[%s4174_s22 + $0x17b0] sm:$0xff]  ;;  %v1003_v32 = vld [vmem:[%s4174_s22 + $0x17c8] sm:$0xff] }
 0x1de   : > { %3553 = vmatprep.subr.bf16.mxu1 %v3552_v38  ;;  %v3058_v38 = vpack.c.bf16 %v998_v28, %v994_v27  ;;  %v3570_v39 = vpack.c.bf16 %v1000_v31, %v996_v29  ;;  %v3060_v40 = vpack.c.bf16 %v1007_v34, %v1003_v32  ;;  %v1032_v27 = vld [vmem:[%s4174_s22 + $0x18b0] sm:$0xff]  ;;  %v1035_v28 = vld [vmem:[%s4174_s22 + $0x18c8] sm:$0xff]  ;;  %v1041_v31 = vld [vmem:[%s4174_s22 + $0x18f8] sm:$0xff] }
 0x1df   : > { %v1039_v29 = vld [vmem:[%s4174_s22 + $0x18e8] sm:$0xff] }
 0x1e0   : > { %3043 = vmatpush1.bf16.msra.mxu0 %v3042_v45  ;;  %v3572_v45 = vpack.c.bf16 %v1009_v37, %v1005_v36  ;;  %v3076_v36 = vpack.c.bf16 %v1039_v29, %v1035_v28  ;;  %v1034_v37 = vld [vmem:[%s4174_s22 + $0x18c0] sm:$0xff] }
 0x1e1   : > { %3555 = vmatpush1.bf16.msra.mxu1 %v3554_v47  ;;  %3045 = vmatprep.subr.bf16.mxu0 %v3044_v48  ;;  %v1008_v47 = vld [vmem:[%s4174_s22 + $0x17f0] sm:$0xff]  ;;  %v1011_v48 = vld [vmem:[%s4174_s22 + $0x1808] sm:$0xff]  ;;  %v1066_v29 = vld [vmem:[%s4174_s22 + $0x19c0] sm:$0xff] }
 0x1e2   : > { %3557 = vmatprep.subr.bf16.mxu1 %v3556_v51  ;;  %v3062_v51 = vpack.c.bf16 %v1006_v42, %v1002_v41  ;;  %v3574_v53 = vpack.c.bf16 %v1008_v47, %v1004_v43  ;;  %v3064_v54 = vpack.c.bf16 %v1015_v49, %v1011_v48  ;;  %v1040_v41 = vld [vmem:[%s4174_s22 + $0x18f0] sm:$0xff]  ;;  %v1043_v42 = vld [vmem:[%s4174_s22 + $0x1908] sm:$0xff]  ;;  %v1049_v47 = vld [vmem:[%s4174_s22 + $0x1938] sm:$0xff] }
 0x1e3   : > { %v1047_v43 = vld [vmem:[%s4174_s22 + $0x1928] sm:$0xff] }
 0x1e4   : > { %3047 = vmatpush1.bf16.msra.mxu0 %v3046_v7  ;;  %v3576_v7 = vpack.c.bf16 %v1017_v52, %v1013_v50  ;;  %v3080_v50 = vpack.c.bf16 %v1047_v43, %v1043_v42  ;;  %v1042_v52 = vld [vmem:[%s4174_s22 + $0x1900] sm:$0xff] }
 0x1e5   : > { %3559 = vmatpush1.bf16.msra.mxu1 %v3558_v58  ;;  %3049 = vmatprep.subr.bf16.mxu0 %v3048_v61  ;;  %v1016_v58 = vld [vmem:[%s4174_s22 + $0x1830] sm:$0xff]  ;;  %v1019_v61 = vld [vmem:[%s4174_s22 + $0x1848] sm:$0xff]  ;;  %v1074_v43 = vld [vmem:[%s4174_s22 + $0x1a00] sm:$0xff] }
 0x1e6   : > { %3561 = vmatprep.subr.bf16.mxu1 %v3560_v1  ;;  %v1021_v1 = vld [vmem:[%s4174_s22 + $0x1858] sm:$0xff]  ;;  %v3578_v4 = vpack.c.bf16 %v1016_v58, %v1012_v57  ;;  %v3068_v19 = vpack.c.bf16 %v1023_v62, %v1019_v61  ;;  %v1055_v57 = vld [vmem:[%s4174_s22 + $0x1968] sm:$0xff] }
 0x1e7   : > { %v1057_v58 = vld [vmem:[%s4174_s22 + $0x1978] sm:$0xff] }
 0x1e8   : > { %3051 = vmatpush1.bf16.msra.mxu0 %v3050_v9  ;;  %v1022_v9 = vld [vmem:[%s4174_s22 + $0x1860] sm:$0xff] }
 0x1e9   : > { %3563 = vmatpush1.bf16.msra.mxu1 %v3562_v11  ;;  %3053 = vmatprep.subr.bf16.mxu0 %v3052_v12  ;;  %v1020_v11 = vld [vmem:[%s4174_s22 + $0x1850] sm:$0xff]  ;;  %v3580_v12 = vpack.c.bf16 %v1025_v2, %v1021_v1  ;;  %v3070_v20 = vpack.c.bf16 %v1022_v9, %v1018_v5  ;;  %v1050_v1 = vld [vmem:[%s4174_s22 + $0x1940] sm:$0xff]  ;;  %v1059_v5 = vld [vmem:[%s4174_s22 + $0x1988] sm:$0xff] }
 0x1ea   : > { %3565 = vmatprep.subr.bf16.mxu1 %v3564_v16  ;;  %v1324_v16 = vrot.slane %v5009_v63, %v1291_v44  ;;  %v3582_v21 = vpack.c.bf16 %v1024_v13, %v1020_v11  ;;  %v3584_v44 = vpack.c.bf16 %v1033_v18, %v1029_v17  ;;  %v1054_v2 = vld [vmem:[%s4174_s22 + $0x1960] sm:$0xff]  ;;  %v1063_v9 = vld [vmem:[%s4174_s22 + $0x19a8] sm:$0xff]  ;;  %v1061_v11 = vld [vmem:[%s4174_s22 + $0x1998] sm:$0xff] }
 0x1eb   : > { %v3086_v13 = vpack.c.bf16 %v1054_v2, %v1050_v1  ;;  %v3088_v15 = vpack.c.bf16 %v1063_v9, %v1059_v5  ;;  %v1062_v17 = vld [vmem:[%s4174_s22 + $0x19a0] sm:$0xff]  ;;  %v1060_v18 = vld [vmem:[%s4174_s22 + $0x1990] sm:$0xff]  ;;  %v1095_v1 = vld [vmem:[%s4174_s22 + $0x1aa8] sm:$0xff] }
 0x1ec   : > { %3055 = vmatpush1.bf16.msra.mxu0 %v3054_v24  ;;  %v1026_v24 = vld [vmem:[%s4174_s22 + $0x1880] sm:$0xff]  ;;  %v1093_v2 = vld [vmem:[%s4174_s22 + $0x1a98] sm:$0xff] }
 0x1ed   : > { %3567 = vmatpush1.bf16.msra.mxu1 %v3566_v25  ;;  %3057 = vmatprep.subr.bf16.mxu0 %v3056_v26  ;;  %v1030_v25 = vld [vmem:[%s4174_s22 + $0x18a0] sm:$0xff]  ;;  %v1028_v26 = vld [vmem:[%s4174_s22 + $0x1890] sm:$0xff] }
 0x1ee   : > { %3569 = vmatprep.subr.bf16.mxu1 %v3568_v30  ;;  %v1037_v30 = vld [vmem:[%s4174_s22 + $0x18d8] sm:$0xff]  ;;  %v3074_v32 = vpack.c.bf16 %v1030_v25, %v1026_v24  ;;  %v3586_v34 = vpack.c.bf16 %v1032_v27, %v1028_v26  ;;  %v1071_v24 = vld [vmem:[%s4174_s22 + $0x19e8] sm:$0xff]  ;;  %v1090_v9 = vld [vmem:[%s4174_s22 + $0x1a80] sm:$0xff] }
 0x1ef   : > { %v1069_v25 = vld [vmem:[%s4174_s22 + $0x19d8] sm:$0xff] }
 0x1f0   : > { %3059 = vmatpush1.bf16.msra.mxu0 %v3058_v38  ;;  %v1038_v38 = vld [vmem:[%s4174_s22 + $0x18e0] sm:$0xff]  ;;  %v1073_v26 = vld [vmem:[%s4174_s22 + $0x19f8] sm:$0xff] }
 0x1f1   : > { %3571 = vmatpush1.bf16.msra.mxu1 %v3570_v39  ;;  %3061 = vmatprep.subr.bf16.mxu0 %v3060_v40  ;;  %v1036_v39 = vld [vmem:[%s4174_s22 + $0x18d0] sm:$0xff]  ;;  %v3588_v40 = vpack.c.bf16 %v1041_v31, %v1037_v30  ;;  %v3078_v48 = vpack.c.bf16 %v1038_v38, %v1034_v37  ;;  %v1070_v30 = vld [vmem:[%s4174_s22 + $0x19e0] sm:$0xff]  ;;  %v1079_v37 = vld [vmem:[%s4174_s22 + $0x1a28] sm:$0xff] }
 0x1f2   : > { %3573 = vmatprep.subr.bf16.mxu1 %v3572_v45  ;;  %v1045_v45 = vld [vmem:[%s4174_s22 + $0x1918] sm:$0xff]  ;;  %v3590_v49 = vpack.c.bf16 %v1040_v41, %v1036_v39  ;;  %v1068_v31 = vld [vmem:[%s4174_s22 + $0x19d0] sm:$0xff] }
 0x1f3   : > { %v1077_v38 = vld [vmem:[%s4174_s22 + $0x1a18] sm:$0xff] }
 0x1f4   : > { %3063 = vmatpush1.bf16.msra.mxu0 %v3062_v51  ;;  %v1046_v51 = vld [vmem:[%s4174_s22 + $0x1920] sm:$0xff]  ;;  %v1081_v39 = vld [vmem:[%s4174_s22 + $0x1a38] sm:$0xff] }
 0x1f5   : > { %3575 = vmatpush1.bf16.msra.mxu1 %v3574_v53  ;;  %3065 = vmatprep.subr.bf16.mxu0 %v3064_v54  ;;  %v1044_v53 = vld [vmem:[%s4174_s22 + $0x1910] sm:$0xff]  ;;  %v3592_v54 = vpack.c.bf16 %v1049_v47, %v1045_v45  ;;  %v3082_v61 = vpack.c.bf16 %v1046_v51, %v1042_v52  ;;  %v1078_v45 = vld [vmem:[%s4174_s22 + $0x1a20] sm:$0xff]  ;;  %v1087_v52 = vld [vmem:[%s4174_s22 + $0x1a68] sm:$0xff] }
 0x1f6   : > { %3577 = vmatprep.subr.bf16.mxu1 %v3576_v7  ;;  %v1053_v7 = vld [vmem:[%s4174_s22 + $0x1958] sm:$0xff]  ;;  %v3594_v62 = vpack.c.bf16 %v1048_v55, %v1044_v53  ;;  %v1076_v47 = vld [vmem:[%s4174_s22 + $0x1a10] sm:$0xff] }
 0x1f7   : > { %1790 = vmatmul.mubr.f32.vlgmr.msra.gmra.mrb[0].mxu0 %v1312_v0  ;;  %v1085_v51 = vld [vmem:[%s4174_s22 + $0x1a58] sm:$0xff] }
 0x1f8   : > { %3067 = vmatpush1.bf16.msra.mxu0 %v3066_v3  ;;  %2358 = vmatmul.mubr.f32.vlgmr.msra.gmra.mrb[0].mxu1 %v1312_v0  ;;  %v3084_v0 = vpack.c.bf16 %v1055_v57, %v1051_v56  ;;  %v1052_v3 = vld [vmem:[%s4174_s22 + $0x1950] sm:$0xff]  ;;  %v1089_v53 = vld [vmem:[%s4174_s22 + $0x1a78] sm:$0xff]  ;;  %v1082_v57 = vld [vmem:[%s4174_s22 + $0x1a40] sm:$0xff] }
 0x1f9   : > { %3579 = vmatpush1.bf16.msra.mxu1 %v3578_v4  ;;  %3069 = vmatprep.subr.bf16.mxu0 %v3068_v19  ;;  %v3596_v4 = vpack.c.bf16 %v1057_v58, %v1053_v7  ;;  %v1056_v19 = vld [vmem:[%s4174_s22 + $0x1970] sm:$0xff]  ;;  %v1086_v7 = vld [vmem:[%s4174_s22 + $0x1a60] sm:$0xff] }
 0x1fa   : > { %3581 = vmatprep.subr.bf16.mxu1 %v3580_v12  ;;  %1860 = vmatprep.mubr.f32.mxu0 %v1324_v16  ;;  %v1065_v12 = vld [vmem:[%s4174_s22 + $0x19b8] sm:$0xff]  ;;  %v3598_v14 = vpack.c.bf16 %v1056_v19, %v1052_v3  ;;  %v1084_v58 = vld [vmem:[%s4174_s22 + $0x1a50] sm:$0xff] }
 0x1fb   : > { %2428 = vmatprep.mubr.f32.mxu1 %v1324_v16  ;;  %v1058_v16 = vld [vmem:[%s4174_s22 + $0x1980] sm:$0xff]  ;;  %v1097_v3 = vld [vmem:[%s4174_s22 + $0x1ab8] sm:$0xff] }
 0x1fc   : > { %3071 = vmatpush1.bf16.msra.mxu0 %v3070_v20  ;;  %v3600_v20 = vpack.c.bf16 %v1065_v12, %v1061_v11  ;;  %v1094_v11 = vld [vmem:[%s4174_s22 + $0x1aa0] sm:$0xff]  ;;  %v1092_v12 = vld [vmem:[%s4174_s22 + $0x1a90] sm:$0xff] }
 0x1fd   : > { %3583 = vmatpush1.bf16.msra.mxu1 %v3582_v21  ;;  %3073 = vmatprep.subr.bf16.mxu0 %v3072_v23  ;;  %v1064_v21 = vld [vmem:[%s4174_s22 + $0x19b0] sm:$0xff]  ;;  %v1067_v23 = vld [vmem:[%s4174_s22 + $0x19c8] sm:$0xff] }
 0x1fe   : > { %3585 = vmatprep.subr.bf16.mxu1 %v3584_v44  ;;  %v3090_v44 = vpack.c.bf16 %v1062_v17, %v1058_v16  ;;  %v3602_v27 = vpack.c.bf16 %v1064_v21, %v1060_v18  ;;  %v3092_v28 = vpack.c.bf16 %v1071_v24, %v1067_v23  ;;  %v1103_v16 = vld [vmem:[%s4174_s22 + $0x1ae8] sm:$0xff]  ;;  %v1101_v17 = vld [vmem:[%s4174_s22 + $0x1ad8] sm:$0xff]  ;;  %v1098_v24 = vld [vmem:[%s4174_s22 + $0x1ac0] sm:$0xff] }
 0x1ff   : > { %v1105_v18 = vld [vmem:[%s4174_s22 + $0x1af8] sm:$0xff] }
 0x200   : > { %3075 = vmatpush1.bf16.msra.mxu0 %v3074_v32  ;;  %v3604_v32 = vpack.c.bf16 %v1073_v26, %v1069_v25  ;;  %v1102_v25 = vld [vmem:[%s4174_s22 + $0x1ae0] sm:$0xff]  ;;  %v1100_v26 = vld [vmem:[%s4174_s22 + $0x1ad0] sm:$0xff] }
 0x201   : > { %3587 = vmatpush1.bf16.msra.mxu1 %v3586_v34  ;;  %3077 = vmatprep.subr.bf16.mxu0 %v3076_v36  ;;  %v1072_v34 = vld [vmem:[%s4174_s22 + $0x19f0] sm:$0xff]  ;;  %v1075_v36 = vld [vmem:[%s4174_s22 + $0x1a08] sm:$0xff] }
 0x202   : > { %3589 = vmatprep.subr.bf16.mxu1 %v3588_v40  ;;  %v3094_v40 = vpack.c.bf16 %v1070_v30, %v1066_v29  ;;  %v3606_v41 = vpack.c.bf16 %v1072_v34, %v1068_v31  ;;  %v3096_v42 = vpack.c.bf16 %v1079_v37, %v1075_v36  ;;  %v1111_v29 = vld [vmem:[%s4174_s22 + $0x1b28] sm:$0xff]  ;;  %v1109_v30 = vld [vmem:[%s4174_s22 + $0x1b18] sm:$0xff]  ;;  %v1106_v37 = vld [vmem:[%s4174_s22 + $0x1b00] sm:$0xff] }
 0x203   : > { %v1113_v31 = vld [vmem:[%s4174_s22 + $0x1b38] sm:$0xff] }
 0x204   : > { %3079 = vmatpush1.bf16.msra.mxu0 %v3078_v48  ;;  %v3608_v48 = vpack.c.bf16 %v1081_v39, %v1077_v38  ;;  %v1110_v38 = vld [vmem:[%s4174_s22 + $0x1b20] sm:$0xff]  ;;  %v1108_v39 = vld [vmem:[%s4174_s22 + $0x1b10] sm:$0xff] }
 0x205   : > { %3591 = vmatpush1.bf16.msra.mxu1 %v3590_v49  ;;  %3081 = vmatprep.subr.bf16.mxu0 %v3080_v50  ;;  %v1080_v49 = vld [vmem:[%s4174_s22 + $0x1a30] sm:$0xff]  ;;  %v1083_v50 = vld [vmem:[%s4174_s22 + $0x1a48] sm:$0xff] }
 0x206   : > { %3593 = vmatprep.subr.bf16.mxu1 %v3592_v54  ;;  %v3098_v54 = vpack.c.bf16 %v1078_v45, %v1074_v43  ;;  %v3610_v55 = vpack.c.bf16 %v1080_v49, %v1076_v47  ;;  %v3100_v56 = vpack.c.bf16 %v1087_v52, %v1083_v50  ;;  %v1119_v43 = vld [vmem:[%s4174_s22 + $0x1b68] sm:$0xff]  ;;  %v1117_v45 = vld [vmem:[%s4174_s22 + $0x1b58] sm:$0xff]  ;;  %v1114_v52 = vld [vmem:[%s4174_s22 + $0x1b40] sm:$0xff] }
 0x207   : > { %v1121_v47 = vld [vmem:[%s4174_s22 + $0x1b78] sm:$0xff] }
 0x208   : > { %3083 = vmatpush1.bf16.msra.mxu0 %v3082_v61  ;;  %v3612_v61 = vpack.c.bf16 %v1089_v53, %v1085_v51  ;;  %v1118_v51 = vld [vmem:[%s4174_s22 + $0x1b60] sm:$0xff]  ;;  %v1116_v53 = vld [vmem:[%s4174_s22 + $0x1b50] sm:$0xff] }
 0x209   : > { %3595 = vmatpush1.bf16.msra.mxu1 %v3594_v62  ;;  %3085 = vmatprep.subr.bf16.mxu0 %v3084_v0  ;;  %v1088_v62 = vld [vmem:[%s4174_s22 + $0x1a70] sm:$0xff]  ;;  %v1091_v0 = vld [vmem:[%s4174_s22 + $0x1a88] sm:$0xff] }
 0x20a   : > { %3597 = vmatprep.subr.bf16.mxu1 %v3596_v4  ;;  %v3102_v4 = vpack.c.bf16 %v1086_v7, %v1082_v57  ;;  %v3614_v19 = vpack.c.bf16 %v1088_v62, %v1084_v58  ;;  %v3104_v5 = vpack.c.bf16 %v1095_v1, %v1091_v0  ;;  %v1127_v57 = vld [vmem:[%s4174_s22 + $0x1ba8] sm:$0xff]  ;;  %v1125_v7 = vld [vmem:[%s4174_s22 + $0x1b98] sm:$0xff]  ;;  %v1122_v1 = vld [vmem:[%s4174_s22 + $0x1b80] sm:$0xff] }
 0x20b   : > { %v1129_v58 = vld [vmem:[%s4174_s22 + $0x1bb8] sm:$0xff] }
 0x20c   : > { %3087 = vmatpush1.bf16.msra.mxu0 %v3086_v13  ;;  %v3616_v13 = vpack.c.bf16 %v1097_v3, %v1093_v2  ;;  %v1126_v2 = vld [vmem:[%s4174_s22 + $0x1ba0] sm:$0xff]  ;;  %v1124_v3 = vld [vmem:[%s4174_s22 + $0x1b90] sm:$0xff] }
 0x20d   : > { %3599 = vmatpush1.bf16.msra.mxu1 %v3598_v14  ;;  %3089 = vmatprep.subr.bf16.mxu0 %v3088_v15  ;;  %v1096_v14 = vld [vmem:[%s4174_s22 + $0x1ab0] sm:$0xff]  ;;  %v1099_v15 = vld [vmem:[%s4174_s22 + $0x1ac8] sm:$0xff] }
 0x20e   : > { %3601 = vmatprep.subr.bf16.mxu1 %v3600_v20  ;;  %v3106_v20 = vpack.c.bf16 %v1094_v11, %v1090_v9  ;;  %v3618_v21 = vpack.c.bf16 %v1096_v14, %v1092_v12  ;;  %v3108_v23 = vpack.c.bf16 %v1103_v16, %v1099_v15  ;;  %v1135_v9 = vld [vmem:[%s4174_s22 + $0x1be8] sm:$0xff]  ;;  %v1133_v11 = vld [vmem:[%s4174_s22 + $0x1bd8] sm:$0xff]  ;;  %v1130_v16 = vld [vmem:[%s4174_s22 + $0x1bc0] sm:$0xff] }
 0x20f   : > { %v1137_v12 = vld [vmem:[%s4174_s22 + $0x1bf8] sm:$0xff] }
 0x210   : > { %3091 = vmatpush1.bf16.msra.mxu0 %v3090_v44  ;;  %v3620_v44 = vpack.c.bf16 %v1105_v18, %v1101_v17  ;;  %v1134_v17 = vld [vmem:[%s4174_s22 + $0x1be0] sm:$0xff]  ;;  %v1132_v18 = vld [vmem:[%s4174_s22 + $0x1bd0] sm:$0xff] }
 0x211   : > { %3603 = vmatpush1.bf16.msra.mxu1 %v3602_v27  ;;  %3093 = vmatprep.subr.bf16.mxu0 %v3092_v28  ;;  %v1104_v27 = vld [vmem:[%s4174_s22 + $0x1af0] sm:$0xff]  ;;  %v1107_v28 = vld [vmem:[%s4174_s22 + $0x1b08] sm:$0xff] }
 0x212   : > { %3605 = vmatprep.subr.bf16.mxu1 %v3604_v32  ;;  %v3110_v32 = vpack.c.bf16 %v1102_v25, %v1098_v24  ;;  %v3622_v34 = vpack.c.bf16 %v1104_v27, %v1100_v26  ;;  %v3112_v36 = vpack.c.bf16 %v1111_v29, %v1107_v28  ;;  %v1143_v24 = vld [vmem:[%s4174_s22 + $0x1c28] sm:$0xff]  ;;  %v1141_v25 = vld [vmem:[%s4174_s22 + $0x1c18] sm:$0xff]  ;;  %v1138_v29 = vld [vmem:[%s4174_s22 + $0x1c00] sm:$0xff] }
 0x213   : > { %v1145_v26 = vld [vmem:[%s4174_s22 + $0x1c38] sm:$0xff] }
 0x214   : > { %3095 = vmatpush1.bf16.msra.mxu0 %v3094_v40  ;;  %v3624_v40 = vpack.c.bf16 %v1113_v31, %v1109_v30  ;;  %v1142_v30 = vld [vmem:[%s4174_s22 + $0x1c20] sm:$0xff]  ;;  %v1140_v31 = vld [vmem:[%s4174_s22 + $0x1c10] sm:$0xff] }
 0x215   : > { %3607 = vmatpush1.bf16.msra.mxu1 %v3606_v41  ;;  %3097 = vmatprep.subr.bf16.mxu0 %v3096_v42  ;;  %v1112_v41 = vld [vmem:[%s4174_s22 + $0x1b30] sm:$0xff]  ;;  %v1115_v42 = vld [vmem:[%s4174_s22 + $0x1b48] sm:$0xff] }
 0x216   : > { %3609 = vmatprep.subr.bf16.mxu1 %v3608_v48  ;;  %v3114_v48 = vpack.c.bf16 %v1110_v38, %v1106_v37  ;;  %v3626_v49 = vpack.c.bf16 %v1112_v41, %v1108_v39  ;;  %v3116_v50 = vpack.c.bf16 %v1119_v43, %v1115_v42  ;;  %v1151_v37 = vld [vmem:[%s4174_s22 + $0x1c68] sm:$0xff]  ;;  %v1320_v38 = vrot.slane %v5009_v63, %v1287_v60  ;;  %v1149_v39 = vld [vmem:[%s4174_s22 + $0x1c58] sm:$0xff] }
 0x217   : > { %v3130_v41 = vpack.c.bf16 %v1142_v30, %v1138_v29  ;;  %v1155_v60 = vld [vmem:[%s4174_s22 + $0x1c88] sm:$0xff]  ;;  %v1181_v29 = vld [vmem:[%s4174_s22 + $0x1d58] sm:$0xff] }
 0x218   : > { %3099 = vmatpush1.bf16.msra.mxu0 %v3098_v54  ;;  %v3628_v54 = vpack.c.bf16 %v1121_v47, %v1117_v45  ;;  %v1146_v45 = vld [vmem:[%s4174_s22 + $0x1c40] sm:$0xff]  ;;  %v1185_v30 = vld [vmem:[%s4174_s22 + $0x1d78] sm:$0xff] }
 0x219   : > { %3611 = vmatpush1.bf16.msra.mxu1 %v3610_v55  ;;  %3101 = vmatprep.subr.bf16.mxu0 %v3100_v56  ;;  %v1120_v55 = vld [vmem:[%s4174_s22 + $0x1b70] sm:$0xff]  ;;  %v1123_v56 = vld [vmem:[%s4174_s22 + $0x1b88] sm:$0xff]  ;;  %v1150_v47 = vld [vmem:[%s4174_s22 + $0x1c60] sm:$0xff] }
 0x21a   : > { %3613 = vmatprep.subr.bf16.mxu1 %v3612_v61  ;;  %v3118_v61 = vpack.c.bf16 %v1118_v51, %v1114_v52  ;;  %v3630_v62 = vpack.c.bf16 %v1120_v55, %v1116_v53  ;;  %v3120_v0 = vpack.c.bf16 %v1127_v57, %v1123_v56  ;;  %v1159_v52 = vld [vmem:[%s4174_s22 + $0x1ca8] sm:$0xff]  ;;  %v1332_v51 = vrot.slane %v5009_v63, %v1299_v6  ;;  %v1157_v53 = vld [vmem:[%s4174_s22 + $0x1c98] sm:$0xff]  ;;  %v1160_v63 = vld [vmem:[%s4174_s22 + $0x1cb0] sm:$0xff] }
 0x21b   : > { %v3134_v55 = vpack.c.bf16 %v1150_v47, %v1146_v45  ;;  %v3136_v57 = vpack.c.bf16 %v1159_v52, %v1155_v60  ;;  %v1193_v45 = vld [vmem:[%s4174_s22 + $0x1db8] sm:$0xff]  ;;  %v1190_v60 = vld [vmem:[%s4174_s22 + $0x1da0] sm:$0xff]  ;;  %v1188_v52 = vld [vmem:[%s4174_s22 + $0x1d90] sm:$0xff] }
 0x21c   : > { %3103 = vmatpush1.bf16.msra.mxu0 %v3102_v4  ;;  %v3632_v4 = vpack.c.bf16 %v1129_v58, %v1125_v7  ;;  %v1154_v7 = vld [vmem:[%s4174_s22 + $0x1c80] sm:$0xff] }
 0x21d   : > { %3615 = vmatpush1.bf16.msra.mxu1 %v3614_v19  ;;  %3105 = vmatprep.subr.bf16.mxu0 %v3104_v5  ;;  %v1128_v19 = vld [vmem:[%s4174_s22 + $0x1bb0] sm:$0xff]  ;;  %v1131_v5 = vld [vmem:[%s4174_s22 + $0x1bc8] sm:$0xff]  ;;  %v1158_v58 = vld [vmem:[%s4174_s22 + $0x1ca0] sm:$0xff] }
 0x21e   : > { %3617 = vmatprep.subr.bf16.mxu1 %v3616_v13  ;;  %v3122_v13 = vpack.c.bf16 %v1126_v2, %v1122_v1  ;;  %v3634_v14 = vpack.c.bf16 %v1128_v19, %v1124_v3  ;;  %v3124_v15 = vpack.c.bf16 %v1135_v9, %v1131_v5  ;;  %v1165_v1 = vld [vmem:[%s4174_s22 + $0x1cd8] sm:$0xff]  ;;  %v3138_v3 = vpack.c.bf16 %v1158_v58, %v1154_v7  ;;  %v1162_v5 = vld [vmem:[%s4174_s22 + $0x1cc0] sm:$0xff] }
 0x21f   : > { %v1169_v2 = vld [vmem:[%s4174_s22 + $0x1cf8] sm:$0xff]  ;;  %v1166_v9 = vld [vmem:[%s4174_s22 + $0x1ce0] sm:$0xff] }
 0x220   : > { %3107 = vmatpush1.bf16.msra.mxu0 %v3106_v20  ;;  %v3636_v20 = vpack.c.bf16 %v1137_v12, %v1133_v11  ;;  %v1164_v11 = vld [vmem:[%s4174_s22 + $0x1cd0] sm:$0xff]  ;;  %v3652_v12 = vpack.c.bf16 %v1169_v2, %v1165_v1  ;;  %v1203_v2 = vld [vmem:[%s4174_s22 + $0x1e08] sm:$0xff] }
 0x221   : > { %3619 = vmatpush1.bf16.msra.mxu1 %v3618_v21  ;;  %3109 = vmatprep.subr.bf16.mxu0 %v3108_v23  ;;  %v1136_v21 = vld [vmem:[%s4174_s22 + $0x1bf0] sm:$0xff]  ;;  %v1139_v23 = vld [vmem:[%s4174_s22 + $0x1c08] sm:$0xff] }
 0x222   : > { %3621 = vmatprep.subr.bf16.mxu1 %v3620_v44  ;;  %v3126_v44 = vpack.c.bf16 %v1134_v17, %v1130_v16  ;;  %v3638_v27 = vpack.c.bf16 %v1136_v21, %v1132_v18  ;;  %v3128_v28 = vpack.c.bf16 %v1143_v24, %v1139_v23  ;;  %v1173_v16 = vld [vmem:[%s4174_s22 + $0x1d18] sm:$0xff]  ;;  %v3142_v18 = vpack.c.bf16 %v1166_v9, %v1162_v5  ;;  %v1170_v23 = vld [vmem:[%s4174_s22 + $0x1d00] sm:$0xff]  ;;  %v1200_v1 = vld [vmem:[%s4174_s22 + $0x1df0] sm:$0xff] }
 0x223   : > { %v1177_v17 = vld [vmem:[%s4174_s22 + $0x1d38] sm:$0xff]  ;;  %v1174_v24 = vld [vmem:[%s4174_s22 + $0x1d20] sm:$0xff] }
 0x224   : > { %3111 = vmatpush1.bf16.msra.mxu0 %v3110_v32  ;;  %v3640_v32 = vpack.c.bf16 %v1145_v26, %v1141_v25  ;;  %v1172_v25 = vld [vmem:[%s4174_s22 + $0x1d10] sm:$0xff]  ;;  %v3656_v26 = vpack.c.bf16 %v1177_v17, %v1173_v16  ;;  %v1211_v17 = vld [vmem:[%s4174_s22 + $0x1e48] sm:$0xff] }
 0x225   : > { %3623 = vmatpush1.bf16.msra.mxu1 %v3622_v34  ;;  %3113 = vmatprep.subr.bf16.mxu0 %v3112_v36  ;;  %v1144_v34 = vld [vmem:[%s4174_s22 + $0x1c30] sm:$0xff]  ;;  %v1147_v36 = vld [vmem:[%s4174_s22 + $0x1c48] sm:$0xff] }
 0x226   : > { %3625 = vmatprep.subr.bf16.mxu1 %v3624_v40  ;;  %v1153_v40 = vld [vmem:[%s4174_s22 + $0x1c78] sm:$0xff]  ;;  %v3642_v42 = vpack.c.bf16 %v1144_v34, %v1140_v31  ;;  %v3132_v43 = vpack.c.bf16 %v1151_v37, %v1147_v36  ;;  %v3146_v31 = vpack.c.bf16 %v1174_v24, %v1170_v23  ;;  %v1178_v36 = vld [vmem:[%s4174_s22 + $0x1d40] sm:$0xff]  ;;  %v1208_v16 = vld [vmem:[%s4174_s22 + $0x1e30] sm:$0xff] }
 0x227   : > { %v1182_v37 = vld [vmem:[%s4174_s22 + $0x1d60] sm:$0xff] }
 0x228   : > { %3115 = vmatpush1.bf16.msra.mxu0 %v3114_v48  ;;  %v1148_v48 = vld [vmem:[%s4174_s22 + $0x1c50] sm:$0xff]  ;;  %v3150_v47 = vpack.c.bf16 %v1182_v37, %v1178_v36 }
 0x229   : > { %3627 = vmatpush1.bf16.msra.mxu1 %v3626_v49  ;;  %3117 = vmatprep.subr.bf16.mxu0 %v3116_v50  ;;  %v3644_v49 = vpack.c.bf16 %v1153_v40, %v1149_v39  ;;  %v1152_v50 = vld [vmem:[%s4174_s22 + $0x1c70] sm:$0xff]  ;;  %v3660_v39 = vpack.c.bf16 %v1185_v30, %v1181_v29  ;;  %v1219_v30 = vld [vmem:[%s4174_s22 + $0x1e88] sm:$0xff] }
 0x22a   : > { %3629 = vmatprep.subr.bf16.mxu1 %v3628_v54  ;;  %v1161_v54 = vld [vmem:[%s4174_s22 + $0x1cb8] sm:$0xff]  ;;  %v3646_v56 = vpack.c.bf16 %v1152_v50, %v1148_v48  ;;  %v1184_v40 = vld [vmem:[%s4174_s22 + $0x1d70] sm:$0xff]  ;;  %v1186_v50 = vld [vmem:[%s4174_s22 + $0x1d80] sm:$0xff] }
 0x22b   : > { %v3648_v6 = vpack.c.bf16 %v1161_v54, %v1157_v53  ;;  %v1192_v53 = vld [vmem:[%s4174_s22 + $0x1db0] sm:$0xff]  ;;  %v1195_v54 = vld [vmem:[%s4174_s22 + $0x1dc8] sm:$0xff]  ;;  %v3154_v7 = vpack.c.bf16 %v1190_v60, %v1186_v50 }
 0x22c   : > { %3119 = vmatpush1.bf16.msra.mxu0 %v3118_v61  ;;  %v1156_v61 = vld [vmem:[%s4174_s22 + $0x1c90] sm:$0xff]  ;;  %v3666_v58 = vpack.c.bf16 %v1192_v53, %v1188_v52  ;;  %v1230_v53 = vld [vmem:[%s4174_s22 + $0x1ee0] sm:$0xff] }
 0x22d   : > { %3631 = vmatpush1.bf16.msra.mxu1 %v3630_v62  ;;  %3121 = vmatprep.subr.bf16.mxu0 %v3120_v0  ;;  %v1163_v62 = vld [vmem:[%s4174_s22 + $0x1cc8] sm:$0xff]  ;;  %v1216_v29 = vld [vmem:[%s4174_s22 + $0x1e70] sm:$0xff] }
 0x22e   : > { %3633 = vmatprep.subr.bf16.mxu1 %v3632_v4  ;;  %v1167_v0 = vld [vmem:[%s4174_s22 + $0x1ce8] sm:$0xff]  ;;  %v3650_v4 = vpack.c.bf16 %v1160_v63, %v1156_v61  ;;  %v1198_v63 = vld [vmem:[%s4174_s22 + $0x1de0] sm:$0xff] }
 0x22f   : > { %v3140_v19 = vpack.c.bf16 %v1167_v0, %v1163_v62  ;;  %v1196_v62 = vld [vmem:[%s4174_s22 + $0x1dd0] sm:$0xff] }
 0x230   : > { %3123 = vmatpush1.bf16.msra.mxu0 %v3122_v13  ;;  %v1168_v13 = vld [vmem:[%s4174_s22 + $0x1cf0] sm:$0xff]  ;;  %v3670_v9 = vpack.c.bf16 %v1200_v1, %v1196_v62  ;;  %v1238_v1 = vld [vmem:[%s4174_s22 + $0x1f20] sm:$0xff] }
 0x231   : > { %3635 = vmatpush1.bf16.msra.mxu1 %v3634_v14  ;;  %3125 = vmatprep.subr.bf16.mxu0 %v3124_v15  ;;  %v1171_v14 = vld [vmem:[%s4174_s22 + $0x1d08] sm:$0xff] }
 0x232   : > { %3637 = vmatprep.subr.bf16.mxu1 %v3636_v20  ;;  %v1175_v15 = vld [vmem:[%s4174_s22 + $0x1d28] sm:$0xff]  ;;  %v3654_v20 = vpack.c.bf16 %v1168_v13, %v1164_v11  ;;  %v1206_v13 = vld [vmem:[%s4174_s22 + $0x1e20] sm:$0xff] }
 0x233   : > { %v3144_v21 = vpack.c.bf16 %v1175_v15, %v1171_v14  ;;  %v1204_v14 = vld [vmem:[%s4174_s22 + $0x1e10] sm:$0xff] }
 0x234   : > { %3127 = vmatpush1.bf16.msra.mxu0 %v3126_v44  ;;  %v1176_v44 = vld [vmem:[%s4174_s22 + $0x1d30] sm:$0xff]  ;;  %v3674_v24 = vpack.c.bf16 %v1208_v16, %v1204_v14  ;;  %v1246_v16 = vld [vmem:[%s4174_s22 + $0x1f60] sm:$0xff] }
 0x235   : > { %3639 = vmatpush1.bf16.msra.mxu1 %v3638_v27  ;;  %3129 = vmatprep.subr.bf16.mxu0 %v3128_v28  ;;  %v1179_v27 = vld [vmem:[%s4174_s22 + $0x1d48] sm:$0xff] }
 0x236   : > { %3641 = vmatprep.subr.bf16.mxu1 %v3640_v32  ;;  %v1183_v28 = vld [vmem:[%s4174_s22 + $0x1d68] sm:$0xff]  ;;  %v3658_v32 = vpack.c.bf16 %v1176_v44, %v1172_v25  ;;  %v1214_v44 = vld [vmem:[%s4174_s22 + $0x1e60] sm:$0xff] }
 0x237   : > { %1861 = vmatmul.mubr.f32.vlgmr.msra.gmra.mrb[0].mxu0 %v1320_v38  ;;  %v3148_v34 = vpack.c.bf16 %v1183_v28, %v1179_v27  ;;  %v1212_v27 = vld [vmem:[%s4174_s22 + $0x1e50] sm:$0xff] }
 0x238   : > { %3131 = vmatpush1.bf16.msra.mxu0 %v3130_v41  ;;  %2429 = vmatmul.mubr.f32.vlgmr.msra.gmra.mrb[0].mxu1 %v1320_v38  ;;  %v1180_v38 = vld [vmem:[%s4174_s22 + $0x1d50] sm:$0xff]  ;;  %v1187_v41 = vld [vmem:[%s4174_s22 + $0x1d88] sm:$0xff]  ;;  %v3678_v37 = vpack.c.bf16 %v1216_v29, %v1212_v27  ;;  %v1254_v29 = vld [vmem:[%s4174_s22 + $0x1fa0] sm:$0xff] }
 0x239   : > { %3643 = vmatpush1.bf16.msra.mxu1 %v3642_v42  ;;  %3133 = vmatprep.subr.bf16.mxu0 %v3132_v43  ;;  %v1191_v42 = vld [vmem:[%s4174_s22 + $0x1da8] sm:$0xff]  ;;  %v1189_v43 = vld [vmem:[%s4174_s22 + $0x1d98] sm:$0xff]  ;;  %v3662_v48 = vpack.c.bf16 %v1184_v40, %v1180_v38  ;;  %v1222_v40 = vld [vmem:[%s4174_s22 + $0x1ea0] sm:$0xff] }
 0x23a   : > { %3645 = vmatprep.subr.bf16.mxu1 %v3644_v49  ;;  %1931 = vmatprep.mubr.f32.mxu0 %v1332_v51  ;;  %v3152_v49 = vpack.c.bf16 %v1191_v42, %v1187_v41  ;;  %v1220_v41 = vld [vmem:[%s4174_s22 + $0x1e90] sm:$0xff] }
 0x23b   : > { %2499 = vmatprep.mubr.f32.mxu1 %v1332_v51  ;;  %v3664_v51 = vpack.c.bf16 %v1193_v45, %v1189_v43  ;;  %v1224_v43 = vld [vmem:[%s4174_s22 + $0x1eb0] sm:$0xff]  ;;  %v1227_v45 = vld [vmem:[%s4174_s22 + $0x1ec8] sm:$0xff] }
 0x23c   : > { %3135 = vmatpush1.bf16.msra.mxu0 %v3134_v55  ;;  %v1199_v55 = vld [vmem:[%s4174_s22 + $0x1de8] sm:$0xff]  ;;  %v3682_v60 = vpack.c.bf16 %v1224_v43, %v1220_v41  ;;  %v1262_v43 = vld [vmem:[%s4174_s22 + $0x1fe0] sm:$0xff] }
 0x23d   : > { %3647 = vmatpush1.bf16.msra.mxu1 %v3646_v56  ;;  %3137 = vmatprep.subr.bf16.mxu0 %v3136_v57  ;;  %v1197_v56 = vld [vmem:[%s4174_s22 + $0x1dd8] sm:$0xff]  ;;  %v3156_v61 = vpack.c.bf16 %v1199_v55, %v1195_v54  ;;  %v1228_v54 = vld [vmem:[%s4174_s22 + $0x1ed0] sm:$0xff] }
 0x23e   : > { %3649 = vmatprep.subr.bf16.mxu1 %v3648_v6  ;;  %v1201_v57 = vld [vmem:[%s4174_s22 + $0x1df8] sm:$0xff]  ;;  %v1194_v6 = vld [vmem:[%s4174_s22 + $0x1dc0] sm:$0xff] }
 0x23f   : > { %v3668_v0 = vpack.c.bf16 %v1201_v57, %v1197_v56  ;;  %v3158_v5 = vpack.c.bf16 %v1198_v63, %v1194_v6  ;;  %v1232_v56 = vld [vmem:[%s4174_s22 + $0x1ef0] sm:$0xff]  ;;  %v1235_v57 = vld [vmem:[%s4174_s22 + $0x1f08] sm:$0xff] }
 0x240   : > { %3139 = vmatpush1.bf16.msra.mxu0 %v3138_v3  ;;  %v1207_v3 = vld [vmem:[%s4174_s22 + $0x1e28] sm:$0xff]  ;;  %v3686_v63 = vpack.c.bf16 %v1232_v56, %v1228_v54 }
 0x241   : > { %3651 = vmatpush1.bf16.msra.mxu1 %v3650_v4  ;;  %3141 = vmatprep.subr.bf16.mxu0 %v3140_v19  ;;  %v1205_v4 = vld [vmem:[%s4174_s22 + $0x1e18] sm:$0xff]  ;;  %v3160_v11 = vpack.c.bf16 %v1207_v3, %v1203_v2  ;;  %v1236_v2 = vld [vmem:[%s4174_s22 + $0x1f10] sm:$0xff] }
 0x242   : > { %3653 = vmatprep.subr.bf16.mxu1 %v3652_v12  ;;  %v1209_v19 = vld [vmem:[%s4174_s22 + $0x1e38] sm:$0xff]  ;;  %v1202_v12 = vld [vmem:[%s4174_s22 + $0x1e00] sm:$0xff] }
 0x243   : > { %v3672_v15 = vpack.c.bf16 %v1209_v19, %v1205_v4  ;;  %v3162_v23 = vpack.c.bf16 %v1206_v13, %v1202_v12  ;;  %v1240_v4 = vld [vmem:[%s4174_s22 + $0x1f30] sm:$0xff]  ;;  %v1243_v19 = vld [vmem:[%s4174_s22 + $0x1f48] sm:$0xff] }
 0x244   : > { %3143 = vmatpush1.bf16.msra.mxu0 %v3142_v18  ;;  %v1215_v18 = vld [vmem:[%s4174_s22 + $0x1e68] sm:$0xff]  ;;  %v3690_v13 = vpack.c.bf16 %v1240_v4, %v1236_v2 }
 0x245   : > { %3655 = vmatpush1.bf16.msra.mxu1 %v3654_v20  ;;  %3145 = vmatprep.subr.bf16.mxu0 %v3144_v21  ;;  %v1213_v20 = vld [vmem:[%s4174_s22 + $0x1e58] sm:$0xff]  ;;  %v3164_v25 = vpack.c.bf16 %v1215_v18, %v1211_v17  ;;  %v1244_v17 = vld [vmem:[%s4174_s22 + $0x1f50] sm:$0xff] }
 0x246   : > { %3657 = vmatprep.subr.bf16.mxu1 %v3656_v26  ;;  %v1217_v21 = vld [vmem:[%s4174_s22 + $0x1e78] sm:$0xff]  ;;  %v1210_v26 = vld [vmem:[%s4174_s22 + $0x1e40] sm:$0xff] }
 0x247   : > { %v3676_v28 = vpack.c.bf16 %v1217_v21, %v1213_v20  ;;  %v3166_v36 = vpack.c.bf16 %v1214_v44, %v1210_v26  ;;  %v1248_v20 = vld [vmem:[%s4174_s22 + $0x1f70] sm:$0xff]  ;;  %v1251_v21 = vld [vmem:[%s4174_s22 + $0x1f88] sm:$0xff] }
 0x248   : > { %3147 = vmatpush1.bf16.msra.mxu0 %v3146_v31  ;;  %v1223_v31 = vld [vmem:[%s4174_s22 + $0x1ea8] sm:$0xff]  ;;  %v3694_v44 = vpack.c.bf16 %v1248_v20, %v1244_v17 }
 0x249   : > { %3659 = vmatpush1.bf16.msra.mxu1 %v3658_v32  ;;  %3149 = vmatprep.subr.bf16.mxu0 %v3148_v34  ;;  %v1221_v32 = vld [vmem:[%s4174_s22 + $0x1e98] sm:$0xff]  ;;  %v3168_v38 = vpack.c.bf16 %v1223_v31, %v1219_v30  ;;  %v1252_v30 = vld [vmem:[%s4174_s22 + $0x1f90] sm:$0xff] }
 0x24a   : > { %3661 = vmatprep.subr.bf16.mxu1 %v3660_v39  ;;  %v1225_v34 = vld [vmem:[%s4174_s22 + $0x1eb8] sm:$0xff]  ;;  %v1218_v39 = vld [vmem:[%s4174_s22 + $0x1e80] sm:$0xff] }
 0x24b   : > { %v3680_v42 = vpack.c.bf16 %v1225_v34, %v1221_v32  ;;  %v3170_v50 = vpack.c.bf16 %v1222_v40, %v1218_v39  ;;  %v1256_v32 = vld [vmem:[%s4174_s22 + $0x1fb0] sm:$0xff]  ;;  %v1259_v34 = vld [vmem:[%s4174_s22 + $0x1fc8] sm:$0xff] }
 0x24c   : > { %3151 = vmatpush1.bf16.msra.mxu0 %v3150_v47  ;;  %v1231_v47 = vld [vmem:[%s4174_s22 + $0x1ee8] sm:$0xff]  ;;  %v3698_v40 = vpack.c.bf16 %v1256_v32, %v1252_v30 }
 0x24d   : > { %3663 = vmatpush1.bf16.msra.mxu1 %v3662_v48  ;;  %3153 = vmatprep.subr.bf16.mxu0 %v3152_v49  ;;  %v1229_v48 = vld [vmem:[%s4174_s22 + $0x1ed8] sm:$0xff]  ;;  %v3172_v52 = vpack.c.bf16 %v1231_v47, %v1227_v45  ;;  %v1260_v47 = vld [vmem:[%s4174_s22 + $0x1fd0] sm:$0xff] }
 0x24e   : > { %3665 = vmatprep.subr.bf16.mxu1 %v3664_v51  ;;  %v1233_v49 = vld [vmem:[%s4174_s22 + $0x1ef8] sm:$0xff]  ;;  %v1226_v51 = vld [vmem:[%s4174_s22 + $0x1ec0] sm:$0xff] }
 0x24f   : > { %v3684_v55 = vpack.c.bf16 %v1233_v49, %v1229_v48  ;;  %v3174_v6 = vpack.c.bf16 %v1230_v53, %v1226_v51  ;;  %v1264_v48 = vld [vmem:[%s4174_s22 + $0x1ff0] sm:$0xff]  ;;  %v1266_v51 = vld [vmem:[%s209_s27] sm:$0xf]  ;;  %v3971_v53 = vmov 1966171168  }
 0x250   : > { %3155 = vmatpush1.bf16.msra.mxu0 %v3154_v7  ;;  %v1239_v7 = vld [vmem:[%s4174_s22 + $0x1f28] sm:$0xff]  ;;  %v2513_v54 = vunpack.c.l.s4 %v3971_v53  ;;  %v1361_v56 = vrot.slane %v1266_v51, %v4461_v33 }
 0x251   : > { %3667 = vmatpush1.bf16.msra.mxu1 %v3666_v58  ;;  %3157 = vmatprep.subr.bf16.mxu0 %v3156_v61  ;;  %v1237_v58 = vld [vmem:[%s4174_s22 + $0x1f18] sm:$0xff]  ;;  %v3176_v62 = vpack.c.bf16 %v1239_v7, %v1235_v57  ;;  %v1357_v57 = vrot.slane %v1266_v51, %v4276_v8 }
 0x252   : > { %3669 = vmatprep.subr.bf16.mxu1 %v3668_v0  ;;  %v1241_v61 = vld [vmem:[%s4174_s22 + $0x1f38] sm:$0xff]  ;;  %v1234_v0 = vld [vmem:[%s4174_s22 + $0x1f00] sm:$0xff]  ;;  %v2514_v7 = vunpack.c.0.s8 %v2513_v54 }
 0x253   : > { %v3688_v3 = vpack.c.bf16 %v1241_v61, %v1237_v58  ;;  %v3178_v12 = vpack.c.bf16 %v1238_v1, %v1234_v0  ;;  %v1365_v58 = vrot.slane %v1266_v51, %v4332_v22 }
 0x254   : > { %3159 = vmatpush1.bf16.msra.mxu0 %v3158_v5  ;;  %v1247_v5 = vld [vmem:[%s4174_s22 + $0x1f68] sm:$0xff]  ;;  %v2517_v1 = vsub.s32 %v2514_v7, %v4265_v59 }
 0x255   : > { %3671 = vmatpush1.bf16.msra.mxu1 %v3670_v9  ;;  %3161 = vmatprep.subr.bf16.mxu0 %v3160_v11  ;;  %v1245_v9 = vld [vmem:[%s4174_s22 + $0x1f58] sm:$0xff]  ;;  %v3180_v14 = vpack.c.bf16 %v1247_v5, %v1243_v19 }
 0x256   : > { %3673 = vmatprep.subr.bf16.mxu1 %v3672_v15  ;;  %v1249_v11 = vld [vmem:[%s4174_s22 + $0x1f78] sm:$0xff]  ;;  %v1242_v15 = vld [vmem:[%s4174_s22 + $0x1f40] sm:$0xff] }
 0x257   : > { %v3692_v18 = vpack.c.bf16 %v1249_v11, %v1245_v9  ;;  %v3182_v26 = vpack.c.bf16 %v1246_v16, %v1242_v15 }
 0x258   : > { %3163 = vmatpush1.bf16.msra.mxu0 %v3162_v23  ;;  %v1255_v23 = vld [vmem:[%s4174_s22 + $0x1fa8] sm:$0xff] }
 0x259   : > { %3675 = vmatpush1.bf16.msra.mxu1 %v3674_v24  ;;  %3165 = vmatprep.subr.bf16.mxu0 %v3164_v25  ;;  %v1253_v24 = vld [vmem:[%s4174_s22 + $0x1f98] sm:$0xff]  ;;  %v3184_v27 = vpack.c.bf16 %v1255_v23, %v1251_v21 }
 0x25a   : > { %3677 = vmatprep.subr.bf16.mxu1 %v3676_v28  ;;  %v1257_v25 = vld [vmem:[%s4174_s22 + $0x1fb8] sm:$0xff]  ;;  %v1250_v28 = vld [vmem:[%s4174_s22 + $0x1f80] sm:$0xff] }
 0x25b   : > { %v3696_v31 = vpack.c.bf16 %v1257_v25, %v1253_v24  ;;  %v3186_v39 = vpack.c.bf16 %v1254_v29, %v1250_v28 }
 0x25c   : > { %3167 = vmatpush1.bf16.msra.mxu0 %v3166_v36  ;;  %v1263_v36 = vld [vmem:[%s4174_s22 + $0x1fe8] sm:$0xff] }
 0x25d   : > { %3679 = vmatpush1.bf16.msra.mxu1 %v3678_v37  ;;  %3169 = vmatprep.subr.bf16.mxu0 %v3168_v38  ;;  %v1261_v37 = vld [vmem:[%s4174_s22 + $0x1fd8] sm:$0xff]  ;;  %v3188_v41 = vpack.c.bf16 %v1263_v36, %v1259_v34 }
 0x25e   : > { %3681 = vmatprep.subr.bf16.mxu1 %v3680_v42  ;;  %v1265_v38 = vld [vmem:[%s4174_s22 + $0x1ff8] sm:$0xff]  ;;  %v1258_v42 = vld [vmem:[%s4174_s22 + $0x1fc0] sm:$0xff] }
 0x25f   : > { %v3700_v45 = vpack.c.bf16 %v1265_v38, %v1261_v37  ;;  %v3190_v49 = vpack.c.bf16 %v1262_v43, %v1258_v42 }
 0x260   : > { %3171 = vmatpush1.bf16.msra.mxu0 %v3170_v50  ;;  %v3702_v50 = vpack.c.bf16 %v1264_v48, %v1260_v47 }
 0x261   : > { %3683 = vmatpush1.bf16.msra.mxu1 %v3682_v60  ;;  %3173 = vmatprep.subr.bf16.mxu0 %v3172_v52  ;;  %v3804_v60 = vld [vmem:[#allocation2 + $0x8] sm:$0xff] }
 0x262   : > { %3685 = vmatprep.subr.bf16.mxu1 %v3684_v55  ;;  %v1328_v52 = vrot.slane %v3804_v60, %v1295_v35  ;;  %v1353_v55 = vrot.slane %v1266_v51, %v4323_v10 }
 0x264   : > { %3175 = vmatpush1.bf16.msra.mxu0 %v3174_v6 }
 0x265   : > { %3687 = vmatpush1.bf16.msra.mxu1 %v3686_v63  ;;  %3177 = vmatprep.subr.bf16.mxu0 %v3176_v62 }
 0x266   : > { %3689 = vmatprep.subr.bf16.mxu1 %v3688_v3 }
 0x268   : > { %3179 = vmatpush1.bf16.msra.mxu0 %v3178_v12 }
 0x269   : > { %3691 = vmatpush1.bf16.msra.mxu1 %v3690_v13  ;;  %3181 = vmatprep.subr.bf16.mxu0 %v3180_v14 }
 0x26a   : > { %3693 = vmatprep.subr.bf16.mxu1 %v3692_v18 }
 0x26c   : > { %3183 = vmatpush1.bf16.msra.mxu0 %v3182_v26 }
 0x26d   : > { %3695 = vmatpush1.bf16.msra.mxu1 %v3694_v44  ;;  %3185 = vmatprep.subr.bf16.mxu0 %v3184_v27 }
 0x26e   : > { %3697 = vmatprep.subr.bf16.mxu1 %v3696_v31 }
 0x270   : > { %3187 = vmatpush1.bf16.msra.mxu0 %v3186_v39 }
 0x271   : > { %3699 = vmatpush1.bf16.msra.mxu1 %v3698_v40  ;;  %3189 = vmatprep.subr.bf16.mxu0 %v3188_v41 }
 0x272   : > { %3701 = vmatprep.subr.bf16.mxu1 %v3700_v45 }
 0x274   : > { %3191 = vmatpush1.bf16.msra.mxu0 %v3190_v49 }
 0x275   : > { %3703 = vmatpush1.bf16.msra.mxu1 %v3702_v50 }
 0x277   : > { %1932 = vmatmul.mubr.f32.vlgmr.msra.gmra.mrb[0].mxu0 %v1328_v52 }
 0x278   : > { %2500 = vmatmul.mubr.f32.vlgmr.msra.gmra.mrb[0].mxu1 %v1328_v52 }
 0x34a   : > { %v1933_v35 = vpop.f32.mrb[0].mxu0 }
 0x34b   : > { %v3704_v61 = vadd.f32 %v1933_v35, %v1353_v55  ;;  %v2501_v6 = vpop.f32.mrb[0].mxu1  ;;  %v1935_v63 = vpop.f32.mrb[1].mxu0 }
 0x34c   : > { %v3706_v62 = vadd.f32 %v2501_v6, %v1361_v56  ;;  %v3705_v0 = vadd.f32 %v1935_v63, %v1357_v57  ;;  %v2503_v2 = vpop.f32.mrb[1].mxu1 }
 0x34d   : > { %v3707_v3 = vadd.f32 %v2503_v2, %v1365_v58 }
 0x34e   : > { %v2510_v10 = vcombine.low %v3704_v61, %v3705_v0 }
 0x34f   : > { %v2511_v33 = vcombine.low %v3706_v62, %v3707_v3 }
 0x350   : > { %v2518_v4 = vrot.slane %v2510_v10, %v2517_v1 }
 0x351   : > { %v2525_v8 = vrot.slane %v2511_v33, %v2517_v1 }
 0x353   : > { %v2526_v22 = vcombine.low %v2518_v4, %v2525_v8 }
 0x355   : > { %v2533_v19 = vrot.slane %v2526_v22, %v2517_v1 }
 0x357   : > { %2539 = vst.msk [vmem:[%s236_s10] sm:$0xf] %vm2537_vm0, %v2533_v19 }
 0x358   : > { %3906 = shalt.err (!%p3903_p1)
}
 0x359   : > { %s3907_s8 = scalar_lea.hbm %s5281_s11, 64  ;;  %s3911_s29 = scalar_lea.hbm %s5328_s3, 128 }
 0x35a   : > { %p3908_p6 = scmp.ne.s32.totalorder %s5281_s11, %s3907_s8  ;;  %p3912_p7 = scmp.lt.u32.totalorder %s5281_s11, %s5328_s3 }
 0x35b   : > { %p3913_p9 = scmp.lt.u32.totalorder %s3911_s29, %s3907_s8  ;;  %p3915_p12 = scmp.lt.u32.totalorder %s3907_s8, %s5281_s11 }
 0x35c   : > { %p3909_p5 = pnand %p3908_p6, %p5349_p4 }
 0x35d   : > { %p3914_p10 = por %p3913_p9, %p3912_p7 }
 0x35e   : > { %p3910_p2 = pneg %p3909_p5 }
 0x35f   : > { %p3916_p0 = por %p3915_p12, %p3914_p10 }
 0x361   : > { %p3917_p11 = pnand %p3916_p0, %p3910_p2 }
 0x363   : > { %3920 = shalt.err (!%p3917_p11)
}
 0x364   : > { %3744 = dma.vmem_to_hbm [thread:$0]  (%p5349_p4), %s5283_s20, 64, %s5281_s11, %s2541_s5  }
 0x365 PF: > { %s2567_s30 = sand.u32 1, %s3951_s12   ;;  %p5350_p13 = scmp.ne.s32.totalorder %s5339_s28, 0 }
 0x366   : > { %p5351_p3 = scmp.ge.s32.totalorder %s3963_s15, 2  ;;  %s2568_s27 = scalar_lea.sflag [#allocation4], %s2567_s30 }
 0x368   : > { %p3758_p8 = pnand %p5351_p3, %p5350_p13 }
 0x36a   : > { %3946 = dma.done.wait (!%p3758_p8), %s2568_s27, 64  }
 0x36b   : > { %3948 = vsyncadd (!%p3758_p8), %s2568_s27, 4294967232  ;;  %p17_p1 = scmp.ge.s32.totalorder %s4014_s16, 4   ;;  %s5352_s12 = smov %s3955_s13 }
 0x36c   : > { %s5353_s13 = smov %s3959_s14  ;;  %s5354_s14 = smov %s4025_s19 }
 0x36d   : > { %s5355_s15 = smov %s4014_s16  ;;  %19 = sbr.rel (!%p17_p1) target bundleno = 6 (0x6), region = 93 }
 0x374   :  { %2573 = vsyncpa [#allocation3], 1 }
 0x375   :  { %2575 = vsyncpa [#allocation3 + $0x1], 1 }
 0x376   :  { %2576 = vsyncpa [#allocation6], 1 }
 0x377   :  { %2578 = vsyncpa [#allocation6 + $0x1], 1 }
 0x378   :  { %2579 = vsyncpa [#allocation4], 1 }
 0x379   :  { %2581 = vsyncpa [#allocation4 + $0x1], 1 }

</bundles_post_ra>
